<compile_context>
chip_gen: v6e
topology: v6e:2x2x1
jax: 0.10.0
libtpu: 0.0.40
codegen_flags: <defaults>
</compile_context>

<pallas_src>
import math
import jax
import jax.numpy as jnp
from jax.experimental import pallas as pl
from jax.experimental.pallas import tpu as pltpu

# ----------------------------- configuration ------------------------------
IMG = 16          # img_size
PS = 4            # patch_size
CH = 4            # channel
EMB = 32          # emb_size
LABELS = 10       # label_num
DIT_NUM = 2       # number of DiT blocks
HEAD = 2          # heads (per-head dim == emb_size, as in the reference DiTBlock)
BATCH = 2

PC = IMG // PS            # patch_count
SEQ = PC * PC             # tokens per image
CPP = CH * PS * PS        # channel * patch_size**2
FF = 4 * EMB
LN_EPS = 1e-5

# ------------------------- slab index bookkeeping ---------------------------
# matE slab: every (EMB, EMB) matrix in the model.
M_T1, M_T2 = 0, 1                 # time-embedding MLP layers
M_BLK = 2                         # first per-block matrix
M_MOD = 0                         # 6 adaLN linears: gamma1, beta1, alpha1, gamma2, beta2, alpha2
M_WQ = 6                          # HEAD query mats
M_WK = 6 + HEAD                   # HEAD key mats
M_WV = 6 + 2 * HEAD               # HEAD value mats
M_WO = 6 + 3 * HEAD               # HEAD output-projection row-blocks
M_PER_BLK = 6 + 4 * HEAD
NM = M_BLK + DIT_NUM * M_PER_BLK

# vecE slab: every (1, EMB) vector in the model.
V_FREQ, V_T1B, V_T2B, V_LNW, V_LNB = 0, 1, 2, 3, 4
V_BLK = 5                         # first per-block vector
V_LN1W, V_LN1B, V_LN2W, V_LN2B = 0, 1, 2, 3
V_MODB = 4                        # 6 adaLN biases
V_BQ = 10
V_BK = 10 + HEAD
V_BV = 10 + 2 * HEAD
V_LOB = 10 + 3 * HEAD
V_F2B = V_LOB + 1
V_PER_BLK = V_F2B + 1
NV = V_BLK + DIT_NUM * V_PER_BLK


# ------------------------------- kernel ------------------------------------
def _layernorm(v, w, b):
    mu = jnp.mean(v, axis=-1, keepdims=True)
    var = jnp.mean(jnp.square(v - mu), axis=-1, keepdims=True)
    return (v - mu) * jax.lax.rsqrt(var + LN_EPS) * w + b


def dit_fused_kernel(cond_ref, xp_ref, pemb_ref, matE_ref, vecE_ref,
                     f1wb_ref, f2w_ref, outwb_ref, o_ref):
    f32 = jnp.float32
    tok = xp_ref.shape[0]
    bs = tok // SEQ

    def mat(i):                     # (EMB, EMB) matrix from the square-matrix slab
        return matE_ref[i]

    def vec(i):                     # (1, EMB) row from the vector slab
        return vecE_ref[i]

    # ---- conditioning: sinusoidal time embedding -> MLP, plus label emb ----
    ht = cond_ref[0] * vec(V_FREQ)                        # (bs, EMB); row b = t_b
    col = jax.lax.broadcasted_iota(jnp.int32, ht.shape, 1)
    temb = jnp.where(col < (EMB // 2), jnp.sin(ht), jnp.cos(ht))
    th = jnp.maximum(jnp.dot(temb, mat(M_T1), preferred_element_type=f32)
                     + vec(V_T1B), 0.0)
    temb = jnp.dot(th, mat(M_T2), preferred_element_type=f32) + vec(V_T2B)
    cond = cond_ref[1] + temb                             # (bs, EMB) label + time emb

    # ---- patch embedding (conv folded into projection) + positional emb ----
    pw = pemb_ref[0][:CPP, :]                             # folded conv @ patch_emb weight
    posb = pemb_ref[1][:tok, :]                           # (pos + folded bias), tiled over batch
    x = jnp.dot(xp_ref[...], pw, preferred_element_type=f32) + posb     # (tok, EMB)

    # Reference DiTBlock: attn = q@k^T / sqrt(q.size(2)); q is (bs, head, seq, emb)
    # after the permute, so the scale is 1/sqrt(seq_len).
    inv_scale = 1.0 / math.sqrt(SEQ)

    for d in range(DIT_NUM):
        mb = M_BLK + d * M_PER_BLK
        vb = V_BLK + d * V_PER_BLK

        def modl(j):                                      # j-th adaLN linear on cond
            return (jnp.dot(cond, mat(mb + M_MOD + j), preferred_element_type=f32)
                    + vec(vb + V_MODB + j))               # (bs, EMB)
        sc1, sh1, al1, sc2, sh2, al2 = [modl(j) for j in range(6)]

        # --- attention branch ---
        ln1 = _layernorm(x, vec(vb + V_LN1W), vec(vb + V_LN1B))          # (tok, EMB)
        chunks = []
        for b in range(bs):
            yb = (ln1[b * SEQ:(b + 1) * SEQ, :] * (1.0 + sc1[b:b + 1, :])
                  + sh1[b:b + 1, :])                                     # (SEQ, EMB)
            acc = jnp.zeros((SEQ, EMB), f32)
            for h in range(HEAD):
                q = (jnp.dot(yb, mat(mb + M_WQ + h), preferred_element_type=f32)
                     + vec(vb + V_BQ + h))
                k = (jnp.dot(yb, mat(mb + M_WK + h), preferred_element_type=f32)
                     + vec(vb + V_BK + h))
                v = (jnp.dot(yb, mat(mb + M_WV + h), preferred_element_type=f32)
                     + vec(vb + V_BV + h))
                s = jax.lax.dot_general(q, k, (((1,), (1,)), ((), ())),
                                        preferred_element_type=f32) * inv_scale
                p = jnp.exp(s - jnp.max(s, axis=-1, keepdims=True))
                p = p / jnp.sum(p, axis=-1, keepdims=True)               # exact softmax
                # per-head output projection summed (no head concat)
                acc = acc + jnp.dot(jnp.dot(p, v, preferred_element_type=f32),
                                    mat(mb + M_WO + h), preferred_element_type=f32)
            chunks.append((acc + vec(vb + V_LOB)) * al1[b:b + 1, :])
        x = x + jnp.concatenate(chunks, axis=0)                          # residual 1

        # --- feed-forward branch (matmuls flattened over the whole batch) ---
        ln2 = _layernorm(x, vec(vb + V_LN2W), vec(vb + V_LN2B))          # (tok, EMB)
        z = jnp.concatenate(
            [ln2[b * SEQ:(b + 1) * SEQ, :] * (1.0 + sc2[b:b + 1, :]) + sh2[b:b + 1, :]
             for b in range(bs)], axis=0)                                # (tok, EMB)
        f1 = f1wb_ref[d]                                                 # (EMB+8, FF): W | bias row
        hmid = jnp.maximum(jnp.dot(z, f1[:EMB, :], preferred_element_type=f32)
                           + f1[EMB:EMB + 1, :], 0.0)                    # (tok, FF)
        ff = jnp.dot(hmid, f2w_ref[d], preferred_element_type=f32) + vec(vb + V_F2B)
        x = x + jnp.concatenate(
            [ff[b * SEQ:(b + 1) * SEQ, :] * al2[b:b + 1, :] for b in range(bs)],
            axis=0)                                                      # residual 2

    # ---- final LN + output projection ----
    yfin = _layernorm(x, vec(V_LNW), vec(V_LNB))
    owb = outwb_ref[...]                                                 # (EMB+8, CPP): W | bias row
    o_ref[...] = (jnp.dot(yfin, owb[:EMB, :], preferred_element_type=f32)
                  + owb[EMB:EMB + 1, :])


# ------------------------------ pallas wrapper ------------------------------
def _full_spec(shape):
    """Full-array block (single grid step), constant block index."""
    nd = len(shape)
    return pl.BlockSpec(shape, lambda i, _nd=nd: (0,) * _nd)


def dit_pallas(cond_in, xp, pemb, p):
    tok = xp.shape[0]
    operands = (cond_in, xp, pemb, p["matE"], p["vecE"], p["f1wb"], p["f2w"], p["outwb"])
    return pl.pallas_call(
        dit_fused_kernel,
        out_shape=jax.ShapeDtypeStruct((tok, CPP), jnp.float32),
        grid=(1,),                                   # single step: whole batch in one invocation
        in_specs=[_full_spec(o.shape) for o in operands],
        out_specs=_full_spec((tok, CPP)),
        compiler_params=pltpu.CompilerParams(dimension_semantics=("arbitrary",)),
    )(*operands)


# ------------------------------ parameters ----------------------------------
def init_params(key):
    keys = iter(jax.random.split(key, 256))

    def nrm(shape, scale=0.02):
        return jax.random.normal(next(keys), shape, jnp.float32) * scale

    p = {}

    # patchify conv (k=PS, stride=PS) as a matmul over (c, ki, kj)-flattened patches,
    # folded offline with the patch-embedding linear (both affine).
    conv_w, conv_b = nrm((CPP, CPP)), nrm((1, CPP))
    pe_w, pe_b = nrm((CPP, EMB)), nrm((1, EMB))
    p["pw"] = conv_w @ pe_w                               # (CPP, EMB)
    pb = conv_b @ pe_w + pe_b                             # (1, EMB)
    pos = jax.random.uniform(next(keys), (SEQ, EMB), jnp.float32)   # torch.rand parameter
    p["posb1"] = pos + pb                                 # positional emb with folded bias

    p["label_emb"] = nrm((LABELS, EMB))

    mats = [None] * NM
    vecs = [None] * NV

    mats[M_T1] = nrm((EMB, EMB)); vecs[V_T1B] = nrm((1, EMB))
    mats[M_T2] = nrm((EMB, EMB)); vecs[V_T2B] = nrm((1, EMB))
    half = EMB // 2
    half_emb = jnp.exp(jnp.arange(half, dtype=jnp.float32)
                       * (-math.log(10000.0) / (half - 1)))
    vecs[V_FREQ] = jnp.concatenate([half_emb, half_emb]).reshape(1, EMB)
    vecs[V_LNW] = jnp.ones((1, EMB), jnp.float32)
    vecs[V_LNB] = jnp.zeros((1, EMB), jnp.float32)

    f1wb, f2w = [], []
    for d in range(DIT_NUM):
        mb = M_BLK + d * M_PER_BLK
        vb = V_BLK + d * V_PER_BLK
        for j in range(6):                                # adaLN: gamma1,beta1,alpha1,gamma2,beta2,alpha2
            mats[mb + M_MOD + j] = nrm((EMB, EMB))
            vecs[vb + V_MODB + j] = nrm((1, EMB))
        for h in range(HEAD):                             # per-head Q/K/V and out-proj row block
            mats[mb + M_WQ + h] = nrm((EMB, EMB)); vecs[vb + V_BQ + h] = nrm((1, EMB))
            mats[mb + M_WK + h] = nrm((EMB, EMB)); vecs[vb + V_BK + h] = nrm((1, EMB))
            mats[mb + M_WV + h] = nrm((EMB, EMB)); vecs[vb + V_BV + h] = nrm((1, EMB))
            mats[mb + M_WO + h] = nrm((EMB, EMB))
        vecs[vb + V_LOB] = nrm((1, EMB))
        vecs[vb + V_LN1W] = jnp.ones((1, EMB), jnp.float32)
        vecs[vb + V_LN1B] = jnp.zeros((1, EMB), jnp.float32)
        vecs[vb + V_LN2W] = jnp.ones((1, EMB), jnp.float32)
        vecs[vb + V_LN2B] = jnp.zeros((1, EMB), jnp.float32)
        vecs[vb + V_F2B] = nrm((1, EMB))
        # FFN weights; bias packed as row EMB (rows EMB+1.. are zero padding)
        f1wb.append(jnp.concatenate([nrm((EMB, FF)), nrm((1, FF)),
                                     jnp.zeros((7, FF), jnp.float32)], axis=0))
        f2w.append(nrm((FF, EMB)))

    p["matE"] = jnp.stack(mats, axis=0)                   # (NM, EMB, EMB)
    p["vecE"] = jnp.stack(vecs, axis=0)                   # (NV, 1, EMB)
    p["f1wb"] = jnp.stack(f1wb, axis=0)                   # (DIT_NUM, EMB+8, FF)
    p["f2w"] = jnp.stack(f2w, axis=0)                     # (DIT_NUM, FF, EMB)
    p["outwb"] = jnp.concatenate([nrm((EMB, CPP)), nrm((1, CPP)),
                                  jnp.zeros((7, CPP), jnp.float32)], axis=0)  # (EMB+8, CPP)
    return p


# ------------------------------- forward ------------------------------------
def dit_forward(params, x, t, y):
    bs = x.shape[0]
    tok = bs * SEQ
    # patchify (im2col): conv(k=PS, stride=PS) -> permute(0,2,3,1) -> view(bs, SEQ, CPP),
    # flattened over batch so the in-kernel matmuls operate on M = bs*SEQ rows.
    xp = (x.reshape(bs, CH, PC, PS, PC, PS)
            .transpose(0, 2, 4, 1, 3, 5)
            .reshape(tok, CPP))

    # conditioning inputs: [0] = t broadcast across EMB lanes, [1] = label embedding (gather)
    t_rows = jnp.broadcast_to(t.astype(jnp.float32)[:, None], (bs, EMB))
    cond_in = jnp.stack([t_rows, params["label_emb"][y]], axis=0)        # (2, bs, EMB)

    # patch-embedding slab: [0] = folded conv@patch_emb weight, [1] = (pos + bias) tiled per batch
    posb = jnp.tile(params["posb1"], (bs, 1))                            # (tok, EMB)
    rows = max(CPP, tok)
    pemb = jnp.stack([
        jnp.pad(params["pw"], ((0, rows - CPP), (0, 0))),
        jnp.pad(posb, ((0, rows - tok), (0, 0))),
    ], axis=0)                                                           # (2, rows, EMB)

    outp = dit_pallas(cond_in, xp, pemb, params)                         # (tok, CPP)

    # unpatchify: view(bs,pc,pc,c,p,p) -> permute(0,3,1,2,4,5) -> permute(0,1,2,4,3,5) -> reshape
    out = (outp.reshape(bs, PC, PC, CH, PS, PS)
               .transpose(0, 3, 1, 4, 2, 5)
               .reshape(bs, CH, PC * PS, PC * PS))
    return out


# --------------------------------- main --------------------------------------
if __name__ == "__main__":
    key = jax.random.PRNGKey(0)
    kp, kx, kt, ky = jax.random.split(key, 4)
    params = init_params(kp)

    x = jax.random.normal(kx, (BATCH, CH, IMG, IMG), jnp.float32)
    t = jax.random.randint(kt, (BATCH,), 0, 1000).astype(jnp.float32)
    y = jax.random.randint(ky, (BATCH,), 0, LABELS)

    fwd = jax.jit(dit_forward)
    out = fwd(params, x, t, y)
    out = jax.block_until_ready(out)

    assert out.shape == (BATCH, CH, IMG, IMG), out.shape
    assert bool(jnp.all(jnp.isfinite(out)))
    print("KERNEL_OK")
</pallas_src>

<mosaic_0001>
module attributes {stable_mosaic.version = 11 : i64} {
  func.func @dit_fused_kernel(%arg0: i32, %arg1: memref<2x2x32xf32, #tpu.memory_space<vmem>>, %arg2: memref<32x64xf32, #tpu.memory_space<vmem>>, %arg3: memref<2x64x32xf32, #tpu.memory_space<vmem>>, %arg4: memref<30x32x32xf32, #tpu.memory_space<vmem>>, %arg5: memref<41x1x32xf32, #tpu.memory_space<vmem>>, %arg6: memref<2x40x128xf32, #tpu.memory_space<vmem>>, %arg7: memref<2x128x32xf32, #tpu.memory_space<vmem>>, %arg8: memref<40x64xf32, #tpu.memory_space<vmem>>, %arg9: memref<32x64xf32, #tpu.memory_space<vmem>>) attributes {dimension_semantics = [#tpu.dimension_semantics<arbitrary>], iteration_bounds = array<i64: 1>, scalar_prefetch = 0 : i64, scratch_operands = 0 : i64, tpu.core_type = #tpu.core_type<tc>, window_params = [{pipeline_mode = #tpu.pipeline_mode<synchronous>, transform_indices = @transform_0, window_bounds = array<i64: 2, 2, 32>}, {pipeline_mode = #tpu.pipeline_mode<synchronous>, transform_indices = @transform_1, window_bounds = array<i64: 32, 64>}, {pipeline_mode = #tpu.pipeline_mode<synchronous>, transform_indices = @transform_2, window_bounds = array<i64: 2, 64, 32>}, {pipeline_mode = #tpu.pipeline_mode<synchronous>, transform_indices = @transform_3, window_bounds = array<i64: 30, 32, 32>}, {pipeline_mode = #tpu.pipeline_mode<synchronous>, transform_indices = @transform_4, window_bounds = array<i64: 41, 1, 32>}, {pipeline_mode = #tpu.pipeline_mode<synchronous>, transform_indices = @transform_5, window_bounds = array<i64: 2, 40, 128>}, {pipeline_mode = #tpu.pipeline_mode<synchronous>, transform_indices = @transform_6, window_bounds = array<i64: 2, 128, 32>}, {pipeline_mode = #tpu.pipeline_mode<synchronous>, transform_indices = @transform_7, window_bounds = array<i64: 40, 64>}, {pipeline_mode = #tpu.pipeline_mode<synchronous>, transform_indices = @transform_8, window_bounds = array<i64: 32, 64>}]} {
    %c0 = arith.constant 0 : index
    %c0_0 = arith.constant 0 : index
    %c0_1 = arith.constant 0 : index
    %0 = vector.load %arg1[%c0, %c0_0, %c0_1] : memref<2x2x32xf32, #tpu.memory_space<vmem>>, vector<1x2x32xf32>
    %1 = vector.shape_cast %0 : vector<1x2x32xf32> to vector<2x32xf32>
    %c0_2 = arith.constant 0 : index
    %c0_3 = arith.constant 0 : index
    %c0_4 = arith.constant 0 : index
    %2 = vector.load %arg5[%c0_2, %c0_3, %c0_4] : memref<41x1x32xf32, #tpu.memory_space<vmem>>, vector<1x1x32xf32>
    %3 = vector.shape_cast %2 : vector<1x1x32xf32> to vector<1x32xf32>
    %4 = vector.broadcast %3 : vector<1x32xf32> to vector<2x32xf32>
    %5 = arith.mulf %1, %4 : vector<2x32xf32>
    %6 = tpu.iota {dimensions = array<i32: 1>} : vector<2x32xi32>
    %c16_i32 = arith.constant 16 : i32
    %7 = vector.broadcast %c16_i32 : i32 to vector<2x32xi32>
    %8 = arith.cmpi slt, %6, %7 : vector<2x32xi32>
    %9 = math.sin %5 : vector<2x32xf32>
    %10 = math.cos %5 : vector<2x32xf32>
    %11 = arith.select %8, %9, %10 : vector<2x32xi1>, vector<2x32xf32>
    %c0_5 = arith.constant 0 : index
    %c0_6 = arith.constant 0 : index
    %c0_7 = arith.constant 0 : index
    %12 = vector.load %arg4[%c0_5, %c0_6, %c0_7] : memref<30x32x32xf32, #tpu.memory_space<vmem>>, vector<1x32x32xf32>
    %13 = vector.shape_cast %12 : vector<1x32x32xf32> to vector<32x32xf32>
    %cst = arith.constant dense<0.000000e+00> : vector<2x32xf32>
    %14 = tpu.matmul %11, %13, %cst {dimension_numbers = #tpu.dot_dimension_numbers<[1], [0], [0], [1], [0, 0, 1, 1], [], []>} : vector<2x32xf32>, vector<32x32xf32>, vector<2x32xf32> -> vector<2x32xf32>
    %c1 = arith.constant 1 : index
    %c0_8 = arith.constant 0 : index
    %c0_9 = arith.constant 0 : index
    %15 = vector.load %arg5[%c1, %c0_8, %c0_9] : memref<41x1x32xf32, #tpu.memory_space<vmem>>, vector<1x1x32xf32>
    %16 = vector.shape_cast %15 : vector<1x1x32xf32> to vector<1x32xf32>
    %17 = vector.broadcast %16 : vector<1x32xf32> to vector<2x32xf32>
    %18 = arith.addf %14, %17 : vector<2x32xf32>
    %cst_10 = arith.constant 0.000000e+00 : f32
    %19 = vector.broadcast %cst_10 : f32 to vector<2x32xf32>
    %20 = arith.maximumf %18, %19 : vector<2x32xf32>
    %c1_11 = arith.constant 1 : index
    %c0_12 = arith.constant 0 : index
    %c0_13 = arith.constant 0 : index
    %21 = vector.load %arg4[%c1_11, %c0_12, %c0_13] : memref<30x32x32xf32, #tpu.memory_space<vmem>>, vector<1x32x32xf32>
    %22 = vector.shape_cast %21 : vector<1x32x32xf32> to vector<32x32xf32>
    %cst_14 = arith.constant dense<0.000000e+00> : vector<2x32xf32>
    %23 = tpu.matmul %20, %22, %cst_14 {dimension_numbers = #tpu.dot_dimension_numbers<[1], [0], [0], [1], [0, 0, 1, 1], [], []>} : vector<2x32xf32>, vector<32x32xf32>, vector<2x32xf32> -> vector<2x32xf32>
    %c2 = arith.constant 2 : index
    %c0_15 = arith.constant 0 : index
    %c0_16 = arith.constant 0 : index
    %24 = vector.load %arg5[%c2, %c0_15, %c0_16] : memref<41x1x32xf32, #tpu.memory_space<vmem>>, vector<1x1x32xf32>
    %25 = vector.shape_cast %24 : vector<1x1x32xf32> to vector<1x32xf32>
    %26 = vector.broadcast %25 : vector<1x32xf32> to vector<2x32xf32>
    %27 = arith.addf %23, %26 : vector<2x32xf32>
    %c1_17 = arith.constant 1 : index
    %c0_18 = arith.constant 0 : index
    %c0_19 = arith.constant 0 : index
    %28 = vector.load %arg1[%c1_17, %c0_18, %c0_19] : memref<2x2x32xf32, #tpu.memory_space<vmem>>, vector<1x2x32xf32>
    %29 = vector.shape_cast %28 : vector<1x2x32xf32> to vector<2x32xf32>
    %30 = arith.addf %29, %27 : vector<2x32xf32>
    %c0_20 = arith.constant 0 : index
    %c0_21 = arith.constant 0 : index
    %c0_22 = arith.constant 0 : index
    %31 = vector.load %arg3[%c0_20, %c0_21, %c0_22] : memref<2x64x32xf32, #tpu.memory_space<vmem>>, vector<1x64x32xf32>
    %32 = vector.shape_cast %31 : vector<1x64x32xf32> to vector<64x32xf32>
    %c1_23 = arith.constant 1 : index
    %c0_24 = arith.constant 0 : index
    %c0_25 = arith.constant 0 : index
    %33 = vector.load %arg3[%c1_23, %c0_24, %c0_25] : memref<2x64x32xf32, #tpu.memory_space<vmem>>, vector<1x64x32xf32>
    %34 = vector.shape_cast %33 : vector<1x64x32xf32> to vector<64x32xf32>
    %35 = vector.extract_strided_slice %34 {offsets = [0, 0], sizes = [32, 32], strides = [1, 1]} : vector<64x32xf32> to vector<32x32xf32>
    %c0_26 = arith.constant 0 : index
    %c0_27 = arith.constant 0 : index
    %36 = vector.load %arg2[%c0_26, %c0_27] : memref<32x64xf32, #tpu.memory_space<vmem>>, vector<32x64xf32>
    %cst_28 = arith.constant dense<0.000000e+00> : vector<32x32xf32>
    %37 = tpu.matmul %36, %32, %cst_28 {dimension_numbers = #tpu.dot_dimension_numbers<[1], [0], [0], [1], [0, 0, 1, 1], [], []>} : vector<32x64xf32>, vector<64x32xf32>, vector<32x32xf32> -> vector<32x32xf32>
    %38 = arith.addf %37, %35 : vector<32x32xf32>
    %c2_29 = arith.constant 2 : index
    %c0_30 = arith.constant 0 : index
    %c0_31 = arith.constant 0 : index
    %39 = vector.load %arg4[%c2_29, %c0_30, %c0_31] : memref<30x32x32xf32, #tpu.memory_space<vmem>>, vector<1x32x32xf32>
    %40 = vector.shape_cast %39 : vector<1x32x32xf32> to vector<32x32xf32>
    %cst_32 = arith.constant dense<0.000000e+00> : vector<2x32xf32>
    %41 = tpu.matmul %30, %40, %cst_32 {dimension_numbers = #tpu.dot_dimension_numbers<[1], [0], [0], [1], [0, 0, 1, 1], [], []>} : vector<2x32xf32>, vector<32x32xf32>, vector<2x32xf32> -> vector<2x32xf32>
    %c9 = arith.constant 9 : index
    %c0_33 = arith.constant 0 : index
    %c0_34 = arith.constant 0 : index
    %42 = vector.load %arg5[%c9, %c0_33, %c0_34] : memref<41x1x32xf32, #tpu.memory_space<vmem>>, vector<1x1x32xf32>
    %43 = vector.shape_cast %42 : vector<1x1x32xf32> to vector<1x32xf32>
    %44 = vector.broadcast %43 : vector<1x32xf32> to vector<2x32xf32>
    %45 = arith.addf %41, %44 : vector<2x32xf32>
    %c3 = arith.constant 3 : index
    %c0_35 = arith.constant 0 : index
    %c0_36 = arith.constant 0 : index
    %46 = vector.load %arg4[%c3, %c0_35, %c0_36] : memref<30x32x32xf32, #tpu.memory_space<vmem>>, vector<1x32x32xf32>
    %47 = vector.shape_cast %46 : vector<1x32x32xf32> to vector<32x32xf32>
    %cst_37 = arith.constant dense<0.000000e+00> : vector<2x32xf32>
    %48 = tpu.matmul %30, %47, %cst_37 {dimension_numbers = #tpu.dot_dimension_numbers<[1], [0], [0], [1], [0, 0, 1, 1], [], []>} : vector<2x32xf32>, vector<32x32xf32>, vector<2x32xf32> -> vector<2x32xf32>
    %c10 = arith.constant 10 : index
    %c0_38 = arith.constant 0 : index
    %c0_39 = arith.constant 0 : index
    %49 = vector.load %arg5[%c10, %c0_38, %c0_39] : memref<41x1x32xf32, #tpu.memory_space<vmem>>, vector<1x1x32xf32>
    %50 = vector.shape_cast %49 : vector<1x1x32xf32> to vector<1x32xf32>
    %51 = vector.broadcast %50 : vector<1x32xf32> to vector<2x32xf32>
    %52 = arith.addf %48, %51 : vector<2x32xf32>
    %c4 = arith.constant 4 : index
    %c0_40 = arith.constant 0 : index
    %c0_41 = arith.constant 0 : index
    %53 = vector.load %arg4[%c4, %c0_40, %c0_41] : memref<30x32x32xf32, #tpu.memory_space<vmem>>, vector<1x32x32xf32>
    %54 = vector.shape_cast %53 : vector<1x32x32xf32> to vector<32x32xf32>
    %cst_42 = arith.constant dense<0.000000e+00> : vector<2x32xf32>
    %55 = tpu.matmul %30, %54, %cst_42 {dimension_numbers = #tpu.dot_dimension_numbers<[1], [0], [0], [1], [0, 0, 1, 1], [], []>} : vector<2x32xf32>, vector<32x32xf32>, vector<2x32xf32> -> vector<2x32xf32>
    %c11 = arith.constant 11 : index
    %c0_43 = arith.constant 0 : index
    %c0_44 = arith.constant 0 : index
    %56 = vector.load %arg5[%c11, %c0_43, %c0_44] : memref<41x1x32xf32, #tpu.memory_space<vmem>>, vector<1x1x32xf32>
    %57 = vector.shape_cast %56 : vector<1x1x32xf32> to vector<1x32xf32>
    %58 = vector.broadcast %57 : vector<1x32xf32> to vector<2x32xf32>
    %59 = arith.addf %55, %58 : vector<2x32xf32>
    %c5 = arith.constant 5 : index
    %c0_45 = arith.constant 0 : index
    %c0_46 = arith.constant 0 : index
    %60 = vector.load %arg4[%c5, %c0_45, %c0_46] : memref<30x32x32xf32, #tpu.memory_space<vmem>>, vector<1x32x32xf32>
    %61 = vector.shape_cast %60 : vector<1x32x32xf32> to vector<32x32xf32>
    %cst_47 = arith.constant dense<0.000000e+00> : vector<2x32xf32>
    %62 = tpu.matmul %30, %61, %cst_47 {dimension_numbers = #tpu.dot_dimension_numbers<[1], [0], [0], [1], [0, 0, 1, 1], [], []>} : vector<2x32xf32>, vector<32x32xf32>, vector<2x32xf32> -> vector<2x32xf32>
    %c12 = arith.constant 12 : index
    %c0_48 = arith.constant 0 : index
    %c0_49 = arith.constant 0 : index
    %63 = vector.load %arg5[%c12, %c0_48, %c0_49] : memref<41x1x32xf32, #tpu.memory_space<vmem>>, vector<1x1x32xf32>
    %64 = vector.shape_cast %63 : vector<1x1x32xf32> to vector<1x32xf32>
    %65 = vector.broadcast %64 : vector<1x32xf32> to vector<2x32xf32>
    %66 = arith.addf %62, %65 : vector<2x32xf32>
    %c6 = arith.constant 6 : index
    %c0_50 = arith.constant 0 : index
    %c0_51 = arith.constant 0 : index
    %67 = vector.load %arg4[%c6, %c0_50, %c0_51] : memref<30x32x32xf32, #tpu.memory_space<vmem>>, vector<1x32x32xf32>
    %68 = vector.shape_cast %67 : vector<1x32x32xf32> to vector<32x32xf32>
    %cst_52 = arith.constant dense<0.000000e+00> : vector<2x32xf32>
    %69 = tpu.matmul %30, %68, %cst_52 {dimension_numbers = #tpu.dot_dimension_numbers<[1], [0], [0], [1], [0, 0, 1, 1], [], []>} : vector<2x32xf32>, vector<32x32xf32>, vector<2x32xf32> -> vector<2x32xf32>
    %c13 = arith.constant 13 : index
    %c0_53 = arith.constant 0 : index
    %c0_54 = arith.constant 0 : index
    %70 = vector.load %arg5[%c13, %c0_53, %c0_54] : memref<41x1x32xf32, #tpu.memory_space<vmem>>, vector<1x1x32xf32>
    %71 = vector.shape_cast %70 : vector<1x1x32xf32> to vector<1x32xf32>
    %72 = vector.broadcast %71 : vector<1x32xf32> to vector<2x32xf32>
    %73 = arith.addf %69, %72 : vector<2x32xf32>
    %c7 = arith.constant 7 : index
    %c0_55 = arith.constant 0 : index
    %c0_56 = arith.constant 0 : index
    %74 = vector.load %arg4[%c7, %c0_55, %c0_56] : memref<30x32x32xf32, #tpu.memory_space<vmem>>, vector<1x32x32xf32>
    %75 = vector.shape_cast %74 : vector<1x32x32xf32> to vector<32x32xf32>
    %cst_57 = arith.constant dense<0.000000e+00> : vector<2x32xf32>
    %76 = tpu.matmul %30, %75, %cst_57 {dimension_numbers = #tpu.dot_dimension_numbers<[1], [0], [0], [1], [0, 0, 1, 1], [], []>} : vector<2x32xf32>, vector<32x32xf32>, vector<2x32xf32> -> vector<2x32xf32>
    %c14 = arith.constant 14 : index
    %c0_58 = arith.constant 0 : index
    %c0_59 = arith.constant 0 : index
    %77 = vector.load %arg5[%c14, %c0_58, %c0_59] : memref<41x1x32xf32, #tpu.memory_space<vmem>>, vector<1x1x32xf32>
    %78 = vector.shape_cast %77 : vector<1x1x32xf32> to vector<1x32xf32>
    %79 = vector.broadcast %78 : vector<1x32xf32> to vector<2x32xf32>
    %80 = arith.addf %76, %79 : vector<2x32xf32>
    %c5_60 = arith.constant 5 : index
    %c0_61 = arith.constant 0 : index
    %c0_62 = arith.constant 0 : index
    %81 = vector.load %arg5[%c5_60, %c0_61, %c0_62] : memref<41x1x32xf32, #tpu.memory_space<vmem>>, vector<1x1x32xf32>
    %82 = vector.shape_cast %81 : vector<1x1x32xf32> to vector<1x32xf32>
    %c6_63 = arith.constant 6 : index
    %c0_64 = arith.constant 0 : index
    %c0_65 = arith.constant 0 : index
    %83 = vector.load %arg5[%c6_63, %c0_64, %c0_65] : memref<41x1x32xf32, #tpu.memory_space<vmem>>, vector<1x1x32xf32>
    %84 = vector.shape_cast %83 : vector<1x1x32xf32> to vector<1x32xf32>
    %cst_66 = arith.constant dense<0.000000e+00> : vector<32xf32>
    %85 = vector.multi_reduction <add>, %38, %cst_66 [1] : vector<32x32xf32> to vector<32xf32>
    %86 = vector.shape_cast %85 : vector<32xf32> to vector<32x1xf32>
    %cst_67 = arith.constant 3.200000e+01 : f32
    %87 = vector.broadcast %cst_67 : f32 to vector<32x1xf32>
    %88 = arith.divf %86, %87 : vector<32x1xf32>
    %89 = vector.broadcast %88 : vector<32x1xf32> to vector<32x32xf32>
    %90 = arith.subf %38, %89 : vector<32x32xf32>
    %91 = arith.mulf %90, %90 : vector<32x32xf32>
    %cst_68 = arith.constant dense<0.000000e+00> : vector<32xf32>
    %92 = vector.multi_reduction <add>, %91, %cst_68 [1] : vector<32x32xf32> to vector<32xf32>
    %93 = vector.shape_cast %92 : vector<32xf32> to vector<32x1xf32>
    %cst_69 = arith.constant 3.200000e+01 : f32
    %94 = vector.broadcast %cst_69 : f32 to vector<32x1xf32>
    %95 = arith.divf %93, %94 : vector<32x1xf32>
    %96 = vector.broadcast %88 : vector<32x1xf32> to vector<32x32xf32>
    %97 = arith.subf %38, %96 : vector<32x32xf32>
    %cst_70 = arith.constant 9.99999974E-6 : f32
    %98 = vector.broadcast %cst_70 : f32 to vector<32x1xf32>
    %99 = arith.addf %95, %98 : vector<32x1xf32>
    %100 = math.rsqrt %99 : vector<32x1xf32>
    %101 = vector.broadcast %100 : vector<32x1xf32> to vector<32x32xf32>
    %102 = arith.mulf %97, %101 : vector<32x32xf32>
    %103 = vector.broadcast %82 : vector<1x32xf32> to vector<32x32xf32>
    %104 = arith.mulf %102, %103 : vector<32x32xf32>
    %105 = vector.broadcast %84 : vector<1x32xf32> to vector<32x32xf32>
    %106 = arith.addf %104, %105 : vector<32x32xf32>
    %107 = vector.extract_strided_slice %106 {offsets = [0, 0], sizes = [16, 32], strides = [1, 1]} : vector<32x32xf32> to vector<16x32xf32>
    %108 = vector.extract_strided_slice %45 {offsets = [0, 0], sizes = [1, 32], strides = [1, 1]} : vector<2x32xf32> to vector<1x32xf32>
    %cst_71 = arith.constant 1.000000e+00 : f32
    %109 = vector.broadcast %cst_71 : f32 to vector<1x32xf32>
    %110 = arith.addf %109, %108 : vector<1x32xf32>
    %111 = vector.broadcast %110 : vector<1x32xf32> to vector<16x32xf32>
    %112 = arith.mulf %107, %111 : vector<16x32xf32>
    %113 = vector.extract_strided_slice %52 {offsets = [0, 0], sizes = [1, 32], strides = [1, 1]} : vector<2x32xf32> to vector<1x32xf32>
    %114 = vector.broadcast %113 : vector<1x32xf32> to vector<16x32xf32>
    %115 = arith.addf %112, %114 : vector<16x32xf32>
    %cst_72 = arith.constant 0.000000e+00 : f32
    %116 = vector.broadcast %cst_72 : f32 to vector<16x32xf32>
    %c8 = arith.constant 8 : index
    %c0_73 = arith.constant 0 : index
    %c0_74 = arith.constant 0 : index
    %117 = vector.load %arg4[%c8, %c0_73, %c0_74] : memref<30x32x32xf32, #tpu.memory_space<vmem>>, vector<1x32x32xf32>
    %118 = vector.shape_cast %117 : vector<1x32x32xf32> to vector<32x32xf32>
    %cst_75 = arith.constant dense<0.000000e+00> : vector<16x32xf32>
    %119 = tpu.matmul %115, %118, %cst_75 {dimension_numbers = #tpu.dot_dimension_numbers<[1], [0], [0], [1], [0, 0, 1, 1], [], []>} : vector<16x32xf32>, vector<32x32xf32>, vector<16x32xf32> -> vector<16x32xf32>
    %c15 = arith.constant 15 : index
    %c0_76 = arith.constant 0 : index
    %c0_77 = arith.constant 0 : index
    %120 = vector.load %arg5[%c15, %c0_76, %c0_77] : memref<41x1x32xf32, #tpu.memory_space<vmem>>, vector<1x1x32xf32>
    %121 = vector.shape_cast %120 : vector<1x1x32xf32> to vector<1x32xf32>
    %122 = vector.broadcast %121 : vector<1x32xf32> to vector<16x32xf32>
    %123 = arith.addf %119, %122 : vector<16x32xf32>
    %c10_78 = arith.constant 10 : index
    %c0_79 = arith.constant 0 : index
    %c0_80 = arith.constant 0 : index
    %124 = vector.load %arg4[%c10_78, %c0_79, %c0_80] : memref<30x32x32xf32, #tpu.memory_space<vmem>>, vector<1x32x32xf32>
    %125 = vector.shape_cast %124 : vector<1x32x32xf32> to vector<32x32xf32>
    %cst_81 = arith.constant dense<0.000000e+00> : vector<16x32xf32>
    %126 = tpu.matmul %115, %125, %cst_81 {dimension_numbers = #tpu.dot_dimension_numbers<[1], [0], [0], [1], [0, 0, 1, 1], [], []>} : vector<16x32xf32>, vector<32x32xf32>, vector<16x32xf32> -> vector<16x32xf32>
    %c17 = arith.constant 17 : index
    %c0_82 = arith.constant 0 : index
    %c0_83 = arith.constant 0 : index
    %127 = vector.load %arg5[%c17, %c0_82, %c0_83] : memref<41x1x32xf32, #tpu.memory_space<vmem>>, vector<1x1x32xf32>
    %128 = vector.shape_cast %127 : vector<1x1x32xf32> to vector<1x32xf32>
    %129 = vector.broadcast %128 : vector<1x32xf32> to vector<16x32xf32>
    %130 = arith.addf %126, %129 : vector<16x32xf32>
    %c12_84 = arith.constant 12 : index
    %c0_85 = arith.constant 0 : index
    %c0_86 = arith.constant 0 : index
    %131 = vector.load %arg4[%c12_84, %c0_85, %c0_86] : memref<30x32x32xf32, #tpu.memory_space<vmem>>, vector<1x32x32xf32>
    %132 = vector.shape_cast %131 : vector<1x32x32xf32> to vector<32x32xf32>
    %cst_87 = arith.constant dense<0.000000e+00> : vector<16x32xf32>
    %133 = tpu.matmul %115, %132, %cst_87 {dimension_numbers = #tpu.dot_dimension_numbers<[1], [0], [0], [1], [0, 0, 1, 1], [], []>} : vector<16x32xf32>, vector<32x32xf32>, vector<16x32xf32> -> vector<16x32xf32>
    %c19 = arith.constant 19 : index
    %c0_88 = arith.constant 0 : index
    %c0_89 = arith.constant 0 : index
    %134 = vector.load %arg5[%c19, %c0_88, %c0_89] : memref<41x1x32xf32, #tpu.memory_space<vmem>>, vector<1x1x32xf32>
    %135 = vector.shape_cast %134 : vector<1x1x32xf32> to vector<1x32xf32>
    %136 = vector.broadcast %135 : vector<1x32xf32> to vector<16x32xf32>
    %137 = arith.addf %133, %136 : vector<16x32xf32>
    %cst_90 = arith.constant dense<0.000000e+00> : vector<16x16xf32>
    %138 = tpu.matmul %123, %130, %cst_90 {dimension_numbers = #tpu.dot_dimension_numbers<[1], [1], [0], [0], [0, 0, 1, 0], [], []>} : vector<16x32xf32>, vector<16x32xf32>, vector<16x16xf32> -> vector<16x16xf32>
    %cst_91 = arith.constant 2.500000e-01 : f32
    %139 = vector.broadcast %cst_91 : f32 to vector<16x16xf32>
    %140 = arith.mulf %138, %139 : vector<16x16xf32>
    %cst_92 = arith.constant dense<0xFF800000> : vector<16xf32>
    %141 = vector.multi_reduction <maximumf>, %140, %cst_92 [1] : vector<16x16xf32> to vector<16xf32>
    %142 = vector.shape_cast %141 : vector<16xf32> to vector<16x1xf32>
    %143 = vector.broadcast %142 : vector<16x1xf32> to vector<16x16xf32>
    %144 = arith.subf %140, %143 : vector<16x16xf32>
    %145 = math.exp %144 : vector<16x16xf32>
    %cst_93 = arith.constant dense<0.000000e+00> : vector<16xf32>
    %146 = vector.multi_reduction <add>, %145, %cst_93 [1] : vector<16x16xf32> to vector<16xf32>
    %147 = vector.shape_cast %146 : vector<16xf32> to vector<16x1xf32>
    %148 = vector.broadcast %147 : vector<16x1xf32> to vector<16x16xf32>
    %149 = arith.divf %145, %148 : vector<16x16xf32>
    %cst_94 = arith.constant dense<0.000000e+00> : vector<16x32xf32>
    %150 = tpu.matmul %149, %137, %cst_94 {dimension_numbers = #tpu.dot_dimension_numbers<[1], [0], [0], [1], [0, 0, 1, 1], [], []>} : vector<16x16xf32>, vector<16x32xf32>, vector<16x32xf32> -> vector<16x32xf32>
    %c14_95 = arith.constant 14 : index
    %c0_96 = arith.constant 0 : index
    %c0_97 = arith.constant 0 : index
    %151 = vector.load %arg4[%c14_95, %c0_96, %c0_97] : memref<30x32x32xf32, #tpu.memory_space<vmem>>, vector<1x32x32xf32>
    %152 = vector.shape_cast %151 : vector<1x32x32xf32> to vector<32x32xf32>
    %cst_98 = arith.constant dense<0.000000e+00> : vector<16x32xf32>
    %153 = tpu.matmul %150, %152, %cst_98 {dimension_numbers = #tpu.dot_dimension_numbers<[1], [0], [0], [1], [0, 0, 1, 1], [], []>} : vector<16x32xf32>, vector<32x32xf32>, vector<16x32xf32> -> vector<16x32xf32>
    %154 = arith.addf %116, %153 : vector<16x32xf32>
    %c9_99 = arith.constant 9 : index
    %c0_100 = arith.constant 0 : index
    %c0_101 = arith.constant 0 : index
    %155 = vector.load %arg4[%c9_99, %c0_100, %c0_101] : memref<30x32x32xf32, #tpu.memory_space<vmem>>, vector<1x32x32xf32>
    %156 = vector.shape_cast %155 : vector<1x32x32xf32> to vector<32x32xf32>
    %cst_102 = arith.constant dense<0.000000e+00> : vector<16x32xf32>
    %157 = tpu.matmul %115, %156, %cst_102 {dimension_numbers = #tpu.dot_dimension_numbers<[1], [0], [0], [1], [0, 0, 1, 1], [], []>} : vector<16x32xf32>, vector<32x32xf32>, vector<16x32xf32> -> vector<16x32xf32>
    %c16 = arith.constant 16 : index
    %c0_103 = arith.constant 0 : index
    %c0_104 = arith.constant 0 : index
    %158 = vector.load %arg5[%c16, %c0_103, %c0_104] : memref<41x1x32xf32, #tpu.memory_space<vmem>>, vector<1x1x32xf32>
    %159 = vector.shape_cast %158 : vector<1x1x32xf32> to vector<1x32xf32>
    %160 = vector.broadcast %159 : vector<1x32xf32> to vector<16x32xf32>
    %161 = arith.addf %157, %160 : vector<16x32xf32>
    %c11_105 = arith.constant 11 : index
    %c0_106 = arith.constant 0 : index
    %c0_107 = arith.constant 0 : index
    %162 = vector.load %arg4[%c11_105, %c0_106, %c0_107] : memref<30x32x32xf32, #tpu.memory_space<vmem>>, vector<1x32x32xf32>
    %163 = vector.shape_cast %162 : vector<1x32x32xf32> to vector<32x32xf32>
    %cst_108 = arith.constant dense<0.000000e+00> : vector<16x32xf32>
    %164 = tpu.matmul %115, %163, %cst_108 {dimension_numbers = #tpu.dot_dimension_numbers<[1], [0], [0], [1], [0, 0, 1, 1], [], []>} : vector<16x32xf32>, vector<32x32xf32>, vector<16x32xf32> -> vector<16x32xf32>
    %c18 = arith.constant 18 : index
    %c0_109 = arith.constant 0 : index
    %c0_110 = arith.constant 0 : index
    %165 = vector.load %arg5[%c18, %c0_109, %c0_110] : memref<41x1x32xf32, #tpu.memory_space<vmem>>, vector<1x1x32xf32>
    %166 = vector.shape_cast %165 : vector<1x1x32xf32> to vector<1x32xf32>
    %167 = vector.broadcast %166 : vector<1x32xf32> to vector<16x32xf32>
    %168 = arith.addf %164, %167 : vector<16x32xf32>
    %c13_111 = arith.constant 13 : index
    %c0_112 = arith.constant 0 : index
    %c0_113 = arith.constant 0 : index
    %169 = vector.load %arg4[%c13_111, %c0_112, %c0_113] : memref<30x32x32xf32, #tpu.memory_space<vmem>>, vector<1x32x32xf32>
    %170 = vector.shape_cast %169 : vector<1x32x32xf32> to vector<32x32xf32>
    %cst_114 = arith.constant dense<0.000000e+00> : vector<16x32xf32>
    %171 = tpu.matmul %115, %170, %cst_114 {dimension_numbers = #tpu.dot_dimension_numbers<[1], [0], [0], [1], [0, 0, 1, 1], [], []>} : vector<16x32xf32>, vector<32x32xf32>, vector<16x32xf32> -> vector<16x32xf32>
    %c20 = arith.constant 20 : index
    %c0_115 = arith.constant 0 : index
    %c0_116 = arith.constant 0 : index
    %172 = vector.load %arg5[%c20, %c0_115, %c0_116] : memref<41x1x32xf32, #tpu.memory_space<vmem>>, vector<1x1x32xf32>
    %173 = vector.shape_cast %172 : vector<1x1x32xf32> to vector<1x32xf32>
    %174 = vector.broadcast %173 : vector<1x32xf32> to vector<16x32xf32>
    %175 = arith.addf %171, %174 : vector<16x32xf32>
    %cst_117 = arith.constant dense<0.000000e+00> : vector<16x16xf32>
    %176 = tpu.matmul %161, %168, %cst_117 {dimension_numbers = #tpu.dot_dimension_numbers<[1], [1], [0], [0], [0, 0, 1, 0], [], []>} : vector<16x32xf32>, vector<16x32xf32>, vector<16x16xf32> -> vector<16x16xf32>
    %cst_118 = arith.constant 2.500000e-01 : f32
    %177 = vector.broadcast %cst_118 : f32 to vector<16x16xf32>
    %178 = arith.mulf %176, %177 : vector<16x16xf32>
    %cst_119 = arith.constant dense<0xFF800000> : vector<16xf32>
    %179 = vector.multi_reduction <maximumf>, %178, %cst_119 [1] : vector<16x16xf32> to vector<16xf32>
    %180 = vector.shape_cast %179 : vector<16xf32> to vector<16x1xf32>
    %181 = vector.broadcast %180 : vector<16x1xf32> to vector<16x16xf32>
    %182 = arith.subf %178, %181 : vector<16x16xf32>
    %183 = math.exp %182 : vector<16x16xf32>
    %cst_120 = arith.constant dense<0.000000e+00> : vector<16xf32>
    %184 = vector.multi_reduction <add>, %183, %cst_120 [1] : vector<16x16xf32> to vector<16xf32>
    %185 = vector.shape_cast %184 : vector<16xf32> to vector<16x1xf32>
    %186 = vector.broadcast %185 : vector<16x1xf32> to vector<16x16xf32>
    %187 = arith.divf %183, %186 : vector<16x16xf32>
    %cst_121 = arith.constant dense<0.000000e+00> : vector<16x32xf32>
    %188 = tpu.matmul %187, %175, %cst_121 {dimension_numbers = #tpu.dot_dimension_numbers<[1], [0], [0], [1], [0, 0, 1, 1], [], []>} : vector<16x16xf32>, vector<16x32xf32>, vector<16x32xf32> -> vector<16x32xf32>
    %c15_122 = arith.constant 15 : index
    %c0_123 = arith.constant 0 : index
    %c0_124 = arith.constant 0 : index
    %189 = vector.load %arg4[%c15_122, %c0_123, %c0_124] : memref<30x32x32xf32, #tpu.memory_space<vmem>>, vector<1x32x32xf32>
    %190 = vector.shape_cast %189 : vector<1x32x32xf32> to vector<32x32xf32>
    %cst_125 = arith.constant dense<0.000000e+00> : vector<16x32xf32>
    %191 = tpu.matmul %188, %190, %cst_125 {dimension_numbers = #tpu.dot_dimension_numbers<[1], [0], [0], [1], [0, 0, 1, 1], [], []>} : vector<16x32xf32>, vector<32x32xf32>, vector<16x32xf32> -> vector<16x32xf32>
    %192 = arith.addf %154, %191 : vector<16x32xf32>
    %c21 = arith.constant 21 : index
    %c0_126 = arith.constant 0 : index
    %c0_127 = arith.constant 0 : index
    %193 = vector.load %arg5[%c21, %c0_126, %c0_127] : memref<41x1x32xf32, #tpu.memory_space<vmem>>, vector<1x1x32xf32>
    %194 = vector.shape_cast %193 : vector<1x1x32xf32> to vector<1x32xf32>
    %195 = vector.broadcast %194 : vector<1x32xf32> to vector<16x32xf32>
    %196 = arith.addf %192, %195 : vector<16x32xf32>
    %197 = vector.extract_strided_slice %59 {offsets = [0, 0], sizes = [1, 32], strides = [1, 1]} : vector<2x32xf32> to vector<1x32xf32>
    %198 = vector.broadcast %197 : vector<1x32xf32> to vector<16x32xf32>
    %199 = arith.mulf %196, %198 : vector<16x32xf32>
    %200 = vector.extract_strided_slice %106 {offsets = [16, 0], sizes = [16, 32], strides = [1, 1]} : vector<32x32xf32> to vector<16x32xf32>
    %201 = vector.extract_strided_slice %45 {offsets = [1, 0], sizes = [1, 32], strides = [1, 1]} : vector<2x32xf32> to vector<1x32xf32>
    %cst_128 = arith.constant 1.000000e+00 : f32
    %202 = vector.broadcast %cst_128 : f32 to vector<1x32xf32>
    %203 = arith.addf %202, %201 : vector<1x32xf32>
    %204 = vector.broadcast %203 : vector<1x32xf32> to vector<16x32xf32>
    %205 = arith.mulf %200, %204 : vector<16x32xf32>
    %206 = vector.extract_strided_slice %52 {offsets = [1, 0], sizes = [1, 32], strides = [1, 1]} : vector<2x32xf32> to vector<1x32xf32>
    %207 = vector.broadcast %206 : vector<1x32xf32> to vector<16x32xf32>
    %208 = arith.addf %205, %207 : vector<16x32xf32>
    %cst_129 = arith.constant 0.000000e+00 : f32
    %209 = vector.broadcast %cst_129 : f32 to vector<16x32xf32>
    %c8_130 = arith.constant 8 : index
    %c0_131 = arith.constant 0 : index
    %c0_132 = arith.constant 0 : index
    %210 = vector.load %arg4[%c8_130, %c0_131, %c0_132] : memref<30x32x32xf32, #tpu.memory_space<vmem>>, vector<1x32x32xf32>
    %211 = vector.shape_cast %210 : vector<1x32x32xf32> to vector<32x32xf32>
    %cst_133 = arith.constant dense<0.000000e+00> : vector<16x32xf32>
    %212 = tpu.matmul %208, %211, %cst_133 {dimension_numbers = #tpu.dot_dimension_numbers<[1], [0], [0], [1], [0, 0, 1, 1], [], []>} : vector<16x32xf32>, vector<32x32xf32>, vector<16x32xf32> -> vector<16x32xf32>
    %c15_134 = arith.constant 15 : index
    %c0_135 = arith.constant 0 : index
    %c0_136 = arith.constant 0 : index
    %213 = vector.load %arg5[%c15_134, %c0_135, %c0_136] : memref<41x1x32xf32, #tpu.memory_space<vmem>>, vector<1x1x32xf32>
    %214 = vector.shape_cast %213 : vector<1x1x32xf32> to vector<1x32xf32>
    %215 = vector.broadcast %214 : vector<1x32xf32> to vector<16x32xf32>
    %216 = arith.addf %212, %215 : vector<16x32xf32>
    %c10_137 = arith.constant 10 : index
    %c0_138 = arith.constant 0 : index
    %c0_139 = arith.constant 0 : index
    %217 = vector.load %arg4[%c10_137, %c0_138, %c0_139] : memref<30x32x32xf32, #tpu.memory_space<vmem>>, vector<1x32x32xf32>
    %218 = vector.shape_cast %217 : vector<1x32x32xf32> to vector<32x32xf32>
    %cst_140 = arith.constant dense<0.000000e+00> : vector<16x32xf32>
    %219 = tpu.matmul %208, %218, %cst_140 {dimension_numbers = #tpu.dot_dimension_numbers<[1], [0], [0], [1], [0, 0, 1, 1], [], []>} : vector<16x32xf32>, vector<32x32xf32>, vector<16x32xf32> -> vector<16x32xf32>
    %c17_141 = arith.constant 17 : index
    %c0_142 = arith.constant 0 : index
    %c0_143 = arith.constant 0 : index
    %220 = vector.load %arg5[%c17_141, %c0_142, %c0_143] : memref<41x1x32xf32, #tpu.memory_space<vmem>>, vector<1x1x32xf32>
    %221 = vector.shape_cast %220 : vector<1x1x32xf32> to vector<1x32xf32>
    %222 = vector.broadcast %221 : vector<1x32xf32> to vector<16x32xf32>
    %223 = arith.addf %219, %222 : vector<16x32xf32>
    %c12_144 = arith.constant 12 : index
    %c0_145 = arith.constant 0 : index
    %c0_146 = arith.constant 0 : index
    %224 = vector.load %arg4[%c12_144, %c0_145, %c0_146] : memref<30x32x32xf32, #tpu.memory_space<vmem>>, vector<1x32x32xf32>
    %225 = vector.shape_cast %224 : vector<1x32x32xf32> to vector<32x32xf32>
    %cst_147 = arith.constant dense<0.000000e+00> : vector<16x32xf32>
    %226 = tpu.matmul %208, %225, %cst_147 {dimension_numbers = #tpu.dot_dimension_numbers<[1], [0], [0], [1], [0, 0, 1, 1], [], []>} : vector<16x32xf32>, vector<32x32xf32>, vector<16x32xf32> -> vector<16x32xf32>
    %c19_148 = arith.constant 19 : index
    %c0_149 = arith.constant 0 : index
    %c0_150 = arith.constant 0 : index
    %227 = vector.load %arg5[%c19_148, %c0_149, %c0_150] : memref<41x1x32xf32, #tpu.memory_space<vmem>>, vector<1x1x32xf32>
    %228 = vector.shape_cast %227 : vector<1x1x32xf32> to vector<1x32xf32>
    %229 = vector.broadcast %228 : vector<1x32xf32> to vector<16x32xf32>
    %230 = arith.addf %226, %229 : vector<16x32xf32>
    %cst_151 = arith.constant dense<0.000000e+00> : vector<16x16xf32>
    %231 = tpu.matmul %216, %223, %cst_151 {dimension_numbers = #tpu.dot_dimension_numbers<[1], [1], [0], [0], [0, 0, 1, 0], [], []>} : vector<16x32xf32>, vector<16x32xf32>, vector<16x16xf32> -> vector<16x16xf32>
    %cst_152 = arith.constant 2.500000e-01 : f32
    %232 = vector.broadcast %cst_152 : f32 to vector<16x16xf32>
    %233 = arith.mulf %231, %232 : vector<16x16xf32>
    %cst_153 = arith.constant dense<0xFF800000> : vector<16xf32>
    %234 = vector.multi_reduction <maximumf>, %233, %cst_153 [1] : vector<16x16xf32> to vector<16xf32>
    %235 = vector.shape_cast %234 : vector<16xf32> to vector<16x1xf32>
    %236 = vector.broadcast %235 : vector<16x1xf32> to vector<16x16xf32>
    %237 = arith.subf %233, %236 : vector<16x16xf32>
    %238 = math.exp %237 : vector<16x16xf32>
    %cst_154 = arith.constant dense<0.000000e+00> : vector<16xf32>
    %239 = vector.multi_reduction <add>, %238, %cst_154 [1] : vector<16x16xf32> to vector<16xf32>
    %240 = vector.shape_cast %239 : vector<16xf32> to vector<16x1xf32>
    %241 = vector.broadcast %240 : vector<16x1xf32> to vector<16x16xf32>
    %242 = arith.divf %238, %241 : vector<16x16xf32>
    %cst_155 = arith.constant dense<0.000000e+00> : vector<16x32xf32>
    %243 = tpu.matmul %242, %230, %cst_155 {dimension_numbers = #tpu.dot_dimension_numbers<[1], [0], [0], [1], [0, 0, 1, 1], [], []>} : vector<16x16xf32>, vector<16x32xf32>, vector<16x32xf32> -> vector<16x32xf32>
    %c14_156 = arith.constant 14 : index
    %c0_157 = arith.constant 0 : index
    %c0_158 = arith.constant 0 : index
    %244 = vector.load %arg4[%c14_156, %c0_157, %c0_158] : memref<30x32x32xf32, #tpu.memory_space<vmem>>, vector<1x32x32xf32>
    %245 = vector.shape_cast %244 : vector<1x32x32xf32> to vector<32x32xf32>
    %cst_159 = arith.constant dense<0.000000e+00> : vector<16x32xf32>
    %246 = tpu.matmul %243, %245, %cst_159 {dimension_numbers = #tpu.dot_dimension_numbers<[1], [0], [0], [1], [0, 0, 1, 1], [], []>} : vector<16x32xf32>, vector<32x32xf32>, vector<16x32xf32> -> vector<16x32xf32>
    %247 = arith.addf %209, %246 : vector<16x32xf32>
    %c9_160 = arith.constant 9 : index
    %c0_161 = arith.constant 0 : index
    %c0_162 = arith.constant 0 : index
    %248 = vector.load %arg4[%c9_160, %c0_161, %c0_162] : memref<30x32x32xf32, #tpu.memory_space<vmem>>, vector<1x32x32xf32>
    %249 = vector.shape_cast %248 : vector<1x32x32xf32> to vector<32x32xf32>
    %cst_163 = arith.constant dense<0.000000e+00> : vector<16x32xf32>
    %250 = tpu.matmul %208, %249, %cst_163 {dimension_numbers = #tpu.dot_dimension_numbers<[1], [0], [0], [1], [0, 0, 1, 1], [], []>} : vector<16x32xf32>, vector<32x32xf32>, vector<16x32xf32> -> vector<16x32xf32>
    %c16_164 = arith.constant 16 : index
    %c0_165 = arith.constant 0 : index
    %c0_166 = arith.constant 0 : index
    %251 = vector.load %arg5[%c16_164, %c0_165, %c0_166] : memref<41x1x32xf32, #tpu.memory_space<vmem>>, vector<1x1x32xf32>
    %252 = vector.shape_cast %251 : vector<1x1x32xf32> to vector<1x32xf32>
    %253 = vector.broadcast %252 : vector<1x32xf32> to vector<16x32xf32>
    %254 = arith.addf %250, %253 : vector<16x32xf32>
    %c11_167 = arith.constant 11 : index
    %c0_168 = arith.constant 0 : index
    %c0_169 = arith.constant 0 : index
    %255 = vector.load %arg4[%c11_167, %c0_168, %c0_169] : memref<30x32x32xf32, #tpu.memory_space<vmem>>, vector<1x32x32xf32>
    %256 = vector.shape_cast %255 : vector<1x32x32xf32> to vector<32x32xf32>
    %cst_170 = arith.constant dense<0.000000e+00> : vector<16x32xf32>
    %257 = tpu.matmul %208, %256, %cst_170 {dimension_numbers = #tpu.dot_dimension_numbers<[1], [0], [0], [1], [0, 0, 1, 1], [], []>} : vector<16x32xf32>, vector<32x32xf32>, vector<16x32xf32> -> vector<16x32xf32>
    %c18_171 = arith.constant 18 : index
    %c0_172 = arith.constant 0 : index
    %c0_173 = arith.constant 0 : index
    %258 = vector.load %arg5[%c18_171, %c0_172, %c0_173] : memref<41x1x32xf32, #tpu.memory_space<vmem>>, vector<1x1x32xf32>
    %259 = vector.shape_cast %258 : vector<1x1x32xf32> to vector<1x32xf32>
    %260 = vector.broadcast %259 : vector<1x32xf32> to vector<16x32xf32>
    %261 = arith.addf %257, %260 : vector<16x32xf32>
    %c13_174 = arith.constant 13 : index
    %c0_175 = arith.constant 0 : index
    %c0_176 = arith.constant 0 : index
    %262 = vector.load %arg4[%c13_174, %c0_175, %c0_176] : memref<30x32x32xf32, #tpu.memory_space<vmem>>, vector<1x32x32xf32>
    %263 = vector.shape_cast %262 : vector<1x32x32xf32> to vector<32x32xf32>
    %cst_177 = arith.constant dense<0.000000e+00> : vector<16x32xf32>
    %264 = tpu.matmul %208, %263, %cst_177 {dimension_numbers = #tpu.dot_dimension_numbers<[1], [0], [0], [1], [0, 0, 1, 1], [], []>} : vector<16x32xf32>, vector<32x32xf32>, vector<16x32xf32> -> vector<16x32xf32>
    %c20_178 = arith.constant 20 : index
    %c0_179 = arith.constant 0 : index
    %c0_180 = arith.constant 0 : index
    %265 = vector.load %arg5[%c20_178, %c0_179, %c0_180] : memref<41x1x32xf32, #tpu.memory_space<vmem>>, vector<1x1x32xf32>
    %266 = vector.shape_cast %265 : vector<1x1x32xf32> to vector<1x32xf32>
    %267 = vector.broadcast %266 : vector<1x32xf32> to vector<16x32xf32>
    %268 = arith.addf %264, %267 : vector<16x32xf32>
    %cst_181 = arith.constant dense<0.000000e+00> : vector<16x16xf32>
    %269 = tpu.matmul %254, %261, %cst_181 {dimension_numbers = #tpu.dot_dimension_numbers<[1], [1], [0], [0], [0, 0, 1, 0], [], []>} : vector<16x32xf32>, vector<16x32xf32>, vector<16x16xf32> -> vector<16x16xf32>
    %cst_182 = arith.constant 2.500000e-01 : f32
    %270 = vector.broadcast %cst_182 : f32 to vector<16x16xf32>
    %271 = arith.mulf %269, %270 : vector<16x16xf32>
    %cst_183 = arith.constant dense<0xFF800000> : vector<16xf32>
    %272 = vector.multi_reduction <maximumf>, %271, %cst_183 [1] : vector<16x16xf32> to vector<16xf32>
    %273 = vector.shape_cast %272 : vector<16xf32> to vector<16x1xf32>
    %274 = vector.broadcast %273 : vector<16x1xf32> to vector<16x16xf32>
    %275 = arith.subf %271, %274 : vector<16x16xf32>
    %276 = math.exp %275 : vector<16x16xf32>
    %cst_184 = arith.constant dense<0.000000e+00> : vector<16xf32>
    %277 = vector.multi_reduction <add>, %276, %cst_184 [1] : vector<16x16xf32> to vector<16xf32>
    %278 = vector.shape_cast %277 : vector<16xf32> to vector<16x1xf32>
    %279 = vector.broadcast %278 : vector<16x1xf32> to vector<16x16xf32>
    %280 = arith.divf %276, %279 : vector<16x16xf32>
    %cst_185 = arith.constant dense<0.000000e+00> : vector<16x32xf32>
    %281 = tpu.matmul %280, %268, %cst_185 {dimension_numbers = #tpu.dot_dimension_numbers<[1], [0], [0], [1], [0, 0, 1, 1], [], []>} : vector<16x16xf32>, vector<16x32xf32>, vector<16x32xf32> -> vector<16x32xf32>
    %c15_186 = arith.constant 15 : index
    %c0_187 = arith.constant 0 : index
    %c0_188 = arith.constant 0 : index
    %282 = vector.load %arg4[%c15_186, %c0_187, %c0_188] : memref<30x32x32xf32, #tpu.memory_space<vmem>>, vector<1x32x32xf32>
    %283 = vector.shape_cast %282 : vector<1x32x32xf32> to vector<32x32xf32>
    %cst_189 = arith.constant dense<0.000000e+00> : vector<16x32xf32>
    %284 = tpu.matmul %281, %283, %cst_189 {dimension_numbers = #tpu.dot_dimension_numbers<[1], [0], [0], [1], [0, 0, 1, 1], [], []>} : vector<16x32xf32>, vector<32x32xf32>, vector<16x32xf32> -> vector<16x32xf32>
    %285 = arith.addf %247, %284 : vector<16x32xf32>
    %c21_190 = arith.constant 21 : index
    %c0_191 = arith.constant 0 : index
    %c0_192 = arith.constant 0 : index
    %286 = vector.load %arg5[%c21_190, %c0_191, %c0_192] : memref<41x1x32xf32, #tpu.memory_space<vmem>>, vector<1x1x32xf32>
    %287 = vector.shape_cast %286 : vector<1x1x32xf32> to vector<1x32xf32>
    %288 = vector.broadcast %287 : vector<1x32xf32> to vector<16x32xf32>
    %289 = arith.addf %285, %288 : vector<16x32xf32>
    %290 = vector.extract_strided_slice %59 {offsets = [1, 0], sizes = [1, 32], strides = [1, 1]} : vector<2x32xf32> to vector<1x32xf32>
    %291 = vector.broadcast %290 : vector<1x32xf32> to vector<16x32xf32>
    %292 = arith.mulf %289, %291 : vector<16x32xf32>
    %293 = tpu.concatenate %199, %292 in 0 : vector<16x32xf32>, vector<16x32xf32> -> vector<32x32xf32>
    %294 = arith.addf %38, %293 : vector<32x32xf32>
    %c7_193 = arith.constant 7 : index
    %c0_194 = arith.constant 0 : index
    %c0_195 = arith.constant 0 : index
    %295 = vector.load %arg5[%c7_193, %c0_194, %c0_195] : memref<41x1x32xf32, #tpu.memory_space<vmem>>, vector<1x1x32xf32>
    %296 = vector.shape_cast %295 : vector<1x1x32xf32> to vector<1x32xf32>
    %c8_196 = arith.constant 8 : index
    %c0_197 = arith.constant 0 : index
    %c0_198 = arith.constant 0 : index
    %297 = vector.load %arg5[%c8_196, %c0_197, %c0_198] : memref<41x1x32xf32, #tpu.memory_space<vmem>>, vector<1x1x32xf32>
    %298 = vector.shape_cast %297 : vector<1x1x32xf32> to vector<1x32xf32>
    %cst_199 = arith.constant dense<0.000000e+00> : vector<32xf32>
    %299 = vector.multi_reduction <add>, %294, %cst_199 [1] : vector<32x32xf32> to vector<32xf32>
    %300 = vector.shape_cast %299 : vector<32xf32> to vector<32x1xf32>
    %cst_200 = arith.constant 3.200000e+01 : f32
    %301 = vector.broadcast %cst_200 : f32 to vector<32x1xf32>
    %302 = arith.divf %300, %301 : vector<32x1xf32>
    %303 = vector.broadcast %302 : vector<32x1xf32> to vector<32x32xf32>
    %304 = arith.subf %294, %303 : vector<32x32xf32>
    %305 = arith.mulf %304, %304 : vector<32x32xf32>
    %cst_201 = arith.constant dense<0.000000e+00> : vector<32xf32>
    %306 = vector.multi_reduction <add>, %305, %cst_201 [1] : vector<32x32xf32> to vector<32xf32>
    %307 = vector.shape_cast %306 : vector<32xf32> to vector<32x1xf32>
    %cst_202 = arith.constant 3.200000e+01 : f32
    %308 = vector.broadcast %cst_202 : f32 to vector<32x1xf32>
    %309 = arith.divf %307, %308 : vector<32x1xf32>
    %310 = vector.broadcast %302 : vector<32x1xf32> to vector<32x32xf32>
    %311 = arith.subf %294, %310 : vector<32x32xf32>
    %cst_203 = arith.constant 9.99999974E-6 : f32
    %312 = vector.broadcast %cst_203 : f32 to vector<32x1xf32>
    %313 = arith.addf %309, %312 : vector<32x1xf32>
    %314 = math.rsqrt %313 : vector<32x1xf32>
    %315 = vector.broadcast %314 : vector<32x1xf32> to vector<32x32xf32>
    %316 = arith.mulf %311, %315 : vector<32x32xf32>
    %317 = vector.broadcast %296 : vector<1x32xf32> to vector<32x32xf32>
    %318 = arith.mulf %316, %317 : vector<32x32xf32>
    %319 = vector.broadcast %298 : vector<1x32xf32> to vector<32x32xf32>
    %320 = arith.addf %318, %319 : vector<32x32xf32>
    %321 = vector.extract_strided_slice %320 {offsets = [0, 0], sizes = [16, 32], strides = [1, 1]} : vector<32x32xf32> to vector<16x32xf32>
    %322 = vector.extract_strided_slice %66 {offsets = [0, 0], sizes = [1, 32], strides = [1, 1]} : vector<2x32xf32> to vector<1x32xf32>
    %cst_204 = arith.constant 1.000000e+00 : f32
    %323 = vector.broadcast %cst_204 : f32 to vector<1x32xf32>
    %324 = arith.addf %323, %322 : vector<1x32xf32>
    %325 = vector.broadcast %324 : vector<1x32xf32> to vector<16x32xf32>
    %326 = arith.mulf %321, %325 : vector<16x32xf32>
    %327 = vector.extract_strided_slice %73 {offsets = [0, 0], sizes = [1, 32], strides = [1, 1]} : vector<2x32xf32> to vector<1x32xf32>
    %328 = vector.broadcast %327 : vector<1x32xf32> to vector<16x32xf32>
    %329 = arith.addf %326, %328 : vector<16x32xf32>
    %330 = vector.extract_strided_slice %320 {offsets = [16, 0], sizes = [16, 32], strides = [1, 1]} : vector<32x32xf32> to vector<16x32xf32>
    %331 = vector.extract_strided_slice %66 {offsets = [1, 0], sizes = [1, 32], strides = [1, 1]} : vector<2x32xf32> to vector<1x32xf32>
    %cst_205 = arith.constant 1.000000e+00 : f32
    %332 = vector.broadcast %cst_205 : f32 to vector<1x32xf32>
    %333 = arith.addf %332, %331 : vector<1x32xf32>
    %334 = vector.broadcast %333 : vector<1x32xf32> to vector<16x32xf32>
    %335 = arith.mulf %330, %334 : vector<16x32xf32>
    %336 = vector.extract_strided_slice %73 {offsets = [1, 0], sizes = [1, 32], strides = [1, 1]} : vector<2x32xf32> to vector<1x32xf32>
    %337 = vector.broadcast %336 : vector<1x32xf32> to vector<16x32xf32>
    %338 = arith.addf %335, %337 : vector<16x32xf32>
    %339 = tpu.concatenate %329, %338 in 0 : vector<16x32xf32>, vector<16x32xf32> -> vector<32x32xf32>
    %c0_206 = arith.constant 0 : index
    %c0_207 = arith.constant 0 : index
    %c0_208 = arith.constant 0 : index
    %340 = vector.load %arg6[%c0_206, %c0_207, %c0_208] : memref<2x40x128xf32, #tpu.memory_space<vmem>>, vector<1x40x128xf32>
    %341 = vector.shape_cast %340 : vector<1x40x128xf32> to vector<40x128xf32>
    %342 = vector.extract_strided_slice %341 {offsets = [0, 0], sizes = [32, 128], strides = [1, 1]} : vector<40x128xf32> to vector<32x128xf32>
    %cst_209 = arith.constant dense<0.000000e+00> : vector<32x128xf32>
    %343 = tpu.matmul %339, %342, %cst_209 {dimension_numbers = #tpu.dot_dimension_numbers<[1], [0], [0], [1], [0, 0, 1, 1], [], []>} : vector<32x32xf32>, vector<32x128xf32>, vector<32x128xf32> -> vector<32x128xf32>
    %344 = vector.extract_strided_slice %341 {offsets = [32, 0], sizes = [1, 128], strides = [1, 1]} : vector<40x128xf32> to vector<1x128xf32>
    %345 = vector.broadcast %344 : vector<1x128xf32> to vector<32x128xf32>
    %346 = arith.addf %343, %345 : vector<32x128xf32>
    %cst_210 = arith.constant 0.000000e+00 : f32
    %347 = vector.broadcast %cst_210 : f32 to vector<32x128xf32>
    %348 = arith.maximumf %346, %347 : vector<32x128xf32>
    %c0_211 = arith.constant 0 : index
    %c0_212 = arith.constant 0 : index
    %c0_213 = arith.constant 0 : index
    %349 = vector.load %arg7[%c0_211, %c0_212, %c0_213] : memref<2x128x32xf32, #tpu.memory_space<vmem>>, vector<1x128x32xf32>
    %350 = vector.shape_cast %349 : vector<1x128x32xf32> to vector<128x32xf32>
    %cst_214 = arith.constant dense<0.000000e+00> : vector<32x32xf32>
    %351 = tpu.matmul %348, %350, %cst_214 {dimension_numbers = #tpu.dot_dimension_numbers<[1], [0], [0], [1], [0, 0, 1, 1], [], []>} : vector<32x128xf32>, vector<128x32xf32>, vector<32x32xf32> -> vector<32x32xf32>
    %c22 = arith.constant 22 : index
    %c0_215 = arith.constant 0 : index
    %c0_216 = arith.constant 0 : index
    %352 = vector.load %arg5[%c22, %c0_215, %c0_216] : memref<41x1x32xf32, #tpu.memory_space<vmem>>, vector<1x1x32xf32>
    %353 = vector.shape_cast %352 : vector<1x1x32xf32> to vector<1x32xf32>
    %354 = vector.broadcast %353 : vector<1x32xf32> to vector<32x32xf32>
    %355 = arith.addf %351, %354 : vector<32x32xf32>
    %356 = vector.extract_strided_slice %355 {offsets = [0, 0], sizes = [16, 32], strides = [1, 1]} : vector<32x32xf32> to vector<16x32xf32>
    %357 = vector.extract_strided_slice %80 {offsets = [0, 0], sizes = [1, 32], strides = [1, 1]} : vector<2x32xf32> to vector<1x32xf32>
    %358 = vector.broadcast %357 : vector<1x32xf32> to vector<16x32xf32>
    %359 = arith.mulf %356, %358 : vector<16x32xf32>
    %360 = vector.extract_strided_slice %355 {offsets = [16, 0], sizes = [16, 32], strides = [1, 1]} : vector<32x32xf32> to vector<16x32xf32>
    %361 = vector.extract_strided_slice %80 {offsets = [1, 0], sizes = [1, 32], strides = [1, 1]} : vector<2x32xf32> to vector<1x32xf32>
    %362 = vector.broadcast %361 : vector<1x32xf32> to vector<16x32xf32>
    %363 = arith.mulf %360, %362 : vector<16x32xf32>
    %364 = tpu.concatenate %359, %363 in 0 : vector<16x32xf32>, vector<16x32xf32> -> vector<32x32xf32>
    %365 = arith.addf %294, %364 : vector<32x32xf32>
    %c16_217 = arith.constant 16 : index
    %c0_218 = arith.constant 0 : index
    %c0_219 = arith.constant 0 : index
    %366 = vector.load %arg4[%c16_217, %c0_218, %c0_219] : memref<30x32x32xf32, #tpu.memory_space<vmem>>, vector<1x32x32xf32>
    %367 = vector.shape_cast %366 : vector<1x32x32xf32> to vector<32x32xf32>
    %cst_220 = arith.constant dense<0.000000e+00> : vector<2x32xf32>
    %368 = tpu.matmul %30, %367, %cst_220 {dimension_numbers = #tpu.dot_dimension_numbers<[1], [0], [0], [1], [0, 0, 1, 1], [], []>} : vector<2x32xf32>, vector<32x32xf32>, vector<2x32xf32> -> vector<2x32xf32>
    %c27 = arith.constant 27 : index
    %c0_221 = arith.constant 0 : index
    %c0_222 = arith.constant 0 : index
    %369 = vector.load %arg5[%c27, %c0_221, %c0_222] : memref<41x1x32xf32, #tpu.memory_space<vmem>>, vector<1x1x32xf32>
    %370 = vector.shape_cast %369 : vector<1x1x32xf32> to vector<1x32xf32>
    %371 = vector.broadcast %370 : vector<1x32xf32> to vector<2x32xf32>
    %372 = arith.addf %368, %371 : vector<2x32xf32>
    %c17_223 = arith.constant 17 : index
    %c0_224 = arith.constant 0 : index
    %c0_225 = arith.constant 0 : index
    %373 = vector.load %arg4[%c17_223, %c0_224, %c0_225] : memref<30x32x32xf32, #tpu.memory_space<vmem>>, vector<1x32x32xf32>
    %374 = vector.shape_cast %373 : vector<1x32x32xf32> to vector<32x32xf32>
    %cst_226 = arith.constant dense<0.000000e+00> : vector<2x32xf32>
    %375 = tpu.matmul %30, %374, %cst_226 {dimension_numbers = #tpu.dot_dimension_numbers<[1], [0], [0], [1], [0, 0, 1, 1], [], []>} : vector<2x32xf32>, vector<32x32xf32>, vector<2x32xf32> -> vector<2x32xf32>
    %c28 = arith.constant 28 : index
    %c0_227 = arith.constant 0 : index
    %c0_228 = arith.constant 0 : index
    %376 = vector.load %arg5[%c28, %c0_227, %c0_228] : memref<41x1x32xf32, #tpu.memory_space<vmem>>, vector<1x1x32xf32>
    %377 = vector.shape_cast %376 : vector<1x1x32xf32> to vector<1x32xf32>
    %378 = vector.broadcast %377 : vector<1x32xf32> to vector<2x32xf32>
    %379 = arith.addf %375, %378 : vector<2x32xf32>
    %c18_229 = arith.constant 18 : index
    %c0_230 = arith.constant 0 : index
    %c0_231 = arith.constant 0 : index
    %380 = vector.load %arg4[%c18_229, %c0_230, %c0_231] : memref<30x32x32xf32, #tpu.memory_space<vmem>>, vector<1x32x32xf32>
    %381 = vector.shape_cast %380 : vector<1x32x32xf32> to vector<32x32xf32>
    %cst_232 = arith.constant dense<0.000000e+00> : vector<2x32xf32>
    %382 = tpu.matmul %30, %381, %cst_232 {dimension_numbers = #tpu.dot_dimension_numbers<[1], [0], [0], [1], [0, 0, 1, 1], [], []>} : vector<2x32xf32>, vector<32x32xf32>, vector<2x32xf32> -> vector<2x32xf32>
    %c29 = arith.constant 29 : index
    %c0_233 = arith.constant 0 : index
    %c0_234 = arith.constant 0 : index
    %383 = vector.load %arg5[%c29, %c0_233, %c0_234] : memref<41x1x32xf32, #tpu.memory_space<vmem>>, vector<1x1x32xf32>
    %384 = vector.shape_cast %383 : vector<1x1x32xf32> to vector<1x32xf32>
    %385 = vector.broadcast %384 : vector<1x32xf32> to vector<2x32xf32>
    %386 = arith.addf %382, %385 : vector<2x32xf32>
    %c19_235 = arith.constant 19 : index
    %c0_236 = arith.constant 0 : index
    %c0_237 = arith.constant 0 : index
    %387 = vector.load %arg4[%c19_235, %c0_236, %c0_237] : memref<30x32x32xf32, #tpu.memory_space<vmem>>, vector<1x32x32xf32>
    %388 = vector.shape_cast %387 : vector<1x32x32xf32> to vector<32x32xf32>
    %cst_238 = arith.constant dense<0.000000e+00> : vector<2x32xf32>
    %389 = tpu.matmul %30, %388, %cst_238 {dimension_numbers = #tpu.dot_dimension_numbers<[1], [0], [0], [1], [0, 0, 1, 1], [], []>} : vector<2x32xf32>, vector<32x32xf32>, vector<2x32xf32> -> vector<2x32xf32>
    %c30 = arith.constant 30 : index
    %c0_239 = arith.constant 0 : index
    %c0_240 = arith.constant 0 : index
    %390 = vector.load %arg5[%c30, %c0_239, %c0_240] : memref<41x1x32xf32, #tpu.memory_space<vmem>>, vector<1x1x32xf32>
    %391 = vector.shape_cast %390 : vector<1x1x32xf32> to vector<1x32xf32>
    %392 = vector.broadcast %391 : vector<1x32xf32> to vector<2x32xf32>
    %393 = arith.addf %389, %392 : vector<2x32xf32>
    %c20_241 = arith.constant 20 : index
    %c0_242 = arith.constant 0 : index
    %c0_243 = arith.constant 0 : index
    %394 = vector.load %arg4[%c20_241, %c0_242, %c0_243] : memref<30x32x32xf32, #tpu.memory_space<vmem>>, vector<1x32x32xf32>
    %395 = vector.shape_cast %394 : vector<1x32x32xf32> to vector<32x32xf32>
    %cst_244 = arith.constant dense<0.000000e+00> : vector<2x32xf32>
    %396 = tpu.matmul %30, %395, %cst_244 {dimension_numbers = #tpu.dot_dimension_numbers<[1], [0], [0], [1], [0, 0, 1, 1], [], []>} : vector<2x32xf32>, vector<32x32xf32>, vector<2x32xf32> -> vector<2x32xf32>
    %c31 = arith.constant 31 : index
    %c0_245 = arith.constant 0 : index
    %c0_246 = arith.constant 0 : index
    %397 = vector.load %arg5[%c31, %c0_245, %c0_246] : memref<41x1x32xf32, #tpu.memory_space<vmem>>, vector<1x1x32xf32>
    %398 = vector.shape_cast %397 : vector<1x1x32xf32> to vector<1x32xf32>
    %399 = vector.broadcast %398 : vector<1x32xf32> to vector<2x32xf32>
    %400 = arith.addf %396, %399 : vector<2x32xf32>
    %c21_247 = arith.constant 21 : index
    %c0_248 = arith.constant 0 : index
    %c0_249 = arith.constant 0 : index
    %401 = vector.load %arg4[%c21_247, %c0_248, %c0_249] : memref<30x32x32xf32, #tpu.memory_space<vmem>>, vector<1x32x32xf32>
    %402 = vector.shape_cast %401 : vector<1x32x32xf32> to vector<32x32xf32>
    %cst_250 = arith.constant dense<0.000000e+00> : vector<2x32xf32>
    %403 = tpu.matmul %30, %402, %cst_250 {dimension_numbers = #tpu.dot_dimension_numbers<[1], [0], [0], [1], [0, 0, 1, 1], [], []>} : vector<2x32xf32>, vector<32x32xf32>, vector<2x32xf32> -> vector<2x32xf32>
    %c32 = arith.constant 32 : index
    %c0_251 = arith.constant 0 : index
    %c0_252 = arith.constant 0 : index
    %404 = vector.load %arg5[%c32, %c0_251, %c0_252] : memref<41x1x32xf32, #tpu.memory_space<vmem>>, vector<1x1x32xf32>
    %405 = vector.shape_cast %404 : vector<1x1x32xf32> to vector<1x32xf32>
    %406 = vector.broadcast %405 : vector<1x32xf32> to vector<2x32xf32>
    %407 = arith.addf %403, %406 : vector<2x32xf32>
    %c23 = arith.constant 23 : index
    %c0_253 = arith.constant 0 : index
    %c0_254 = arith.constant 0 : index
    %408 = vector.load %arg5[%c23, %c0_253, %c0_254] : memref<41x1x32xf32, #tpu.memory_space<vmem>>, vector<1x1x32xf32>
    %409 = vector.shape_cast %408 : vector<1x1x32xf32> to vector<1x32xf32>
    %c24 = arith.constant 24 : index
    %c0_255 = arith.constant 0 : index
    %c0_256 = arith.constant 0 : index
    %410 = vector.load %arg5[%c24, %c0_255, %c0_256] : memref<41x1x32xf32, #tpu.memory_space<vmem>>, vector<1x1x32xf32>
    %411 = vector.shape_cast %410 : vector<1x1x32xf32> to vector<1x32xf32>
    %cst_257 = arith.constant dense<0.000000e+00> : vector<32xf32>
    %412 = vector.multi_reduction <add>, %365, %cst_257 [1] : vector<32x32xf32> to vector<32xf32>
    %413 = vector.shape_cast %412 : vector<32xf32> to vector<32x1xf32>
    %cst_258 = arith.constant 3.200000e+01 : f32
    %414 = vector.broadcast %cst_258 : f32 to vector<32x1xf32>
    %415 = arith.divf %413, %414 : vector<32x1xf32>
    %416 = vector.broadcast %415 : vector<32x1xf32> to vector<32x32xf32>
    %417 = arith.subf %365, %416 : vector<32x32xf32>
    %418 = arith.mulf %417, %417 : vector<32x32xf32>
    %cst_259 = arith.constant dense<0.000000e+00> : vector<32xf32>
    %419 = vector.multi_reduction <add>, %418, %cst_259 [1] : vector<32x32xf32> to vector<32xf32>
    %420 = vector.shape_cast %419 : vector<32xf32> to vector<32x1xf32>
    %cst_260 = arith.constant 3.200000e+01 : f32
    %421 = vector.broadcast %cst_260 : f32 to vector<32x1xf32>
    %422 = arith.divf %420, %421 : vector<32x1xf32>
    %423 = vector.broadcast %415 : vector<32x1xf32> to vector<32x32xf32>
    %424 = arith.subf %365, %423 : vector<32x32xf32>
    %cst_261 = arith.constant 9.99999974E-6 : f32
    %425 = vector.broadcast %cst_261 : f32 to vector<32x1xf32>
    %426 = arith.addf %422, %425 : vector<32x1xf32>
    %427 = math.rsqrt %426 : vector<32x1xf32>
    %428 = vector.broadcast %427 : vector<32x1xf32> to vector<32x32xf32>
    %429 = arith.mulf %424, %428 : vector<32x32xf32>
    %430 = vector.broadcast %409 : vector<1x32xf32> to vector<32x32xf32>
    %431 = arith.mulf %429, %430 : vector<32x32xf32>
    %432 = vector.broadcast %411 : vector<1x32xf32> to vector<32x32xf32>
    %433 = arith.addf %431, %432 : vector<32x32xf32>
    %434 = vector.extract_strided_slice %433 {offsets = [0, 0], sizes = [16, 32], strides = [1, 1]} : vector<32x32xf32> to vector<16x32xf32>
    %435 = vector.extract_strided_slice %372 {offsets = [0, 0], sizes = [1, 32], strides = [1, 1]} : vector<2x32xf32> to vector<1x32xf32>
    %cst_262 = arith.constant 1.000000e+00 : f32
    %436 = vector.broadcast %cst_262 : f32 to vector<1x32xf32>
    %437 = arith.addf %436, %435 : vector<1x32xf32>
    %438 = vector.broadcast %437 : vector<1x32xf32> to vector<16x32xf32>
    %439 = arith.mulf %434, %438 : vector<16x32xf32>
    %440 = vector.extract_strided_slice %379 {offsets = [0, 0], sizes = [1, 32], strides = [1, 1]} : vector<2x32xf32> to vector<1x32xf32>
    %441 = vector.broadcast %440 : vector<1x32xf32> to vector<16x32xf32>
    %442 = arith.addf %439, %441 : vector<16x32xf32>
    %cst_263 = arith.constant 0.000000e+00 : f32
    %443 = vector.broadcast %cst_263 : f32 to vector<16x32xf32>
    %c22_264 = arith.constant 22 : index
    %c0_265 = arith.constant 0 : index
    %c0_266 = arith.constant 0 : index
    %444 = vector.load %arg4[%c22_264, %c0_265, %c0_266] : memref<30x32x32xf32, #tpu.memory_space<vmem>>, vector<1x32x32xf32>
    %445 = vector.shape_cast %444 : vector<1x32x32xf32> to vector<32x32xf32>
    %cst_267 = arith.constant dense<0.000000e+00> : vector<16x32xf32>
    %446 = tpu.matmul %442, %445, %cst_267 {dimension_numbers = #tpu.dot_dimension_numbers<[1], [0], [0], [1], [0, 0, 1, 1], [], []>} : vector<16x32xf32>, vector<32x32xf32>, vector<16x32xf32> -> vector<16x32xf32>
    %c33 = arith.constant 33 : index
    %c0_268 = arith.constant 0 : index
    %c0_269 = arith.constant 0 : index
    %447 = vector.load %arg5[%c33, %c0_268, %c0_269] : memref<41x1x32xf32, #tpu.memory_space<vmem>>, vector<1x1x32xf32>
    %448 = vector.shape_cast %447 : vector<1x1x32xf32> to vector<1x32xf32>
    %449 = vector.broadcast %448 : vector<1x32xf32> to vector<16x32xf32>
    %450 = arith.addf %446, %449 : vector<16x32xf32>
    %c24_270 = arith.constant 24 : index
    %c0_271 = arith.constant 0 : index
    %c0_272 = arith.constant 0 : index
    %451 = vector.load %arg4[%c24_270, %c0_271, %c0_272] : memref<30x32x32xf32, #tpu.memory_space<vmem>>, vector<1x32x32xf32>
    %452 = vector.shape_cast %451 : vector<1x32x32xf32> to vector<32x32xf32>
    %cst_273 = arith.constant dense<0.000000e+00> : vector<16x32xf32>
    %453 = tpu.matmul %442, %452, %cst_273 {dimension_numbers = #tpu.dot_dimension_numbers<[1], [0], [0], [1], [0, 0, 1, 1], [], []>} : vector<16x32xf32>, vector<32x32xf32>, vector<16x32xf32> -> vector<16x32xf32>
    %c35 = arith.constant 35 : index
    %c0_274 = arith.constant 0 : index
    %c0_275 = arith.constant 0 : index
    %454 = vector.load %arg5[%c35, %c0_274, %c0_275] : memref<41x1x32xf32, #tpu.memory_space<vmem>>, vector<1x1x32xf32>
    %455 = vector.shape_cast %454 : vector<1x1x32xf32> to vector<1x32xf32>
    %456 = vector.broadcast %455 : vector<1x32xf32> to vector<16x32xf32>
    %457 = arith.addf %453, %456 : vector<16x32xf32>
    %c26 = arith.constant 26 : index
    %c0_276 = arith.constant 0 : index
    %c0_277 = arith.constant 0 : index
    %458 = vector.load %arg4[%c26, %c0_276, %c0_277] : memref<30x32x32xf32, #tpu.memory_space<vmem>>, vector<1x32x32xf32>
    %459 = vector.shape_cast %458 : vector<1x32x32xf32> to vector<32x32xf32>
    %cst_278 = arith.constant dense<0.000000e+00> : vector<16x32xf32>
    %460 = tpu.matmul %442, %459, %cst_278 {dimension_numbers = #tpu.dot_dimension_numbers<[1], [0], [0], [1], [0, 0, 1, 1], [], []>} : vector<16x32xf32>, vector<32x32xf32>, vector<16x32xf32> -> vector<16x32xf32>
    %c37 = arith.constant 37 : index
    %c0_279 = arith.constant 0 : index
    %c0_280 = arith.constant 0 : index
    %461 = vector.load %arg5[%c37, %c0_279, %c0_280] : memref<41x1x32xf32, #tpu.memory_space<vmem>>, vector<1x1x32xf32>
    %462 = vector.shape_cast %461 : vector<1x1x32xf32> to vector<1x32xf32>
    %463 = vector.broadcast %462 : vector<1x32xf32> to vector<16x32xf32>
    %464 = arith.addf %460, %463 : vector<16x32xf32>
    %cst_281 = arith.constant dense<0.000000e+00> : vector<16x16xf32>
    %465 = tpu.matmul %450, %457, %cst_281 {dimension_numbers = #tpu.dot_dimension_numbers<[1], [1], [0], [0], [0, 0, 1, 0], [], []>} : vector<16x32xf32>, vector<16x32xf32>, vector<16x16xf32> -> vector<16x16xf32>
    %cst_282 = arith.constant 2.500000e-01 : f32
    %466 = vector.broadcast %cst_282 : f32 to vector<16x16xf32>
    %467 = arith.mulf %465, %466 : vector<16x16xf32>
    %cst_283 = arith.constant dense<0xFF800000> : vector<16xf32>
    %468 = vector.multi_reduction <maximumf>, %467, %cst_283 [1] : vector<16x16xf32> to vector<16xf32>
    %469 = vector.shape_cast %468 : vector<16xf32> to vector<16x1xf32>
    %470 = vector.broadcast %469 : vector<16x1xf32> to vector<16x16xf32>
    %471 = arith.subf %467, %470 : vector<16x16xf32>
    %472 = math.exp %471 : vector<16x16xf32>
    %cst_284 = arith.constant dense<0.000000e+00> : vector<16xf32>
    %473 = vector.multi_reduction <add>, %472, %cst_284 [1] : vector<16x16xf32> to vector<16xf32>
    %474 = vector.shape_cast %473 : vector<16xf32> to vector<16x1xf32>
    %475 = vector.broadcast %474 : vector<16x1xf32> to vector<16x16xf32>
    %476 = arith.divf %472, %475 : vector<16x16xf32>
    %cst_285 = arith.constant dense<0.000000e+00> : vector<16x32xf32>
    %477 = tpu.matmul %476, %464, %cst_285 {dimension_numbers = #tpu.dot_dimension_numbers<[1], [0], [0], [1], [0, 0, 1, 1], [], []>} : vector<16x16xf32>, vector<16x32xf32>, vector<16x32xf32> -> vector<16x32xf32>
    %c28_286 = arith.constant 28 : index
    %c0_287 = arith.constant 0 : index
    %c0_288 = arith.constant 0 : index
    %478 = vector.load %arg4[%c28_286, %c0_287, %c0_288] : memref<30x32x32xf32, #tpu.memory_space<vmem>>, vector<1x32x32xf32>
    %479 = vector.shape_cast %478 : vector<1x32x32xf32> to vector<32x32xf32>
    %cst_289 = arith.constant dense<0.000000e+00> : vector<16x32xf32>
    %480 = tpu.matmul %477, %479, %cst_289 {dimension_numbers = #tpu.dot_dimension_numbers<[1], [0], [0], [1], [0, 0, 1, 1], [], []>} : vector<16x32xf32>, vector<32x32xf32>, vector<16x32xf32> -> vector<16x32xf32>
    %481 = arith.addf %443, %480 : vector<16x32xf32>
    %c23_290 = arith.constant 23 : index
    %c0_291 = arith.constant 0 : index
    %c0_292 = arith.constant 0 : index
    %482 = vector.load %arg4[%c23_290, %c0_291, %c0_292] : memref<30x32x32xf32, #tpu.memory_space<vmem>>, vector<1x32x32xf32>
    %483 = vector.shape_cast %482 : vector<1x32x32xf32> to vector<32x32xf32>
    %cst_293 = arith.constant dense<0.000000e+00> : vector<16x32xf32>
    %484 = tpu.matmul %442, %483, %cst_293 {dimension_numbers = #tpu.dot_dimension_numbers<[1], [0], [0], [1], [0, 0, 1, 1], [], []>} : vector<16x32xf32>, vector<32x32xf32>, vector<16x32xf32> -> vector<16x32xf32>
    %c34 = arith.constant 34 : index
    %c0_294 = arith.constant 0 : index
    %c0_295 = arith.constant 0 : index
    %485 = vector.load %arg5[%c34, %c0_294, %c0_295] : memref<41x1x32xf32, #tpu.memory_space<vmem>>, vector<1x1x32xf32>
    %486 = vector.shape_cast %485 : vector<1x1x32xf32> to vector<1x32xf32>
    %487 = vector.broadcast %486 : vector<1x32xf32> to vector<16x32xf32>
    %488 = arith.addf %484, %487 : vector<16x32xf32>
    %c25 = arith.constant 25 : index
    %c0_296 = arith.constant 0 : index
    %c0_297 = arith.constant 0 : index
    %489 = vector.load %arg4[%c25, %c0_296, %c0_297] : memref<30x32x32xf32, #tpu.memory_space<vmem>>, vector<1x32x32xf32>
    %490 = vector.shape_cast %489 : vector<1x32x32xf32> to vector<32x32xf32>
    %cst_298 = arith.constant dense<0.000000e+00> : vector<16x32xf32>
    %491 = tpu.matmul %442, %490, %cst_298 {dimension_numbers = #tpu.dot_dimension_numbers<[1], [0], [0], [1], [0, 0, 1, 1], [], []>} : vector<16x32xf32>, vector<32x32xf32>, vector<16x32xf32> -> vector<16x32xf32>
    %c36 = arith.constant 36 : index
    %c0_299 = arith.constant 0 : index
    %c0_300 = arith.constant 0 : index
    %492 = vector.load %arg5[%c36, %c0_299, %c0_300] : memref<41x1x32xf32, #tpu.memory_space<vmem>>, vector<1x1x32xf32>
    %493 = vector.shape_cast %492 : vector<1x1x32xf32> to vector<1x32xf32>
    %494 = vector.broadcast %493 : vector<1x32xf32> to vector<16x32xf32>
    %495 = arith.addf %491, %494 : vector<16x32xf32>
    %c27_301 = arith.constant 27 : index
    %c0_302 = arith.constant 0 : index
    %c0_303 = arith.constant 0 : index
    %496 = vector.load %arg4[%c27_301, %c0_302, %c0_303] : memref<30x32x32xf32, #tpu.memory_space<vmem>>, vector<1x32x32xf32>
    %497 = vector.shape_cast %496 : vector<1x32x32xf32> to vector<32x32xf32>
    %cst_304 = arith.constant dense<0.000000e+00> : vector<16x32xf32>
    %498 = tpu.matmul %442, %497, %cst_304 {dimension_numbers = #tpu.dot_dimension_numbers<[1], [0], [0], [1], [0, 0, 1, 1], [], []>} : vector<16x32xf32>, vector<32x32xf32>, vector<16x32xf32> -> vector<16x32xf32>
    %c38 = arith.constant 38 : index
    %c0_305 = arith.constant 0 : index
    %c0_306 = arith.constant 0 : index
    %499 = vector.load %arg5[%c38, %c0_305, %c0_306] : memref<41x1x32xf32, #tpu.memory_space<vmem>>, vector<1x1x32xf32>
    %500 = vector.shape_cast %499 : vector<1x1x32xf32> to vector<1x32xf32>
    %501 = vector.broadcast %500 : vector<1x32xf32> to vector<16x32xf32>
    %502 = arith.addf %498, %501 : vector<16x32xf32>
    %cst_307 = arith.constant dense<0.000000e+00> : vector<16x16xf32>
    %503 = tpu.matmul %488, %495, %cst_307 {dimension_numbers = #tpu.dot_dimension_numbers<[1], [1], [0], [0], [0, 0, 1, 0], [], []>} : vector<16x32xf32>, vector<16x32xf32>, vector<16x16xf32> -> vector<16x16xf32>
    %cst_308 = arith.constant 2.500000e-01 : f32
    %504 = vector.broadcast %cst_308 : f32 to vector<16x16xf32>
    %505 = arith.mulf %503, %504 : vector<16x16xf32>
    %cst_309 = arith.constant dense<0xFF800000> : vector<16xf32>
    %506 = vector.multi_reduction <maximumf>, %505, %cst_309 [1] : vector<16x16xf32> to vector<16xf32>
    %507 = vector.shape_cast %506 : vector<16xf32> to vector<16x1xf32>
    %508 = vector.broadcast %507 : vector<16x1xf32> to vector<16x16xf32>
    %509 = arith.subf %505, %508 : vector<16x16xf32>
    %510 = math.exp %509 : vector<16x16xf32>
    %cst_310 = arith.constant dense<0.000000e+00> : vector<16xf32>
    %511 = vector.multi_reduction <add>, %510, %cst_310 [1] : vector<16x16xf32> to vector<16xf32>
    %512 = vector.shape_cast %511 : vector<16xf32> to vector<16x1xf32>
    %513 = vector.broadcast %512 : vector<16x1xf32> to vector<16x16xf32>
    %514 = arith.divf %510, %513 : vector<16x16xf32>
    %cst_311 = arith.constant dense<0.000000e+00> : vector<16x32xf32>
    %515 = tpu.matmul %514, %502, %cst_311 {dimension_numbers = #tpu.dot_dimension_numbers<[1], [0], [0], [1], [0, 0, 1, 1], [], []>} : vector<16x16xf32>, vector<16x32xf32>, vector<16x32xf32> -> vector<16x32xf32>
    %c29_312 = arith.constant 29 : index
    %c0_313 = arith.constant 0 : index
    %c0_314 = arith.constant 0 : index
    %516 = vector.load %arg4[%c29_312, %c0_313, %c0_314] : memref<30x32x32xf32, #tpu.memory_space<vmem>>, vector<1x32x32xf32>
    %517 = vector.shape_cast %516 : vector<1x32x32xf32> to vector<32x32xf32>
    %cst_315 = arith.constant dense<0.000000e+00> : vector<16x32xf32>
    %518 = tpu.matmul %515, %517, %cst_315 {dimension_numbers = #tpu.dot_dimension_numbers<[1], [0], [0], [1], [0, 0, 1, 1], [], []>} : vector<16x32xf32>, vector<32x32xf32>, vector<16x32xf32> -> vector<16x32xf32>
    %519 = arith.addf %481, %518 : vector<16x32xf32>
    %c39 = arith.constant 39 : index
    %c0_316 = arith.constant 0 : index
    %c0_317 = arith.constant 0 : index
    %520 = vector.load %arg5[%c39, %c0_316, %c0_317] : memref<41x1x32xf32, #tpu.memory_space<vmem>>, vector<1x1x32xf32>
    %521 = vector.shape_cast %520 : vector<1x1x32xf32> to vector<1x32xf32>
    %522 = vector.broadcast %521 : vector<1x32xf32> to vector<16x32xf32>
    %523 = arith.addf %519, %522 : vector<16x32xf32>
    %524 = vector.extract_strided_slice %386 {offsets = [0, 0], sizes = [1, 32], strides = [1, 1]} : vector<2x32xf32> to vector<1x32xf32>
    %525 = vector.broadcast %524 : vector<1x32xf32> to vector<16x32xf32>
    %526 = arith.mulf %523, %525 : vector<16x32xf32>
    %527 = vector.extract_strided_slice %433 {offsets = [16, 0], sizes = [16, 32], strides = [1, 1]} : vector<32x32xf32> to vector<16x32xf32>
    %528 = vector.extract_strided_slice %372 {offsets = [1, 0], sizes = [1, 32], strides = [1, 1]} : vector<2x32xf32> to vector<1x32xf32>
    %cst_318 = arith.constant 1.000000e+00 : f32
    %529 = vector.broadcast %cst_318 : f32 to vector<1x32xf32>
    %530 = arith.addf %529, %528 : vector<1x32xf32>
    %531 = vector.broadcast %530 : vector<1x32xf32> to vector<16x32xf32>
    %532 = arith.mulf %527, %531 : vector<16x32xf32>
    %533 = vector.extract_strided_slice %379 {offsets = [1, 0], sizes = [1, 32], strides = [1, 1]} : vector<2x32xf32> to vector<1x32xf32>
    %534 = vector.broadcast %533 : vector<1x32xf32> to vector<16x32xf32>
    %535 = arith.addf %532, %534 : vector<16x32xf32>
    %cst_319 = arith.constant 0.000000e+00 : f32
    %536 = vector.broadcast %cst_319 : f32 to vector<16x32xf32>
    %c22_320 = arith.constant 22 : index
    %c0_321 = arith.constant 0 : index
    %c0_322 = arith.constant 0 : index
    %537 = vector.load %arg4[%c22_320, %c0_321, %c0_322] : memref<30x32x32xf32, #tpu.memory_space<vmem>>, vector<1x32x32xf32>
    %538 = vector.shape_cast %537 : vector<1x32x32xf32> to vector<32x32xf32>
    %cst_323 = arith.constant dense<0.000000e+00> : vector<16x32xf32>
    %539 = tpu.matmul %535, %538, %cst_323 {dimension_numbers = #tpu.dot_dimension_numbers<[1], [0], [0], [1], [0, 0, 1, 1], [], []>} : vector<16x32xf32>, vector<32x32xf32>, vector<16x32xf32> -> vector<16x32xf32>
    %c33_324 = arith.constant 33 : index
    %c0_325 = arith.constant 0 : index
    %c0_326 = arith.constant 0 : index
    %540 = vector.load %arg5[%c33_324, %c0_325, %c0_326] : memref<41x1x32xf32, #tpu.memory_space<vmem>>, vector<1x1x32xf32>
    %541 = vector.shape_cast %540 : vector<1x1x32xf32> to vector<1x32xf32>
    %542 = vector.broadcast %541 : vector<1x32xf32> to vector<16x32xf32>
    %543 = arith.addf %539, %542 : vector<16x32xf32>
    %c24_327 = arith.constant 24 : index
    %c0_328 = arith.constant 0 : index
    %c0_329 = arith.constant 0 : index
    %544 = vector.load %arg4[%c24_327, %c0_328, %c0_329] : memref<30x32x32xf32, #tpu.memory_space<vmem>>, vector<1x32x32xf32>
    %545 = vector.shape_cast %544 : vector<1x32x32xf32> to vector<32x32xf32>
    %cst_330 = arith.constant dense<0.000000e+00> : vector<16x32xf32>
    %546 = tpu.matmul %535, %545, %cst_330 {dimension_numbers = #tpu.dot_dimension_numbers<[1], [0], [0], [1], [0, 0, 1, 1], [], []>} : vector<16x32xf32>, vector<32x32xf32>, vector<16x32xf32> -> vector<16x32xf32>
    %c35_331 = arith.constant 35 : index
    %c0_332 = arith.constant 0 : index
    %c0_333 = arith.constant 0 : index
    %547 = vector.load %arg5[%c35_331, %c0_332, %c0_333] : memref<41x1x32xf32, #tpu.memory_space<vmem>>, vector<1x1x32xf32>
    %548 = vector.shape_cast %547 : vector<1x1x32xf32> to vector<1x32xf32>
    %549 = vector.broadcast %548 : vector<1x32xf32> to vector<16x32xf32>
    %550 = arith.addf %546, %549 : vector<16x32xf32>
    %c26_334 = arith.constant 26 : index
    %c0_335 = arith.constant 0 : index
    %c0_336 = arith.constant 0 : index
    %551 = vector.load %arg4[%c26_334, %c0_335, %c0_336] : memref<30x32x32xf32, #tpu.memory_space<vmem>>, vector<1x32x32xf32>
    %552 = vector.shape_cast %551 : vector<1x32x32xf32> to vector<32x32xf32>
    %cst_337 = arith.constant dense<0.000000e+00> : vector<16x32xf32>
    %553 = tpu.matmul %535, %552, %cst_337 {dimension_numbers = #tpu.dot_dimension_numbers<[1], [0], [0], [1], [0, 0, 1, 1], [], []>} : vector<16x32xf32>, vector<32x32xf32>, vector<16x32xf32> -> vector<16x32xf32>
    %c37_338 = arith.constant 37 : index
    %c0_339 = arith.constant 0 : index
    %c0_340 = arith.constant 0 : index
    %554 = vector.load %arg5[%c37_338, %c0_339, %c0_340] : memref<41x1x32xf32, #tpu.memory_space<vmem>>, vector<1x1x32xf32>
    %555 = vector.shape_cast %554 : vector<1x1x32xf32> to vector<1x32xf32>
    %556 = vector.broadcast %555 : vector<1x32xf32> to vector<16x32xf32>
    %557 = arith.addf %553, %556 : vector<16x32xf32>
    %cst_341 = arith.constant dense<0.000000e+00> : vector<16x16xf32>
    %558 = tpu.matmul %543, %550, %cst_341 {dimension_numbers = #tpu.dot_dimension_numbers<[1], [1], [0], [0], [0, 0, 1, 0], [], []>} : vector<16x32xf32>, vector<16x32xf32>, vector<16x16xf32> -> vector<16x16xf32>
    %cst_342 = arith.constant 2.500000e-01 : f32
    %559 = vector.broadcast %cst_342 : f32 to vector<16x16xf32>
    %560 = arith.mulf %558, %559 : vector<16x16xf32>
    %cst_343 = arith.constant dense<0xFF800000> : vector<16xf32>
    %561 = vector.multi_reduction <maximumf>, %560, %cst_343 [1] : vector<16x16xf32> to vector<16xf32>
    %562 = vector.shape_cast %561 : vector<16xf32> to vector<16x1xf32>
    %563 = vector.broadcast %562 : vector<16x1xf32> to vector<16x16xf32>
    %564 = arith.subf %560, %563 : vector<16x16xf32>
    %565 = math.exp %564 : vector<16x16xf32>
    %cst_344 = arith.constant dense<0.000000e+00> : vector<16xf32>
    %566 = vector.multi_reduction <add>, %565, %cst_344 [1] : vector<16x16xf32> to vector<16xf32>
    %567 = vector.shape_cast %566 : vector<16xf32> to vector<16x1xf32>
    %568 = vector.broadcast %567 : vector<16x1xf32> to vector<16x16xf32>
    %569 = arith.divf %565, %568 : vector<16x16xf32>
    %cst_345 = arith.constant dense<0.000000e+00> : vector<16x32xf32>
    %570 = tpu.matmul %569, %557, %cst_345 {dimension_numbers = #tpu.dot_dimension_numbers<[1], [0], [0], [1], [0, 0, 1, 1], [], []>} : vector<16x16xf32>, vector<16x32xf32>, vector<16x32xf32> -> vector<16x32xf32>
    %c28_346 = arith.constant 28 : index
    %c0_347 = arith.constant 0 : index
    %c0_348 = arith.constant 0 : index
    %571 = vector.load %arg4[%c28_346, %c0_347, %c0_348] : memref<30x32x32xf32, #tpu.memory_space<vmem>>, vector<1x32x32xf32>
    %572 = vector.shape_cast %571 : vector<1x32x32xf32> to vector<32x32xf32>
    %cst_349 = arith.constant dense<0.000000e+00> : vector<16x32xf32>
    %573 = tpu.matmul %570, %572, %cst_349 {dimension_numbers = #tpu.dot_dimension_numbers<[1], [0], [0], [1], [0, 0, 1, 1], [], []>} : vector<16x32xf32>, vector<32x32xf32>, vector<16x32xf32> -> vector<16x32xf32>
    %574 = arith.addf %536, %573 : vector<16x32xf32>
    %c23_350 = arith.constant 23 : index
    %c0_351 = arith.constant 0 : index
    %c0_352 = arith.constant 0 : index
    %575 = vector.load %arg4[%c23_350, %c0_351, %c0_352] : memref<30x32x32xf32, #tpu.memory_space<vmem>>, vector<1x32x32xf32>
    %576 = vector.shape_cast %575 : vector<1x32x32xf32> to vector<32x32xf32>
    %cst_353 = arith.constant dense<0.000000e+00> : vector<16x32xf32>
    %577 = tpu.matmul %535, %576, %cst_353 {dimension_numbers = #tpu.dot_dimension_numbers<[1], [0], [0], [1], [0, 0, 1, 1], [], []>} : vector<16x32xf32>, vector<32x32xf32>, vector<16x32xf32> -> vector<16x32xf32>
    %c34_354 = arith.constant 34 : index
    %c0_355 = arith.constant 0 : index
    %c0_356 = arith.constant 0 : index
    %578 = vector.load %arg5[%c34_354, %c0_355, %c0_356] : memref<41x1x32xf32, #tpu.memory_space<vmem>>, vector<1x1x32xf32>
    %579 = vector.shape_cast %578 : vector<1x1x32xf32> to vector<1x32xf32>
    %580 = vector.broadcast %579 : vector<1x32xf32> to vector<16x32xf32>
    %581 = arith.addf %577, %580 : vector<16x32xf32>
    %c25_357 = arith.constant 25 : index
    %c0_358 = arith.constant 0 : index
    %c0_359 = arith.constant 0 : index
    %582 = vector.load %arg4[%c25_357, %c0_358, %c0_359] : memref<30x32x32xf32, #tpu.memory_space<vmem>>, vector<1x32x32xf32>
    %583 = vector.shape_cast %582 : vector<1x32x32xf32> to vector<32x32xf32>
    %cst_360 = arith.constant dense<0.000000e+00> : vector<16x32xf32>
    %584 = tpu.matmul %535, %583, %cst_360 {dimension_numbers = #tpu.dot_dimension_numbers<[1], [0], [0], [1], [0, 0, 1, 1], [], []>} : vector<16x32xf32>, vector<32x32xf32>, vector<16x32xf32> -> vector<16x32xf32>
    %c36_361 = arith.constant 36 : index
    %c0_362 = arith.constant 0 : index
    %c0_363 = arith.constant 0 : index
    %585 = vector.load %arg5[%c36_361, %c0_362, %c0_363] : memref<41x1x32xf32, #tpu.memory_space<vmem>>, vector<1x1x32xf32>
    %586 = vector.shape_cast %585 : vector<1x1x32xf32> to vector<1x32xf32>
    %587 = vector.broadcast %586 : vector<1x32xf32> to vector<16x32xf32>
    %588 = arith.addf %584, %587 : vector<16x32xf32>
    %c27_364 = arith.constant 27 : index
    %c0_365 = arith.constant 0 : index
    %c0_366 = arith.constant 0 : index
    %589 = vector.load %arg4[%c27_364, %c0_365, %c0_366] : memref<30x32x32xf32, #tpu.memory_space<vmem>>, vector<1x32x32xf32>
    %590 = vector.shape_cast %589 : vector<1x32x32xf32> to vector<32x32xf32>
    %cst_367 = arith.constant dense<0.000000e+00> : vector<16x32xf32>
    %591 = tpu.matmul %535, %590, %cst_367 {dimension_numbers = #tpu.dot_dimension_numbers<[1], [0], [0], [1], [0, 0, 1, 1], [], []>} : vector<16x32xf32>, vector<32x32xf32>, vector<16x32xf32> -> vector<16x32xf32>
    %c38_368 = arith.constant 38 : index
    %c0_369 = arith.constant 0 : index
    %c0_370 = arith.constant 0 : index
    %592 = vector.load %arg5[%c38_368, %c0_369, %c0_370] : memref<41x1x32xf32, #tpu.memory_space<vmem>>, vector<1x1x32xf32>
    %593 = vector.shape_cast %592 : vector<1x1x32xf32> to vector<1x32xf32>
    %594 = vector.broadcast %593 : vector<1x32xf32> to vector<16x32xf32>
    %595 = arith.addf %591, %594 : vector<16x32xf32>
    %cst_371 = arith.constant dense<0.000000e+00> : vector<16x16xf32>
    %596 = tpu.matmul %581, %588, %cst_371 {dimension_numbers = #tpu.dot_dimension_numbers<[1], [1], [0], [0], [0, 0, 1, 0], [], []>} : vector<16x32xf32>, vector<16x32xf32>, vector<16x16xf32> -> vector<16x16xf32>
    %cst_372 = arith.constant 2.500000e-01 : f32
    %597 = vector.broadcast %cst_372 : f32 to vector<16x16xf32>
    %598 = arith.mulf %596, %597 : vector<16x16xf32>
    %cst_373 = arith.constant dense<0xFF800000> : vector<16xf32>
    %599 = vector.multi_reduction <maximumf>, %598, %cst_373 [1] : vector<16x16xf32> to vector<16xf32>
    %600 = vector.shape_cast %599 : vector<16xf32> to vector<16x1xf32>
    %601 = vector.broadcast %600 : vector<16x1xf32> to vector<16x16xf32>
    %602 = arith.subf %598, %601 : vector<16x16xf32>
    %603 = math.exp %602 : vector<16x16xf32>
    %cst_374 = arith.constant dense<0.000000e+00> : vector<16xf32>
    %604 = vector.multi_reduction <add>, %603, %cst_374 [1] : vector<16x16xf32> to vector<16xf32>
    %605 = vector.shape_cast %604 : vector<16xf32> to vector<16x1xf32>
    %606 = vector.broadcast %605 : vector<16x1xf32> to vector<16x16xf32>
    %607 = arith.divf %603, %606 : vector<16x16xf32>
    %cst_375 = arith.constant dense<0.000000e+00> : vector<16x32xf32>
    %608 = tpu.matmul %607, %595, %cst_375 {dimension_numbers = #tpu.dot_dimension_numbers<[1], [0], [0], [1], [0, 0, 1, 1], [], []>} : vector<16x16xf32>, vector<16x32xf32>, vector<16x32xf32> -> vector<16x32xf32>
    %c29_376 = arith.constant 29 : index
    %c0_377 = arith.constant 0 : index
    %c0_378 = arith.constant 0 : index
    %609 = vector.load %arg4[%c29_376, %c0_377, %c0_378] : memref<30x32x32xf32, #tpu.memory_space<vmem>>, vector<1x32x32xf32>
    %610 = vector.shape_cast %609 : vector<1x32x32xf32> to vector<32x32xf32>
    %cst_379 = arith.constant dense<0.000000e+00> : vector<16x32xf32>
    %611 = tpu.matmul %608, %610, %cst_379 {dimension_numbers = #tpu.dot_dimension_numbers<[1], [0], [0], [1], [0, 0, 1, 1], [], []>} : vector<16x32xf32>, vector<32x32xf32>, vector<16x32xf32> -> vector<16x32xf32>
    %612 = arith.addf %574, %611 : vector<16x32xf32>
    %c39_380 = arith.constant 39 : index
    %c0_381 = arith.constant 0 : index
    %c0_382 = arith.constant 0 : index
    %613 = vector.load %arg5[%c39_380, %c0_381, %c0_382] : memref<41x1x32xf32, #tpu.memory_space<vmem>>, vector<1x1x32xf32>
    %614 = vector.shape_cast %613 : vector<1x1x32xf32> to vector<1x32xf32>
    %615 = vector.broadcast %614 : vector<1x32xf32> to vector<16x32xf32>
    %616 = arith.addf %612, %615 : vector<16x32xf32>
    %617 = vector.extract_strided_slice %386 {offsets = [1, 0], sizes = [1, 32], strides = [1, 1]} : vector<2x32xf32> to vector<1x32xf32>
    %618 = vector.broadcast %617 : vector<1x32xf32> to vector<16x32xf32>
    %619 = arith.mulf %616, %618 : vector<16x32xf32>
    %620 = tpu.concatenate %526, %619 in 0 : vector<16x32xf32>, vector<16x32xf32> -> vector<32x32xf32>
    %621 = arith.addf %365, %620 : vector<32x32xf32>
    %c25_383 = arith.constant 25 : index
    %c0_384 = arith.constant 0 : index
    %c0_385 = arith.constant 0 : index
    %622 = vector.load %arg5[%c25_383, %c0_384, %c0_385] : memref<41x1x32xf32, #tpu.memory_space<vmem>>, vector<1x1x32xf32>
    %623 = vector.shape_cast %622 : vector<1x1x32xf32> to vector<1x32xf32>
    %c26_386 = arith.constant 26 : index
    %c0_387 = arith.constant 0 : index
    %c0_388 = arith.constant 0 : index
    %624 = vector.load %arg5[%c26_386, %c0_387, %c0_388] : memref<41x1x32xf32, #tpu.memory_space<vmem>>, vector<1x1x32xf32>
    %625 = vector.shape_cast %624 : vector<1x1x32xf32> to vector<1x32xf32>
    %cst_389 = arith.constant dense<0.000000e+00> : vector<32xf32>
    %626 = vector.multi_reduction <add>, %621, %cst_389 [1] : vector<32x32xf32> to vector<32xf32>
    %627 = vector.shape_cast %626 : vector<32xf32> to vector<32x1xf32>
    %cst_390 = arith.constant 3.200000e+01 : f32
    %628 = vector.broadcast %cst_390 : f32 to vector<32x1xf32>
    %629 = arith.divf %627, %628 : vector<32x1xf32>
    %630 = vector.broadcast %629 : vector<32x1xf32> to vector<32x32xf32>
    %631 = arith.subf %621, %630 : vector<32x32xf32>
    %632 = arith.mulf %631, %631 : vector<32x32xf32>
    %cst_391 = arith.constant dense<0.000000e+00> : vector<32xf32>
    %633 = vector.multi_reduction <add>, %632, %cst_391 [1] : vector<32x32xf32> to vector<32xf32>
    %634 = vector.shape_cast %633 : vector<32xf32> to vector<32x1xf32>
    %cst_392 = arith.constant 3.200000e+01 : f32
    %635 = vector.broadcast %cst_392 : f32 to vector<32x1xf32>
    %636 = arith.divf %634, %635 : vector<32x1xf32>
    %637 = vector.broadcast %629 : vector<32x1xf32> to vector<32x32xf32>
    %638 = arith.subf %621, %637 : vector<32x32xf32>
    %cst_393 = arith.constant 9.99999974E-6 : f32
    %639 = vector.broadcast %cst_393 : f32 to vector<32x1xf32>
    %640 = arith.addf %636, %639 : vector<32x1xf32>
    %641 = math.rsqrt %640 : vector<32x1xf32>
    %642 = vector.broadcast %641 : vector<32x1xf32> to vector<32x32xf32>
    %643 = arith.mulf %638, %642 : vector<32x32xf32>
    %644 = vector.broadcast %623 : vector<1x32xf32> to vector<32x32xf32>
    %645 = arith.mulf %643, %644 : vector<32x32xf32>
    %646 = vector.broadcast %625 : vector<1x32xf32> to vector<32x32xf32>
    %647 = arith.addf %645, %646 : vector<32x32xf32>
    %648 = vector.extract_strided_slice %647 {offsets = [0, 0], sizes = [16, 32], strides = [1, 1]} : vector<32x32xf32> to vector<16x32xf32>
    %649 = vector.extract_strided_slice %393 {offsets = [0, 0], sizes = [1, 32], strides = [1, 1]} : vector<2x32xf32> to vector<1x32xf32>
    %cst_394 = arith.constant 1.000000e+00 : f32
    %650 = vector.broadcast %cst_394 : f32 to vector<1x32xf32>
    %651 = arith.addf %650, %649 : vector<1x32xf32>
    %652 = vector.broadcast %651 : vector<1x32xf32> to vector<16x32xf32>
    %653 = arith.mulf %648, %652 : vector<16x32xf32>
    %654 = vector.extract_strided_slice %400 {offsets = [0, 0], sizes = [1, 32], strides = [1, 1]} : vector<2x32xf32> to vector<1x32xf32>
    %655 = vector.broadcast %654 : vector<1x32xf32> to vector<16x32xf32>
    %656 = arith.addf %653, %655 : vector<16x32xf32>
    %657 = vector.extract_strided_slice %647 {offsets = [16, 0], sizes = [16, 32], strides = [1, 1]} : vector<32x32xf32> to vector<16x32xf32>
    %658 = vector.extract_strided_slice %393 {offsets = [1, 0], sizes = [1, 32], strides = [1, 1]} : vector<2x32xf32> to vector<1x32xf32>
    %cst_395 = arith.constant 1.000000e+00 : f32
    %659 = vector.broadcast %cst_395 : f32 to vector<1x32xf32>
    %660 = arith.addf %659, %658 : vector<1x32xf32>
    %661 = vector.broadcast %660 : vector<1x32xf32> to vector<16x32xf32>
    %662 = arith.mulf %657, %661 : vector<16x32xf32>
    %663 = vector.extract_strided_slice %400 {offsets = [1, 0], sizes = [1, 32], strides = [1, 1]} : vector<2x32xf32> to vector<1x32xf32>
    %664 = vector.broadcast %663 : vector<1x32xf32> to vector<16x32xf32>
    %665 = arith.addf %662, %664 : vector<16x32xf32>
    %666 = tpu.concatenate %656, %665 in 0 : vector<16x32xf32>, vector<16x32xf32> -> vector<32x32xf32>
    %c1_396 = arith.constant 1 : index
    %c0_397 = arith.constant 0 : index
    %c0_398 = arith.constant 0 : index
    %667 = vector.load %arg6[%c1_396, %c0_397, %c0_398] : memref<2x40x128xf32, #tpu.memory_space<vmem>>, vector<1x40x128xf32>
    %668 = vector.shape_cast %667 : vector<1x40x128xf32> to vector<40x128xf32>
    %669 = vector.extract_strided_slice %668 {offsets = [0, 0], sizes = [32, 128], strides = [1, 1]} : vector<40x128xf32> to vector<32x128xf32>
    %cst_399 = arith.constant dense<0.000000e+00> : vector<32x128xf32>
    %670 = tpu.matmul %666, %669, %cst_399 {dimension_numbers = #tpu.dot_dimension_numbers<[1], [0], [0], [1], [0, 0, 1, 1], [], []>} : vector<32x32xf32>, vector<32x128xf32>, vector<32x128xf32> -> vector<32x128xf32>
    %671 = vector.extract_strided_slice %668 {offsets = [32, 0], sizes = [1, 128], strides = [1, 1]} : vector<40x128xf32> to vector<1x128xf32>
    %672 = vector.broadcast %671 : vector<1x128xf32> to vector<32x128xf32>
    %673 = arith.addf %670, %672 : vector<32x128xf32>
    %cst_400 = arith.constant 0.000000e+00 : f32
    %674 = vector.broadcast %cst_400 : f32 to vector<32x128xf32>
    %675 = arith.maximumf %673, %674 : vector<32x128xf32>
    %c1_401 = arith.constant 1 : index
    %c0_402 = arith.constant 0 : index
    %c0_403 = arith.constant 0 : index
    %676 = vector.load %arg7[%c1_401, %c0_402, %c0_403] : memref<2x128x32xf32, #tpu.memory_space<vmem>>, vector<1x128x32xf32>
    %677 = vector.shape_cast %676 : vector<1x128x32xf32> to vector<128x32xf32>
    %cst_404 = arith.constant dense<0.000000e+00> : vector<32x32xf32>
    %678 = tpu.matmul %675, %677, %cst_404 {dimension_numbers = #tpu.dot_dimension_numbers<[1], [0], [0], [1], [0, 0, 1, 1], [], []>} : vector<32x128xf32>, vector<128x32xf32>, vector<32x32xf32> -> vector<32x32xf32>
    %c40 = arith.constant 40 : index
    %c0_405 = arith.constant 0 : index
    %c0_406 = arith.constant 0 : index
    %679 = vector.load %arg5[%c40, %c0_405, %c0_406] : memref<41x1x32xf32, #tpu.memory_space<vmem>>, vector<1x1x32xf32>
    %680 = vector.shape_cast %679 : vector<1x1x32xf32> to vector<1x32xf32>
    %681 = vector.broadcast %680 : vector<1x32xf32> to vector<32x32xf32>
    %682 = arith.addf %678, %681 : vector<32x32xf32>
    %683 = vector.extract_strided_slice %682 {offsets = [0, 0], sizes = [16, 32], strides = [1, 1]} : vector<32x32xf32> to vector<16x32xf32>
    %684 = vector.extract_strided_slice %407 {offsets = [0, 0], sizes = [1, 32], strides = [1, 1]} : vector<2x32xf32> to vector<1x32xf32>
    %685 = vector.broadcast %684 : vector<1x32xf32> to vector<16x32xf32>
    %686 = arith.mulf %683, %685 : vector<16x32xf32>
    %687 = vector.extract_strided_slice %682 {offsets = [16, 0], sizes = [16, 32], strides = [1, 1]} : vector<32x32xf32> to vector<16x32xf32>
    %688 = vector.extract_strided_slice %407 {offsets = [1, 0], sizes = [1, 32], strides = [1, 1]} : vector<2x32xf32> to vector<1x32xf32>
    %689 = vector.broadcast %688 : vector<1x32xf32> to vector<16x32xf32>
    %690 = arith.mulf %687, %689 : vector<16x32xf32>
    %691 = tpu.concatenate %686, %690 in 0 : vector<16x32xf32>, vector<16x32xf32> -> vector<32x32xf32>
    %692 = arith.addf %621, %691 : vector<32x32xf32>
    %c3_407 = arith.constant 3 : index
    %c0_408 = arith.constant 0 : index
    %c0_409 = arith.constant 0 : index
    %693 = vector.load %arg5[%c3_407, %c0_408, %c0_409] : memref<41x1x32xf32, #tpu.memory_space<vmem>>, vector<1x1x32xf32>
    %694 = vector.shape_cast %693 : vector<1x1x32xf32> to vector<1x32xf32>
    %c4_410 = arith.constant 4 : index
    %c0_411 = arith.constant 0 : index
    %c0_412 = arith.constant 0 : index
    %695 = vector.load %arg5[%c4_410, %c0_411, %c0_412] : memref<41x1x32xf32, #tpu.memory_space<vmem>>, vector<1x1x32xf32>
    %696 = vector.shape_cast %695 : vector<1x1x32xf32> to vector<1x32xf32>
    %cst_413 = arith.constant dense<0.000000e+00> : vector<32xf32>
    %697 = vector.multi_reduction <add>, %692, %cst_413 [1] : vector<32x32xf32> to vector<32xf32>
    %698 = vector.shape_cast %697 : vector<32xf32> to vector<32x1xf32>
    %cst_414 = arith.constant 3.200000e+01 : f32
    %699 = vector.broadcast %cst_414 : f32 to vector<32x1xf32>
    %700 = arith.divf %698, %699 : vector<32x1xf32>
    %701 = vector.broadcast %700 : vector<32x1xf32> to vector<32x32xf32>
    %702 = arith.subf %692, %701 : vector<32x32xf32>
    %703 = arith.mulf %702, %702 : vector<32x32xf32>
    %cst_415 = arith.constant dense<0.000000e+00> : vector<32xf32>
    %704 = vector.multi_reduction <add>, %703, %cst_415 [1] : vector<32x32xf32> to vector<32xf32>
    %705 = vector.shape_cast %704 : vector<32xf32> to vector<32x1xf32>
    %cst_416 = arith.constant 3.200000e+01 : f32
    %706 = vector.broadcast %cst_416 : f32 to vector<32x1xf32>
    %707 = arith.divf %705, %706 : vector<32x1xf32>
    %708 = vector.broadcast %700 : vector<32x1xf32> to vector<32x32xf32>
    %709 = arith.subf %692, %708 : vector<32x32xf32>
    %cst_417 = arith.constant 9.99999974E-6 : f32
    %710 = vector.broadcast %cst_417 : f32 to vector<32x1xf32>
    %711 = arith.addf %707, %710 : vector<32x1xf32>
    %712 = math.rsqrt %711 : vector<32x1xf32>
    %713 = vector.broadcast %712 : vector<32x1xf32> to vector<32x32xf32>
    %714 = arith.mulf %709, %713 : vector<32x32xf32>
    %715 = vector.broadcast %694 : vector<1x32xf32> to vector<32x32xf32>
    %716 = arith.mulf %714, %715 : vector<32x32xf32>
    %717 = vector.broadcast %696 : vector<1x32xf32> to vector<32x32xf32>
    %718 = arith.addf %716, %717 : vector<32x32xf32>
    %c0_418 = arith.constant 0 : index
    %c0_419 = arith.constant 0 : index
    %719 = vector.load %arg8[%c0_418, %c0_419] : memref<40x64xf32, #tpu.memory_space<vmem>>, vector<40x64xf32>
    %720 = vector.extract_strided_slice %719 {offsets = [0, 0], sizes = [32, 64], strides = [1, 1]} : vector<40x64xf32> to vector<32x64xf32>
    %cst_420 = arith.constant dense<0.000000e+00> : vector<32x64xf32>
    %721 = tpu.matmul %718, %720, %cst_420 {dimension_numbers = #tpu.dot_dimension_numbers<[1], [0], [0], [1], [0, 0, 1, 1], [], []>} : vector<32x32xf32>, vector<32x64xf32>, vector<32x64xf32> -> vector<32x64xf32>
    %722 = vector.extract_strided_slice %719 {offsets = [32, 0], sizes = [1, 64], strides = [1, 1]} : vector<40x64xf32> to vector<1x64xf32>
    %723 = vector.broadcast %722 : vector<1x64xf32> to vector<32x64xf32>
    %724 = arith.addf %721, %723 : vector<32x64xf32>
    %c0_421 = arith.constant 0 : index
    %c0_422 = arith.constant 0 : index
    %725 = vector.load %arg9[%c0_421, %c0_422] : memref<32x64xf32, #tpu.memory_space<vmem>>, vector<32x64xf32>
    tpu.vector_store %arg9[%c0_421, %c0_422], %724 {strides = array<i32>} : memref<32x64xf32, #tpu.memory_space<vmem>>, vector<32x64xf32>,
    return
  }
  func.func @transform_0(%arg0: i32) -> (i32, i32, i32) {
    %c0_i32 = arith.constant 0 : i32
    %c0_i32_0 = arith.constant 0 : i32
    %c0_i32_1 = arith.constant 0 : i32
    %c0_i32_2 = arith.constant 0 : i32
    return %c0_i32, %c0_i32_0, %c0_i32_1 : i32, i32, i32
  }
  func.func @transform_1(%arg0: i32) -> (i32, i32) {
    %c0_i32 = arith.constant 0 : i32
    %c0_i32_0 = arith.constant 0 : i32
    %c0_i32_1 = arith.constant 0 : i32
    return %c0_i32, %c0_i32_0 : i32, i32
  }
  func.func @transform_2(%arg0: i32) -> (i32, i32, i32) {
    %c0_i32 = arith.constant 0 : i32
    %c0_i32_0 = arith.constant 0 : i32
    %c0_i32_1 = arith.constant 0 : i32
    %c0_i32_2 = arith.constant 0 : i32
    return %c0_i32, %c0_i32_0, %c0_i32_1 : i32, i32, i32
  }
  func.func @transform_3(%arg0: i32) -> (i32, i32, i32) {
    %c0_i32 = arith.constant 0 : i32
    %c0_i32_0 = arith.constant 0 : i32
    %c0_i32_1 = arith.constant 0 : i32
    %c0_i32_2 = arith.constant 0 : i32
    return %c0_i32, %c0_i32_0, %c0_i32_1 : i32, i32, i32
  }
  func.func @transform_4(%arg0: i32) -> (i32, i32, i32) {
    %c0_i32 = arith.constant 0 : i32
    %c0_i32_0 = arith.constant 0 : i32
    %c0_i32_1 = arith.constant 0 : i32
    %c0_i32_2 = arith.constant 0 : i32
    return %c0_i32, %c0_i32_0, %c0_i32_1 : i32, i32, i32
  }
  func.func @transform_5(%arg0: i32) -> (i32, i32, i32) {
    %c0_i32 = arith.constant 0 : i32
    %c0_i32_0 = arith.constant 0 : i32
    %c0_i32_1 = arith.constant 0 : i32
    %c0_i32_2 = arith.constant 0 : i32
    return %c0_i32, %c0_i32_0, %c0_i32_1 : i32, i32, i32
  }
  func.func @transform_6(%arg0: i32) -> (i32, i32, i32) {
    %c0_i32 = arith.constant 0 : i32
    %c0_i32_0 = arith.constant 0 : i32
    %c0_i32_1 = arith.constant 0 : i32
    %c0_i32_2 = arith.constant 0 : i32
    return %c0_i32, %c0_i32_0, %c0_i32_1 : i32, i32, i32
  }
  func.func @transform_7(%arg0: i32) -> (i32, i32) {
    %c0_i32 = arith.constant 0 : i32
    %c0_i32_0 = arith.constant 0 : i32
    %c0_i32_1 = arith.constant 0 : i32
    return %c0_i32, %c0_i32_0 : i32, i32
  }
  func.func @transform_8(%arg0: i32) -> (i32, i32) {
    %c0_i32 = arith.constant 0 : i32
    %c0_i32_0 = arith.constant 0 : i32
    %c0_i32_1 = arith.constant 0 : i32
    return %c0_i32, %c0_i32_0 : i32, i32
  }
}

</mosaic_0001>

<bundles_post_ra>
// kernel: dit_forward.1
= control target key start
LH: loop header
LB: loop body
LE: loop exit
PB: predicated region body
PF: predicated region fallthrough
CT: control target
= control target key end

     0   :  { %v10464_v0 = vmov 0.0   ;;  %vm8501_vm0 = vmmov 0   ;;  %v8502_v19 = vmov 683565275   ;;  %v8503_v21 = vmov 2475754826   ;;  %s10455_s3 = inlined_call_operand.vmem [shape: f32[30,32,32], index: 3, kind: input, shape index: {}]   ;;  %s10456_s0 = inlined_call_operand.vmem [shape: f32[2,2,32], index: 0, kind: input, shape index: {}]   ;;  %s10457_s4 = inlined_call_operand.vmem [shape: f32[41,1,32], index: 4, kind: input, shape index: {}]   ;;  %s10458_s2 = inlined_call_operand.vmem [shape: f32[2,64,32], index: 2, kind: input, shape index: {}]   ;;  %s10459_s1 = inlined_call_operand.vmem [shape: f32[32,64], index: 1, kind: input, shape index: {}]   ;;  %s10460_s5 = inlined_call_operand.vmem [shape: f32[2,40,128], index: 5, kind: input, shape index: {}]   ;;  %s10461_s6 = inlined_call_operand.vmem [shape: f32[2,128,32], index: 6, kind: input, shape index: {}]   ;;  %s10462_s7 = inlined_call_operand.vmem [shape: f32[40,64], index: 7, kind: input, shape index: {}]   ;;  %s10463_s8 = inlined_call_operand.vmem [shape: f32[32,64], index: 8, kind: output, shape index: {}]  }
   0x1   :  { %7622 = vmatprep.subr.mxu0 %v10464_v0  ;;  %v252_v1 = vld [vmem:[%s10455_s3 + $0x18] sm:$0xff]  ;;  %v251_v2 = vld [vmem:[%s10455_s3 + $0x10] sm:$0xff]  ;;  %7630 = vmatprep.mubr.msk.f32.mxu0 %vm8501_vm0, %v10464_v0  ;;  %v29_v3 = vld [vmem:[%s10456_s0] sm:$0x3]  ;;  %v8504_v23 = vmov 2131351028  }
   0x2   :  { %7623 = vmatpush3.msra.mxu0 %v252_v1  ;;  %v6847_v4 = vld [vmem:[%s10457_s4] ss:$0 sm:$0xff]  ;;  %7666 = vmatprep.subr.mxu1 %v10464_v0  ;;  %v250_v5 = vld [vmem:[%s10455_s3 + $0x8] sm:$0xff]  ;;  %v8505_v25 = vmov 2102212464  }
   0x3   :  { %7624 = vmatprep.subr.mxu0 %v10464_v0  ;;  %v8573_v6 = vmul.f32 %v6847_v4, %v29_v3  ;;  %7674 = vmatprep.mubr.msk.f32.mxu1 %vm8501_vm0, %v10464_v0  ;;  %v249_v7 = vld [vmem:[%s10455_s3] sm:$0xff]  ;;  %v8506_v27 = vmov 920167782   ;;  %v8507_v34 = vmov 1326507024  }
   0x4   :  { %7625 = vmatpush3.msra.mxu0 %v251_v2 }
   0x5   :  { %7626 = vmatprep.subr.mxu0 %v10464_v0  ;;  %v44_v8 = vand.u32 2139095040, %v8573_v6  ;;  %v41_v10 = vand.u32 2147483647, %v8573_v6  ;;  %vm43_vm8 = vcmp.lt.s32.totalorder %v8573_v6, 0 }
   0x6   :  { %7627 = vmatpush3.msra.mxu0 %v250_v5 }
   0x7   :  { %7628 = vmatprep.subr.mxu0 %v10464_v0  ;;  %v45_v9 = vshrl.u32 %v44_v8, 23  ;;  %v48_v13 = vand.u32 8388607, %v41_v10  ;;  %vm42_vm9 = vcmp.le.f32.partialorder %v41_v10, 0.7853982 }
   0x8   :  { %7629 = vmatpush3.msra.mxu0 %v249_v7 }
   0x9   :  { %v6848_v11 = vadd.s32 4294967169, %v45_v9  ;;  %7633 = vmatprep.subr.mxu0 %v10464_v0  ;;  %v49_v16 = vor.u32 8388608, %v48_v13 }
   0xb   :  { %v51_v12 = vadd.s32 1, %v6848_v11  ;;  %v89_v36 = vshll.u32 %v49_v16, 8 }
   0xd   :  { %vm52_vm1 = vcmp.gt.s32.totalorder %v51_v12, 0 }
   0xe   :  { %v53_v14 = vsel %vm52_vm1, %v51_v12, 0  ;;  %vm133_vm1 = vweird.f32 %v8573_v6 }
   0xf   :  { %v55_v15 = vand.u32 31, %v53_v14  ;;  %v54_v17 = vshrl.u32 %v53_v14, 5 }
  0x11   :  { %v56_v18 = vsub.s32 32, %v55_v15  ;;  %v58_v20 = vshll.u32 %v8502_v19, %v55_v15  ;;  %v61_v22 = vshll.u32 %v8503_v21, %v55_v15  ;;  %v64_v24 = vshll.u32 %v8504_v23, %v55_v15 }
  0x12   :  { %v67_v26 = vshll.u32 %v8505_v25, %v55_v15  ;;  %v70_v28 = vshll.u32 %v8506_v27, %v55_v15  ;;  %vm73_vm2 = vcmp.lt.s32.totalorder %v54_v17, 1  ;;  %vm76_vm3 = vcmp.lt.s32.totalorder %v54_v17, 4 }
  0x13   :  { %v57_v29 = vshrl.u32 %v8502_v19, %v56_v18  ;;  %v59_v30 = vshrl.u32 %v8503_v21, %v56_v18  ;;  %v62_v31 = vshrl.u32 %v8504_v23, %v56_v18  ;;  %v65_v32 = vshrl.u32 %v8505_v25, %v56_v18 }
  0x14   :  { %v68_v33 = vshrl.u32 %v8506_v27, %v56_v18  ;;  %v71_v35 = vshrl.u32 %v8507_v34, %v56_v18  ;;  %vm74_vm4 = vcmp.lt.s32.totalorder %v54_v17, 2  ;;  %vm75_vm5 = vcmp.lt.s32.totalorder %v54_v17, 3 }
  0x15   :  { %v60_v37 = vor.u32 %v59_v30, %v58_v20  ;;  %v63_v38 = vor.u32 %v62_v31, %v61_v22  ;;  %v66_v39 = vor.u32 %v65_v32, %v64_v24 }
  0x16   :  { %v69_v40 = vor.u32 %v68_v33, %v67_v26  ;;  %v72_v41 = vor.u32 %v71_v35, %v70_v28 }
  0x17   :  { %v77_v42 = vsel %vm73_vm2, %v57_v29, %v60_v37  ;;  %v78_v43 = vsel %vm76_vm3, %v66_v39, 2102212464  ;;  %v81_v44 = vsel %vm73_vm2, %v60_v37, %v63_v38  ;;  %v85_v45 = vsel %vm73_vm2, %v63_v38, %v66_v39 }
  0x18   :  { %v79_v46 = vsel %vm75_vm5, %v63_v38, %v78_v43  ;;  %v82_v47 = vsel %vm76_vm3, %v69_v40, 920167782  ;;  %v86_v48 = vsel %vm76_vm3, %v72_v41, 1326507024  ;;  %v38_v29 = vlaneseq }
  0x19   :  { %v83_v49 = vsel %vm75_vm5, %v66_v39, %v82_v47  ;;  %v87_v50 = vsel %vm75_vm5, %v69_v40, %v86_v48  ;;  %v80_v51 = vsel %vm74_vm4, %v77_v42, %v79_v46  ;;  %vm261_vm3 = vcmask 261120   ;;  %v6860_v46 = vld [vmem:[%s10455_s3 + $0x28] sm:$0xff]  ;;  %v6859_v47 = vld [vmem:[%s10455_s3 + $0x20] sm:$0xff]  ;;  %v432_v48 = vld [vmem:[%s10458_s2 + $0x38] sm:$0xff] }
  0x1a   :  { %v84_v52 = vsel %vm74_vm4, %v81_v44, %v83_v49  ;;  %v88_v53 = vsel %vm74_vm4, %v85_v45, %v87_v50  ;;  %v96_v58 = vmul.u32 %v89_v36, %v80_v51  ;;  %v39_v33 = vand.u32 127, %v38_v29  ;;  %v6862_v44 = vld [vmem:[%s10455_s3 + $0x38] sm:$0xff]  ;;  %v6877_v50 = vld [vmem:[%s10455_s3 + $0x50] sm:$0xff]  ;;  %v6857_v51 = vld [vmem:[%s10457_s4 + $0x1] ss:$0 sm:$0xff] }
  0x1b   :  { %v8587_v54 = vmul.u32.u64.low %v89_v36, %v88_v53  ;;  %v8588_v55 = vmul.u32.u64.high %v89_v36, %v88_v53, %v8587_v54  ;;  %v8590_v56 = vmul.u32.u64.low %v89_v36, %v84_v52  ;;  %v8591_v57 = vmul.u32.u64.high %v89_v36, %v84_v52, %v8590_v56  ;;  %v6878_v49 = vld [vmem:[%s10455_s3 + $0x58] sm:$0xff] }
  0x1c   :  { %vm40_vm2 = vcmp.lt.s32.totalorder %v39_v33, 16  ;;  %7667 = vmatpush3.msra.mxu1 %v6878_v49  ;;  %vm442_vm4 = vcmask 523264   ;;  %v6896_v33 = vld [vmem:[%s10455_s3 + $0xa0] sm:$0xff]  ;;  %vm1490_vm5 = vcmask 130048  }
  0x1d   :  { %vm98_vm6 = vc.u32 %v8588_v55, %v8590_v56  ;;  %v99_v59 = vadd.s32 1, %v8591_v57  ;;  %v97_v8 = vadd.s32 %v8590_v56, %v8588_v55  ;;  %7668 = vmatprep.subr.mxu1 %v10464_v0  ;;  %v438_v56 = vld [vmem:[%s10459_s1] sm:$0xff] }
  0x1e   :  { %7669 = vmatpush3.msra.mxu1 %v6877_v50 }
  0x1f   :  { %v100_v60 = vsel %vm98_vm6, %v99_v59, %v8591_v57  ;;  %7670 = vmatprep.subr.mxu1 %v10464_v0  ;;  %v431_v57 = vld [vmem:[%s10458_s2 + $0x30] sm:$0xff]  ;;  %v429_v59 = vld [vmem:[%s10458_s2 + $0x20] sm:$0xff] }
  0x20   :  { %v101_v61 = vadd.s32 %v100_v60, %v96_v58  ;;  %v430_v58 = vld [vmem:[%s10458_s2 + $0x28] sm:$0xff]  ;;  %v428_v60 = vld [vmem:[%s10458_s2 + $0x18] sm:$0xff] }
  0x22   :  { %v102_v62 = vadd.s32 536870912, %v101_v61 }
  0x24   :  { %v103_v63 = vshrl.u32 %v102_v62, 30  ;;  %v426_v62 = vld [vmem:[%s10458_s2 + $0x8] sm:$0xff] }
  0x26   :  { %v104_v1 = vshll.u32 %v103_v63, 30  ;;  %v127_v22 = vsub.s32 4, %v103_v63 }
  0x28   :  { %v105_v2 = vsub.s32 %v101_v61, %v104_v1  ;;  %v128_v25 = vsel %vm43_vm8, %v127_v22, %v103_v63  ;;  %v427_v61 = vld [vmem:[%s10458_s2 + $0x10] sm:$0xff]  ;;  %v425_v63 = vld [vmem:[%s10458_s2] sm:$0xff]  ;;  %v439_v1 = vld [vmem:[%s10459_s1 + $0x8] sm:$0xff] }
  0x29   :  { %v130_v27 = vsel %vm42_vm9, 0, %v128_v25  ;;  %v6883_v22 = vld [vmem:[%s10455_s3 + $0x68] sm:$0xff]  ;;  %v6903_v25 = vld [vmem:[%s10455_s3 + $0xc0] sm:$0xff] }
  0x2a   :  { %v107_v3 = vsub.s32 0, %v105_v2  ;;  %v134_v28 = vadd.s32 3, %v130_v27  ;;  %v238_v31 = vand.u32 3, %v130_v27  ;;  %v6898_v27 = vld [vmem:[%s10455_s3 + $0xb0] sm:$0xff] }
  0x2c   :  { %v6849_v4 = vmin.u32 %v107_v3, %v105_v2  ;;  %v135_v30 = vand.u32 3, %v134_v28  ;;  %vm243_vm11 = vcmp.eq.s32.totalorder %v238_v31, 2  ;;  %vm240_vm13 = vcmp.eq.s32.totalorder %v238_v31, 0  ;;  %v6891_v3 = vld [vmem:[%s10455_s3 + $0x90] sm:$0xff] }
  0x2d   :  { %vm239_vm15 = vcmp.lt.s32.totalorder %v238_v31, 2  ;;  %v6897_v31 = vld [vmem:[%s10455_s3 + $0xa8] sm:$0xff] }
  0x2e   :  { %v109_v5 = vclz %v6849_v4  ;;  %vm140_vm10 = vcmp.eq.s32.totalorder %v135_v30, 2  ;;  %vm137_vm12 = vcmp.eq.s32.totalorder %v135_v30, 0  ;;  %vm136_vm14 = vcmp.lt.s32.totalorder %v135_v30, 2  ;;  %v440_v4 = vld [vmem:[%s10459_s1 + $0x10] sm:$0xff]  ;;  %v6867_v30 = vld [vmem:[%s10458_s2 + $0x40] sm:$0xff] }
  0x30   :  { %v6850_v7 = vadd.s32 4294967294, %v109_v5  ;;  %v441_v5 = vld [vmem:[%s10459_s1 + $0x18] sm:$0xff] }
  0x32   :  { %vm6851_vm7 = vcmp.lt.s32.totalorder %v6850_v7, 0 }
  0x33   :  { %v112_v9 = vsel %vm6851_vm7, 0, %v6850_v7  ;;  %v6876_v7 = vld [vmem:[%s10455_s3 + $0x48] sm:$0xff] }
  0x34   :  { %v113_v11 = vsub.s32 32, %v112_v9  ;;  %v114_v12 = vshll.u32 %v105_v2, %v112_v9  ;;  %v117_v13 = vsub.s32 4294967266, %v112_v9  ;;  %v6892_v2 = vld [vmem:[%s10455_s3 + $0x98] sm:$0xff]  ;;  %7671 = vmatpush3.msra.mxu1 %v6876_v7  ;;  %v6875_v9 = vld [vmem:[%s10455_s3 + $0x40] sm:$0xff] }
  0x35   :  { %7672 = vmatprep.subr.mxu1 %v10464_v0 }
  0x36   :  { %v115_v14 = vshrl.u32 %v97_v8, %v113_v11  ;;  %v118_v15 = vadd.s32 127, %v117_v13  ;;  %v6890_v8 = vld [vmem:[%s10455_s3 + $0x88] sm:$0xff]  ;;  %v6889_v11 = vld [vmem:[%s10455_s3 + $0x80] sm:$0xff]  ;;  %7673 = vmatpush3.msra.mxu1 %v6875_v9 }
  0x37   :  { %7677 = vmatprep.subr.mxu1 %v10464_v0 }
  0x38   :  { %v116_v16 = vor.u32 %v115_v14, %v114_v12  ;;  %v119_v17 = vshll.u32 %v118_v15, 23  ;;  %v6864_v12 = vld [vmem:[%s10457_s4 + $0x2] ss:$0 sm:$0xff] }
  0x39   :  { %v6866_v14 = vld [vmem:[%s10456_s0 + $0x2] sm:$0x3] }
  0x3a   :  { %v120_v18 = vor.u32 4788187, %v119_v17  ;;  %v123_v19 = vcvt.s32.f32 %v116_v16 }
  0x3c   :  { %v121_v20 = vand.u32 2147483647, %v120_v18  ;;  %v6885_v18 = vld [vmem:[%s10455_s3 + $0x78] sm:$0xff] }
  0x3e   :  { %v124_v21 = vmul.f32 %v123_v19, %v121_v20  ;;  %v6906_v19 = vld [vmem:[%s10455_s3 + $0xd8] sm:$0xff]  ;;  %v6884_v20 = vld [vmem:[%s10455_s3 + $0x70] sm:$0xff] }
  0x40   :  { %v125_v23 = vxor.u32 2147483648, %v124_v21 }
  0x42   :  { %v126_v24 = vsel %vm43_vm8, %v125_v23, %v124_v21  ;;  %v6905_v21 = vld [vmem:[%s10455_s3 + $0xd0] sm:$0xff]  ;;  %v6904_v23 = vld [vmem:[%s10455_s3 + $0xc8] sm:$0xff] }
  0x43   :  { %v129_v26 = vsel %vm42_vm9, %v8573_v6, %v126_v24  ;;  %v6861_v6 = vld [vmem:[%s10455_s3 + $0x30] sm:$0xff]  ;;  %v6882_v24 = vld [vmem:[%s10455_s3 + $0x60] sm:$0xff] }
  0x44   :  { %8392 = vcosq.f32 %v129_v26 }
  0x45   :  { %8394 = vsinq.f32 %v129_v26  ;;  %v6899_v26 = vld [vmem:[%s10455_s3 + $0xb8] sm:$0xff] }
  0x51   :  { %v8393_v32 = vpop.eup %8392 }
  0x52   :  { %v8395_v34 = vpop.eup %8394  ;;  %v141_v10 = vxor.u32 2147483648, %v8393_v32 }
  0x53   :  { %v138_v35 = vxor.u32 2147483648, %v8395_v34 }
  0x54   :  { %v142_v36 = vsel %vm140_vm10, %v141_v10, %v8395_v34  ;;  %v245_v37 = vsel %vm243_vm11, %v141_v10, %v8395_v34  ;;  %v6868_v34 = vld [vmem:[%s10458_s2 + $0x48] sm:$0xff] }
  0x55   :  { %v139_v38 = vsel %vm137_vm12, %v8393_v32, %v138_v35  ;;  %v242_v39 = vsel %vm240_vm13, %v8393_v32, %v138_v35  ;;  %v6913_v35 = vld [vmem:[%s10455_s3 + $0xf8] sm:$0xff] }
  0x56   :  { %v143_v40 = vsel %vm136_vm14, %v139_v38, %v142_v36  ;;  %v246_v41 = vsel %vm239_vm15, %v242_v39, %v245_v37  ;;  %v6912_v38 = vld [vmem:[%s10455_s3 + $0xf0] sm:$0xff]  ;;  %v6911_v39 = vld [vmem:[%s10455_s3 + $0xe8] sm:$0xff] }
  0x57   :  { %v144_v42 = vsel %vm133_vm1, nan, %v143_v40  ;;  %v247_v43 = vsel %vm133_vm1, nan, %v246_v41  ;;  %v6910_v41 = vld [vmem:[%s10455_s3 + $0xe0] sm:$0xff] }
  0x58   :  { %v248_v45 = vsel %vm40_vm2, %v144_v42, %v247_v43 }
  0x59   :  { %7631 = vmatmul.mubr.msk.f32.vlgmr.msra.gmra.mxu0 %vm261_vm3, %v248_v45 }
  0x5a   :  { %7634 = vmatpush3.msra.mxu0 %v6862_v44  ;;  %7641 = vmatprep.mubr.msk.f32.mxu0 %vm8501_vm0, %v10464_v0 }
  0x5b   :  { %7635 = vmatprep.subr.mxu0 %v10464_v0 }
  0x5c   :  { %7636 = vmatpush3.msra.mxu0 %v6861_v6 }
  0x5d   :  { %7637 = vmatprep.subr.mxu0 %v10464_v0 }
  0x5e   :  { %7638 = vmatpush3.msra.mxu0 %v6860_v46 }
  0x5f   :  { %7639 = vmatprep.subr.mxu0 %v10464_v0 }
  0x60   :  { %7640 = vmatpush3.msra.mxu0 %v6859_v47 }
  0x61   :  { %7644 = vmatprep.subr.mxu0 %v432_v48 }
 0x119   :  { %v331_v52 = vpop.f32.mrf.mxu0 }
 0x11a   :  { %v332_v53 = vadd.f32 %v6857_v51, %v331_v52 }
 0x11b   :  { %v7632_v54 = vpop.f32.mrf.mxu0 }
 0x11c   :  { %v335_v55 = vmax.f32 %v332_v53, 0.0 }
 0x11e   :  { %7642 = vmatmul.mubr.msk.f32.vlgmr.msra.gmra.mxu0 %vm261_vm3, %v335_v55 }
 0x11f   :  { %7645 = vmatpush3.msra.mxu0 %v432_v48  ;;  %7660 = vmatprep.mubr.msk.f32.mxu0 %vm442_vm4, %v438_v56 }
 0x120   :  { %7646 = vmatprep.subr.mxu0 %v431_v57 }
 0x121   :  { %7647 = vmatpush3.msra.mxu0 %v431_v57  ;;  %v8825_v57 = vld [vmem:[%s10455_s3 + $0x118] sm:$0xff] }
 0x122   :  { %7648 = vmatprep.subr.mxu0 %v430_v58 }
 0x123   :  { %7649 = vmatpush3.msra.mxu0 %v430_v58  ;;  %v8831_v58 = vld [vmem:[%s10455_s3 + $0x158] sm:$0xff] }
 0x124   :  { %7650 = vmatprep.subr.mxu0 %v429_v59 }
 0x125   :  { %7651 = vmatpush3.msra.mxu0 %v429_v59  ;;  %v8838_v59 = vld [vmem:[%s10455_s3 + $0x110] sm:$0xff] }
 0x126   :  { %7652 = vmatprep.subr.mxu0 %v428_v60 }
 0x127   :  { %7653 = vmatpush3.msra.mxu0 %v428_v60  ;;  %v8845_v60 = vld [vmem:[%s10455_s3 + $0x150] sm:$0xff] }
 0x128   :  { %7654 = vmatprep.subr.mxu0 %v427_v61 }
 0x129   :  { %7655 = vmatpush3.msra.mxu0 %v427_v61  ;;  %v8850_v61 = vld [vmem:[%s10455_s3 + $0x108] sm:$0xff] }
 0x12a   :  { %7656 = vmatprep.subr.mxu0 %v426_v62 }
 0x12b   :  { %7657 = vmatpush3.msra.mxu0 %v426_v62 }
 0x12c   :  { %7658 = vmatprep.subr.mxu0 %v425_v63 }
 0x12d   :  { %7659 = vmatpush3.msra.mxu0 %v425_v63  ;;  %v8859_v63 = vld [vmem:[%s10455_s3 + $0x148] sm:$0xff] }
 0x12e   :  { %7661 = vmatmul.mubr.msk.f32.vlgmr.msra.gmra.mxu0 %vm442_vm4, %v439_v1  ;;  %7688 = vmatprep.subr.mxu0 %v10464_v0  ;;  %v8864_v1 = vld [vmem:[%s10455_s3 + $0x100] sm:$0xff] }
 0x12f   :  { %7689 = vmatpush3.msra.mxu0 %v6892_v2  ;;  %7663 = vmatprep.mubr.msk.f32.mxu0 %vm442_vm4, %v440_v4  ;;  %v8869_v2 = vld [vmem:[%s10455_s3 + $0x140] sm:$0xff]  ;;  %v8878_v4 = vld [vmem:[%s10455_s3 + $0x198] sm:$0xff] }
 0x130   :  { %7690 = vmatprep.subr.mxu0 %v10464_v0 }
 0x131   :  { %7691 = vmatpush3.msra.mxu0 %v6891_v3 }
 0x132   :  { %7692 = vmatprep.subr.mxu0 %v10464_v0  ;;  %7664 = vmatmul.mubr.msk.f32.gmra.mxu0 %vm442_vm4, %v441_v5 }
 0x133   :  { %7693 = vmatpush3.msra.mxu0 %v6890_v8  ;;  %7696 = vmatprep.mubr.msk.f32.mxu0 %vm8501_vm0, %v10464_v0 }
 0x134   :  { %7694 = vmatprep.subr.mxu0 %v10464_v0 }
 0x135   :  { %7695 = vmatpush3.msra.mxu0 %v6889_v11 }
 0x136   :  { %7710 = vmatprep.subr.mxu0 %v10464_v0 }
 0x1de   :  { %v418_v13 = vpop.f32.mrf.mxu0 }
 0x1df   :  { %v419_v15 = vadd.f32 %v6864_v12, %v418_v13 }
 0x1e0   :  { %v7643_v16 = vpop.f32.mrf.mxu0 }
 0x1e1   :  { %v8706_v17 = vadd.f32 %v6866_v14, %v419_v15 }
 0x1e3   :  { %7675 = vmatmul.mubr.msk.f32.vlgmr.msra.gmra.mxu1 %vm261_vm3, %v8706_v17  ;;  %7697 = vmatmul.mubr.msk.f32.vlgmr.msra.gmra.mxu0 %vm261_vm3, %v8706_v17 }
 0x1e4   :  { %7678 = vmatpush3.msra.mxu1 %v6885_v18  ;;  %7711 = vmatpush3.msra.mxu0 %v6906_v19 }
 0x1e5   :  { %7679 = vmatprep.subr.mxu1 %v10464_v0  ;;  %7712 = vmatprep.subr.mxu0 %v10464_v0 }
 0x1e6   :  { %7680 = vmatpush3.msra.mxu1 %v6884_v20  ;;  %7713 = vmatpush3.msra.mxu0 %v6905_v21  ;;  %v6880_v20 = vld [vmem:[%s10457_s4 + $0x9] ss:$0 sm:$0xff] }
 0x1e7   :  { %7681 = vmatprep.subr.mxu1 %v10464_v0  ;;  %7714 = vmatprep.subr.mxu0 %v10464_v0 }
 0x1e8   :  { %7682 = vmatpush3.msra.mxu1 %v6883_v22  ;;  %7715 = vmatpush3.msra.mxu0 %v6904_v23  ;;  %v8894_v22 = vshrl.u32 %v38_v29, 7 }
 0x1e9   :  { %7683 = vmatprep.subr.mxu1 %v10464_v0  ;;  %7716 = vmatprep.subr.mxu0 %v10464_v0 }
 0x1ea   :  { %7684 = vmatpush3.msra.mxu1 %v6882_v24  ;;  %7685 = vmatprep.mubr.msk.f32.mxu1 %vm8501_vm0, %v10464_v0  ;;  %v6887_v24 = vld [vmem:[%s10457_s4 + $0xa] ss:$0 sm:$0xff]  ;;  %v8913_v29 = vsub.s32 0, %v8894_v22 }
 0x1eb   :  { %7717 = vmatpush3.msra.mxu0 %v6903_v25  ;;  %7718 = vmatprep.mubr.msk.f32.mxu0 %vm8501_vm0, %v10464_v0  ;;  %v8902_v25 = vld [vmem:[%s10457_s4 + $0x5] ss:$0 sm:$0xff] }
 0x1ec   :  { %7686 = vmatmul.mubr.msk.f32.vlgmr.msra.gmra.mxu1 %vm261_vm3, %v8706_v17  ;;  %7699 = vmatprep.subr.mxu1 %v10464_v0 }
 0x1ed   :  { %7719 = vmatmul.mubr.msk.f32.vlgmr.msra.gmra.mxu0 %vm261_vm3, %v8706_v17  ;;  %7700 = vmatpush3.msra.mxu1 %v6899_v26 }
 0x1ee   :  { %7701 = vmatprep.subr.mxu1 %v10464_v0  ;;  %v7662_v28 = vpop.f32.mrf.mxu0  ;;  %7707 = vmatprep.mubr.msk.f32.mxu1 %vm8501_vm0, %v10464_v0 }
 0x1ef   :  { %7702 = vmatpush3.msra.mxu1 %v6898_v27  ;;  %v8781_v37 = vadd.f32 %v7662_v28, %v6868_v34  ;;  %7732 = vmatprep.subr.mxu0 %v8825_v57  ;;  %v8910_v28 = vld [vmem:[%s10457_s4 + $0x6] ss:$0 sm:$0xff] }
 0x1f0   :  { %7703 = vmatprep.subr.mxu1 %v10464_v0  ;;  %v521_v32 = vpop.f32.mrf.mxu0  ;;  %7733 = vmatpush3.msra.mxu0 %v8825_v57 }
 0x1f1   :  { %v8773_v10 = vadd.f32 %v6867_v30, %v521_v32  ;;  %7704 = vmatpush3.msra.mxu1 %v6897_v31  ;;  %v1048_v40 = vsel %vm261_vm3, %v8781_v37, 0.0  ;;  %7734 = vmatprep.subr.mxu0 %v8838_v59 }
 0x1f2   :  { %7705 = vmatprep.subr.mxu1 %v10464_v0  ;;  %v8816_v51 = vpop.f32.mrf.mxu0  ;;  %7735 = vmatpush3.msra.mxu0 %v8838_v59 }
 0x1f3   :  { %7706 = vmatpush3.msra.mxu1 %v6896_v33  ;;  %v1045_v36 = vsel %vm261_vm3, %v8773_v10, 0.0  ;;  %7736 = vmatprep.subr.mxu0 %v8850_v61 }
 0x1f4   :  { %7708 = vmatmul.mubr.msk.f32.vlgmr.msra.gmra.mxu1 %vm261_vm3, %v8706_v17  ;;  %7721 = vmatprep.subr.mxu1 %v10464_v0  ;;  %v8818_v52 = vpop.f32.mrf.mxu0 }
 0x1f5   :  { %7722 = vmatpush3.msra.mxu1 %v6913_v35  ;;  %1046 = vadd.xlane.f32.xlu0 %v1045_v36 }
 0x1f6   :  { %7723 = vmatprep.subr.mxu1 %v10464_v0  ;;  %7729 = vmatprep.mubr.msk.f32.mxu1 %vm8501_vm0, %v10464_v0 }
 0x1f7   :  { %7724 = vmatpush3.msra.mxu1 %v6912_v38  ;;  %7737 = vmatpush3.msra.mxu0 %v8850_v61 }
 0x1f8   :  { %7725 = vmatprep.subr.mxu1 %v10464_v0  ;;  %7738 = vmatprep.subr.mxu0 %v8864_v1 }
 0x1f9   :  { %7726 = vmatpush3.msra.mxu1 %v6911_v39  ;;  %1049 = vadd.xlane.f32.xlu0 %v1048_v40 }
 0x1fa   :  { %7727 = vmatprep.subr.mxu1 %v10464_v0  ;;  %7739 = vmatpush3.msra.mxu0 %v8864_v1 }
 0x1fb   :  { %7728 = vmatpush3.msra.mxu1 %v6910_v41  ;;  %7754 = vmatprep.subr.mxu0 %v8878_v4 }
 0x1fc   :  { %7730 = vmatmul.mubr.msk.f32.vlgmr.msra.gmra.mxu1 %vm261_vm3, %v8706_v17  ;;  %7743 = vmatprep.subr.mxu1 %v8831_v58 }
 0x1fd   :  { %7744 = vmatpush3.msra.mxu1 %v8831_v58 }
 0x1fe   :  { %7745 = vmatprep.subr.mxu1 %v8845_v60 }
 0x1ff   :  { %7746 = vmatpush3.msra.mxu1 %v8845_v60 }
 0x200   :  { %7747 = vmatprep.subr.mxu1 %v8859_v63 }
 0x201   :  { %7748 = vmatpush3.msra.mxu1 %v8859_v63 }
 0x202   :  { %7749 = vmatprep.subr.mxu1 %v8869_v2 }
 0x203   :  { %7750 = vmatpush3.msra.mxu1 %v8869_v2 }
 0x27e   :  { %v1047_v42 = vpop.xlane.xlu0 %1046 }
 0x27f   :  { %v1058_v43 = vmul.f32 0.03125, %v1047_v42 }
 0x281   :  { %v8805_v44 = vsub.f32 %v8773_v10, %v1058_v43 }
 0x282   :  { %v1050_v45 = vpop.xlane.xlu0 %1049 }
 0x283   :  { %v1059_v6 = vmul.f32 0.03125, %v1050_v45  ;;  %v1066_v46 = vmul.f32 %v8805_v44, %v8805_v44  ;;  %v8949_v45 = vld [vmem:[%s10455_s3 + $0x188] sm:$0xff] }
 0x285   :  { %v8810_v47 = vsub.f32 %v8781_v37, %v1059_v6  ;;  %v1070_v48 = vsel %vm261_vm3, %v1066_v46, 0.0  ;;  %v8956_v6 = vld [vmem:[%s10455_s3 + $0x180] sm:$0xff]  ;;  %v8967_v46 = vld [vmem:[%s10457_s4 + $0x11] ss:$0 sm:$0xff] }
 0x286   :  { %1071 = vadd.xlane.f32.xlu1 %v1070_v48 }
 0x287   :  { %v1067_v49 = vmul.f32 %v8810_v47, %v8810_v47 }
 0x289   :  { %v1073_v50 = vsel %vm261_vm3, %v1067_v49, 0.0 }
 0x28a   :  { %1074 = vadd.xlane.f32.xlu1 %v1073_v50  ;;  %v8973_v50 = vld [vmem:[%s10457_s4 + $0xf] ss:$0 sm:$0xff] }
 0x2a3   :  { %v622_v53 = vpop.f32.mrf.mxu1  ;;  %v8820_v54 = vpop.f32.mrf.mxu0 }
 0x2a4   :  { %v623_v21 = vadd.f32 %v6880_v20, %v622_v53  ;;  %v9022_v20 = vld [vmem:[%s10455_s3 + $0x1b8] sm:$0xff] }
 0x2a5   :  { %v7676_v55 = vpop.f32.mrf.mxu1  ;;  %v7698_v56 = vpop.f32.mrf.mxu0 }
 0x2a6   :  { %v8904_v26 = vadd.f32 1.0, %v623_v21  ;;  %v9029_v21 = vld [vmem:[%s10455_s3 + $0x1b0] sm:$0xff] }
 0x2a8   :  { %v1122_v33 = vrot.slane %v8904_v26, %v8913_v29 }
 0x2ac   :  { %v705_v62 = vpop.f32.mrf.mxu1 }
 0x2ad   :  { %v8871_v3 = vpop.f32.mrf.mxu0  ;;  %v8915_v30 = vadd.f32 %v6887_v24, %v705_v62  ;;  %v9047_v24 = vld [vmem:[%s10455_s3 + $0x1a0] sm:$0xff] }
 0x2ae   :  { %v7687_v5 = vpop.f32.mrf.mxu1 }
 0x2af   :  { %v7720_v7 = vpop.f32.mrf.mxu0  ;;  %v1128_v36 = vrot.slane %v8915_v30, %v8913_v29  ;;  %v8984_v5 = vld [vmem:[%s10457_s4 + $0x13] ss:$0 sm:$0xff] }
 0x2b0   :  { %v8989_v7 = vld [vmem:[%s10455_s3 + $0x138] sm:$0xff] }
 0x2b4   :  { %v8886_v8 = vpop.f32.mrf.mxu1 }
 0x2b6   :  { %v7709_v9 = vpop.f32.mrf.mxu1 }
 0x2bc   :  { %v8888_v11 = vpop.f32.mrf.mxu1 }
 0x2be   :  { %v7731_v12 = vpop.f32.mrf.mxu1 }
 0x30f   :  { %v1072_v13 = vpop.xlane.xlu1 %1071 }
 0x310   :  { %v1082_v14 = vmul.f32 0.03125, %v1072_v13 }
 0x312   :  { %v1086_v15 = vadd.f32 1e-05, %v1082_v14 }
 0x313   :  { %v1075_v16 = vpop.xlane.xlu1 %1074 }
 0x314   :  { %8396 = vrsqrt.f32 %v1086_v15  ;;  %v1083_v18 = vmul.f32 0.03125, %v1075_v16  ;;  %v9000_v16 = vld [vmem:[%s10455_s3 + $0x130] sm:$0xff] }
 0x316   :  { %v1087_v19 = vadd.f32 1e-05, %v1083_v18  ;;  %v9008_v18 = vld [vmem:[%s10455_s3 + $0x128] sm:$0xff] }
 0x318   :  { %8398 = vrsqrt.f32 %v1087_v19  ;;  %v9015_v19 = vld [vmem:[%s10455_s3 + $0x120] sm:$0xff] }
 0x321   :  { %v8397_v23 = vpop.eup %8396 }
 0x322   :  { %v1094_v27 = vmul.f32 %v8397_v23, %v8805_v44  ;;  %v8937_v44 = vld [vmem:[%s10455_s3 + $0x190] sm:$0xff]  ;;  %v9040_v23 = vld [vmem:[%s10455_s3 + $0x1a8] sm:$0xff] }
 0x324   :  { %v1104_v31 = vmul.f32 %v8902_v25, %v1094_v27 }
 0x325   :  { %v8399_v32 = vpop.eup %8398 }
 0x326   :  { %v1114_v34 = vadd.f32 %v8910_v28, %v1104_v31  ;;  %v1095_v35 = vmul.f32 %v8399_v32, %v8810_v47 }
 0x328   :  { %v1105_v38 = vmul.f32 %v8902_v25, %v1095_v35  ;;  %v1123_v39 = vmul.f32 %v1122_v33, %v1114_v34 }
 0x32a   :  { %v1115_v40 = vadd.f32 %v8910_v28, %v1105_v38  ;;  %v8926_v41 = vadd.f32 %v1128_v36, %v1123_v39  ;;  %v9062_v39 = vld [vmem:[%s10457_s4 + $0x14] ss:$0 sm:$0xff] }
 0x32c   :  { %7740 = vmatprep.mubr.msk.f32.mxu0 %vm261_vm3, %v8926_v41  ;;  %7751 = vmatprep.mubr.msk.f32.mxu1 %vm261_vm3, %v8926_v41  ;;  %v1124_v42 = vmul.f32 %v1122_v33, %v1115_v40 }
 0x32e   :  { %v8932_v43 = vadd.f32 %v1128_v36, %v1124_v42 }
 0x330   :  { %7741 = vmatmul.mubr.msk.f32.vlgmr.msra.gmra.mxu0 %vm261_vm3, %v8932_v43  ;;  %7752 = vmatmul.mubr.msk.f32.vlgmr.msra.gmra.mxu1 %vm261_vm3, %v8932_v43 }
 0x331   :  { %7755 = vmatpush3.msra.mxu0 %v8878_v4  ;;  %7762 = vmatprep.mubr.msk.f32.mxu0 %vm261_vm3, %v8926_v41 }
 0x332   :  { %7756 = vmatprep.subr.mxu0 %v8937_v44 }
 0x333   :  { %7757 = vmatpush3.msra.mxu0 %v8937_v44 }
 0x334   :  { %7758 = vmatprep.subr.mxu0 %v8949_v45 }
 0x335   :  { %7759 = vmatpush3.msra.mxu0 %v8949_v45 }
 0x336   :  { %7760 = vmatprep.subr.mxu0 %v8956_v6 }
 0x337   :  { %7761 = vmatpush3.msra.mxu0 %v8956_v6 }
 0x338   :  { %7763 = vmatmul.mubr.msk.f32.vlgmr.msra.gmra.mxu0 %vm261_vm3, %v8932_v43 }
 0x3f0   :  { %v7742_v47 = vpop.f32.mrf.mxu0  ;;  %v7753_v48 = vpop.f32.mrf.mxu1 }
 0x3f1   :  { %v1310_v49 = vadd.f32 %v7753_v48, %v8967_v46  ;;  %v1222_v12 = vadd.f32 %v7742_v47, %v8973_v50 }
 0x3f2   :  { %v1216_v53 = vpop.f32.mrf.mxu0  ;;  %v1304_v55 = vpop.f32.mrf.mxu1 }
 0x3f3   :  { %v1217_v56 = vadd.f32 %v8973_v50, %v1216_v53  ;;  %v1305_v62 = vadd.f32 %v8967_v46, %v1304_v55  ;;  %7765 = vmatprep.subr.msk.mxu1 %vm261_vm3, %v1310_v49 }
 0x3f4   :  { %7766 = vmatpush3.xpose.msk.msra.mxu1 %vm261_vm3, %v1310_v49 }
 0x3f5   :  { %7767 = vmatprep.subr.msk.mxu1 %vm261_vm3, %v1305_v62  ;;  %7769 = vmatprep.mubr.msk.f32.mxu1 %vm261_vm3, %v1217_v56 }
 0x3f8   :  { %v7764_v9 = vpop.f32.mrf.mxu0  ;;  %7768 = vmatpush3.xpose.msk.msra.mxu1 %vm261_vm3, %v1305_v62 }
 0x3f9   :  { %v1398_v13 = vadd.f32 %v7764_v9, %v8984_v5  ;;  %7779 = vmatprep.subr.mxu1 %v8989_v7 }
 0x3fa   :  { %v1392_v14 = vpop.f32.mrf.mxu0 }
 0x3fb   :  { %v1393_v15 = vadd.f32 %v8984_v5, %v1392_v14  ;;  %7772 = vmatprep.subr.mxu0 %v1398_v13  ;;  %7770 = vmatmul.mubr.msk.f32.vlgmr.msra.gmra.mxu1 %vm261_vm3, %v1222_v12 }
 0x3fc   :  { %7773 = vmatpush3.msra.mxu0 %v1398_v13  ;;  %7780 = vmatpush3.msra.mxu1 %v8989_v7 }
 0x3fd   :  { %7774 = vmatprep.subr.mxu0 %v1393_v15  ;;  %7787 = vmatprep.mubr.msk.f32.mxu1 %vm261_vm3, %v8926_v41 }
 0x3fe   :  { %7775 = vmatpush3.msra.mxu0 %v1393_v15  ;;  %7781 = vmatprep.subr.mxu1 %v9000_v16 }
 0x3ff   :  { %7782 = vmatpush3.msra.mxu1 %v9000_v16 }
 0x400   :  { %7783 = vmatprep.subr.mxu1 %v9008_v18 }
 0x401   :  { %7784 = vmatpush3.msra.mxu1 %v9008_v18 }
 0x402   :  { %7785 = vmatprep.subr.mxu1 %v9015_v19 }
 0x403   :  { %7786 = vmatpush3.msra.mxu1 %v9015_v19 }
 0x404   :  { %7788 = vmatmul.mubr.msk.f32.vlgmr.msra.gmra.mxu1 %vm261_vm3, %v8932_v43  ;;  %7801 = vmatprep.subr.mxu1 %v9022_v20 }
 0x405   :  { %7802 = vmatpush3.msra.mxu1 %v9022_v20  ;;  %7809 = vmatprep.mubr.msk.f32.mxu1 %vm261_vm3, %v8926_v41 }
 0x406   :  { %7803 = vmatprep.subr.mxu1 %v9029_v21 }
 0x407   :  { %7804 = vmatpush3.msra.mxu1 %v9029_v21 }
 0x408   :  { %7805 = vmatprep.subr.mxu1 %v9040_v23 }
 0x409   :  { %7806 = vmatpush3.msra.mxu1 %v9040_v23 }
 0x40a   :  { %7807 = vmatprep.subr.mxu1 %v9047_v24 }
 0x40b   :  { %7808 = vmatpush3.msra.mxu1 %v9047_v24 }
 0x40c   :  { %7810 = vmatmul.mubr.msk.f32.vlgmr.msra.gmra.mxu1 %vm261_vm3, %v8932_v43 }
 0x4bb   :  { %v7771_v27 = vpop.f32.mrf.mxu1 }
 0x4bc   :  { %v1489_v31 = vmul.f32 0.25, %v7771_v27  ;;  %v9071_v27 = vld [vmem:[%s10455_s3 + $0x178] sm:$0xff] }
 0x4bd   :  { %v1479_v32 = vpop.f32.mrf.mxu1  ;;  %7790 = vmatprep.subr.mxu0 %v9071_v27 }
 0x4be   :  { %v1488_v33 = vmul.f32 0.25, %v1479_v32  ;;  %v1494_v34 = vsel %vm1490_vm5, %v1489_v31, -inf }
 0x4bf   :  { %1495 = vmax.xlane.f32.xlu1 %v1494_v34 }
 0x4c0   :  { %v1491_v35 = vsel %vm1490_vm5, %v1488_v33, -inf }
 0x4c1   :  { %1492 = vmax.xlane.f32.xlu0 %v1491_v35 }
 0x4c4   :  { %v9057_v36 = vpop.f32.mrf.mxu1 }
 0x4c6   :  { %v1678_v38 = vpop.f32.mrf.mxu1 }
 0x4cc   :  { %v7811_v40 = vpop.f32.mrf.mxu1 }
 0x4cd   :  { %v1860_v42 = vadd.f32 %v7811_v40, %v9062_v39 }
 0x4ce   :  { %v1854_v47 = vpop.f32.mrf.mxu1 }
 0x4cf   :  { %v1855_v48 = vadd.f32 %v9062_v39, %v1854_v47  ;;  %7819 = vmatprep.subr.mxu1 %v1860_v42  ;;  %v9087_v47 = vld [vmem:[%s10455_s3 + $0x168] sm:$0xff] }
 0x4d0   :  { %7820 = vmatpush3.msra.mxu1 %v1860_v42  ;;  %v9078_v42 = vld [vmem:[%s10455_s3 + $0x170] sm:$0xff] }
 0x4d1   :  { %7821 = vmatprep.subr.mxu1 %v1855_v48 }
 0x4d2   :  { %7822 = vmatpush3.msra.mxu1 %v1855_v48  ;;  %v9094_v48 = vld [vmem:[%s10455_s3 + $0x160] sm:$0xff] }
 0x548   :  { %v1496_v49 = vpop.xlane.xlu1 %1495 }
 0x549   :  { %v1498_v53 = vsub.f32 %v1489_v31, %v1496_v49 }
 0x54a   :  { %v1493_v55 = vpop.xlane.xlu0 %1492 }
 0x54b   :  { %v1501_v56 = vmul.f32 1.442695, %v1498_v53  ;;  %v1497_v62 = vsub.f32 %v1488_v33, %v1493_v55 }
 0x54d   :  { %8400 = vpow2.f32 %v1501_v56  ;;  %v1499_v9 = vmul.f32 1.442695, %v1497_v62  ;;  %v9116_v56 = vld [vmem:[%s10457_s4 + $0x12] ss:$0 sm:$0xff] }
 0x54f   :  { %8402 = vpow2.f32 %v1499_v9 }
 0x55a   :  { %v8401_v12 = vpop.eup %8400 }
 0x55b   :  { %v1506_v13 = vsel %vm1490_vm5, %v8401_v12, 0.0 }
 0x55c   :  { %v8403_v14 = vpop.eup %8402  ;;  %1507 = vadd.xlane.f32.xlu1 %v1506_v13 }
 0x55d   :  { %v1503_v15 = vsel %vm1490_vm5, %v8403_v14, 0.0 }
 0x55e   :  { %1504 = vadd.xlane.f32.xlu0 %v1503_v15 }
 0x5e5   :  { %v1508_v31 = vpop.xlane.xlu1 %1507 }
 0x5e6   :  { %8404 = vrcp.f32 %v1508_v31 }
 0x5e7   :  { %v1505_v32 = vpop.xlane.xlu0 %1504 }
 0x5e8   :  { %8406 = vrcp.f32 %v1505_v32 }
 0x5f3   :  { %v8405_v33 = vpop.eup %8404 }
 0x5f4   :  { %v1512_v40 = vmul.f32 %v8405_v33, %v8401_v12 }
 0x5f5   :  { %v8407_v34 = vpop.eup %8406 }
 0x5f6   :  { %v1510_v35 = vmul.f32 %v8407_v34, %v8403_v14 }
 0x5f8   :  { %7776 = vmatprep.mubr.msk.f32.mxu0 %vm1490_vm5, %v1510_v35 }
 0x5f9   :  { %7777 = vmatmul.mubr.msk.f32.vlgmr.msra.gmra.mxu0 %vm1490_vm5, %v1512_v40 }
 0x5fa   :  { %7791 = vmatpush3.msra.mxu0 %v9071_v27  ;;  %7798 = vmatprep.mubr.msk.f32.mxu0 %vm261_vm3, %v8926_v41  ;;  %v9101_v41 = vld [vmem:[%s10457_s4 + $0x10] ss:$0 sm:$0xff] }
 0x5fb   :  { %7792 = vmatprep.subr.mxu0 %v9078_v42  ;;  %v1679_v49 = vadd.f32 %v9101_v41, %v1678_v38 }
 0x5fc   :  { %7793 = vmatpush3.msra.mxu0 %v9078_v42 }
 0x5fd   :  { %7794 = vmatprep.subr.mxu0 %v9087_v47 }
 0x5fe   :  { %7795 = vmatpush3.msra.mxu0 %v9087_v47 }
 0x5ff   :  { %7796 = vmatprep.subr.mxu0 %v9094_v48 }
 0x600   :  { %7797 = vmatpush3.msra.mxu0 %v9094_v48 }
 0x601   :  { %7799 = vmatmul.mubr.msk.f32.vlgmr.msra.gmra.mxu0 %vm261_vm3, %v8932_v43  ;;  %v1684_v43 = vadd.f32 %v9057_v36, %v9101_v41  ;;  %v6870_v36 = vld [vmem:[%s10458_s2 + $0x58] sm:$0xff] }
 0x602   :  { %7816 = vmatprep.mubr.msk.f32.mxu0 %vm261_vm3, %v1679_v49 }
 0x6b9   :  { %v9109_v53 = vpop.f32.mrf.mxu0 }
 0x6bb   :  { %v9111_v55 = vpop.f32.mrf.mxu0 }
 0x6c1   :  { %v7800_v62 = vpop.f32.mrf.mxu0 }
 0x6c2   :  { %v1772_v9 = vadd.f32 %v7800_v62, %v9116_v56 }
 0x6c3   :  { %v1766_v38 = vpop.f32.mrf.mxu0 }
 0x6c4   :  { %v1767_v12 = vadd.f32 %v9116_v56, %v1766_v38  ;;  %7812 = vmatprep.subr.msk.mxu0 %vm261_vm3, %v1772_v9 }
 0x6c5   :  { %7813 = vmatpush3.xpose.msk.msra.mxu0 %vm261_vm3, %v1772_v9 }
 0x6c6   :  { %7814 = vmatprep.subr.msk.mxu0 %vm261_vm3, %v1767_v12 }
 0x6c9   :  { %7815 = vmatpush3.xpose.msk.msra.mxu0 %vm261_vm3, %v1767_v12  ;;  %v6869_v12 = vld [vmem:[%s10458_s2 + $0x50] sm:$0xff] }
 0x6cc   :  { %7817 = vmatmul.mubr.msk.f32.vlgmr.msra.gmra.mxu0 %vm261_vm3, %v1684_v43  ;;  %v9136_v43 = vadd.f32 %v8816_v51, %v6870_v36  ;;  %v9150_v51 = vld [vmem:[%s10455_s3 + $0x1d8] sm:$0xff] }
 0x6cd   :  { %7837 = vmatprep.subr.mxu1 %v9150_v51 }
 0x78c   :  { %v7818_v13 = vpop.f32.mrf.mxu0 }
 0x78d   :  { %v1951_v14 = vmul.f32 0.25, %v7818_v13 }
 0x78e   :  { %v1941_v15 = vpop.f32.mrf.mxu0 }
 0x78f   :  { %v1950_v31 = vmul.f32 0.25, %v1941_v15  ;;  %v1955_v32 = vsel %vm1490_vm5, %v1951_v14, -inf  ;;  %v9140_v15 = vadd.f32 %v6869_v12, %v8818_v52 }
 0x790   :  { %1956 = vmax.xlane.f32.xlu1 %v1955_v32  ;;  %v1054_v32 = vsel %vm261_vm3, %v9136_v43, 0.0 }
 0x791   :  { %v1952_v33 = vsel %vm1490_vm5, %v1950_v31, -inf }
 0x792   :  { %1953 = vmax.xlane.f32.xlu0 %v1952_v33  ;;  %v1051_v33 = vsel %vm261_vm3, %v9140_v15, 0.0 }
 0x819   :  { %v1957_v34 = vpop.xlane.xlu1 %1956 }
 0x81a   :  { %v1959_v35 = vsub.f32 %v1951_v14, %v1957_v34 }
 0x81b   :  { %v1954_v40 = vpop.xlane.xlu0 %1953 }
 0x81c   :  { %v1962_v49 = vmul.f32 1.442695, %v1959_v35  ;;  %v1958_v62 = vsub.f32 %v1950_v31, %v1954_v40 }
 0x81e   :  { %8408 = vpow2.f32 %v1962_v49  ;;  %v1960_v9 = vmul.f32 1.442695, %v1958_v62 }
 0x820   :  { %8410 = vpow2.f32 %v1960_v9 }
 0x82b   :  { %v8409_v38 = vpop.eup %8408 }
 0x82c   :  { %v1967_v13 = vsel %vm1490_vm5, %v8409_v38, 0.0 }
 0x82d   :  { %v8411_v14 = vpop.eup %8410  ;;  %1968 = vadd.xlane.f32.xlu1 %v1967_v13 }
 0x82e   :  { %v1964_v31 = vsel %vm1490_vm5, %v8411_v14, 0.0 }
 0x82f   :  { %1965 = vadd.xlane.f32.xlu0 %v1964_v31 }
 0x831   :  { %1055 = vadd.xlane.f32.xlu1 %v1054_v32 }
 0x833   :  { %1052 = vadd.xlane.f32.xlu0 %v1051_v33 }
 0x8b6   :  { %v1969_v52 = vpop.xlane.xlu1 %1968 }
 0x8b7   :  { %8412 = vrcp.f32 %v1969_v52 }
 0x8b8   :  { %v1966_v34 = vpop.xlane.xlu0 %1965 }
 0x8b9   :  { %8414 = vrcp.f32 %v1966_v34 }
 0x8ba   :  { %v1056_v35 = vpop.xlane.xlu1 %1055 }
 0x8bb   :  { %v1061_v40 = vmul.f32 0.03125, %v1056_v35  ;;  %v9161_v35 = vld [vmem:[%s10455_s3 + $0x1d0] sm:$0xff] }
 0x8bc   :  { %v1053_v49 = vpop.xlane.xlu0 %1052 }
 0x8bd   :  { %v1065_v62 = vsub.f32 %v9136_v43, %v1061_v40  ;;  %v1060_v9 = vmul.f32 0.03125, %v1053_v49  ;;  %v9170_v40 = vld [vmem:[%s10455_s3 + $0x1c8] sm:$0xff] }
 0x8bf   :  { %v1064_v36 = vsub.f32 %v9140_v15, %v1060_v9  ;;  %v1069_v12 = vmul.f32 %v1065_v62, %v1065_v62 }
 0x8c1   :  { %v1079_v13 = vsel %vm261_vm3, %v1069_v12, 0.0  ;;  %v1068_v31 = vmul.f32 %v1064_v36, %v1064_v36 }
 0x8c2   :  { %1080 = vadd.xlane.f32.xlu1 %v1079_v13 }
 0x8c3   :  { %v1076_v32 = vsel %vm261_vm3, %v1068_v31, 0.0 }
 0x8c4   :  { %1077 = vadd.xlane.f32.xlu0 %v1076_v32  ;;  %v8413_v33 = vpop.eup %8412  ;;  %v9223_v32 = vsub.s32 1, %v8894_v22 }
 0x8c5   :  { %v1973_v34 = vmul.f32 %v8413_v33, %v8409_v38 }
 0x8c6   :  { %v8415_v52 = vpop.eup %8414 }
 0x8c7   :  { %v1971_v0 = vmul.f32 %v8415_v52, %v8411_v14 }
 0x8c9   :  { %7823 = vmatprep.mubr.msk.f32.mxu1 %vm1490_vm5, %v1971_v0  ;;  %v9177_v0 = vld [vmem:[%s10455_s3 + $0x1c0] sm:$0xff] }
 0x8ca   :  { %7824 = vmatmul.mubr.msk.f32.vlgmr.msra.gmra.mxu1 %vm1490_vm5, %v1973_v34  ;;  %v2241_v34 = vrot.slane %v8904_v26, %v9223_v32 }
 0x8cb   :  { %7838 = vmatpush3.msra.mxu1 %v9150_v51  ;;  %7845 = vmatprep.mubr.msk.f32.mxu1 %vm261_vm3, %v9111_v55 }
 0x8cc   :  { %7839 = vmatprep.subr.mxu1 %v9161_v35 }
 0x8cd   :  { %7840 = vmatpush3.msra.mxu1 %v9161_v35 }
 0x8ce   :  { %7841 = vmatprep.subr.mxu1 %v9170_v40 }
 0x8cf   :  { %7842 = vmatpush3.msra.mxu1 %v9170_v40 }
 0x8d0   :  { %7843 = vmatprep.subr.mxu1 %v9177_v0 }
 0x8d1   :  { %7844 = vmatpush3.msra.mxu1 %v9177_v0 }
 0x8d2   :  { %7846 = vmatmul.mubr.msk.f32.vlgmr.msra.gmra.mxu1 %vm261_vm3, %v9109_v53  ;;  %7859 = vmatprep.subr.mxu1 %v8831_v58  ;;  %v9196_v53 = vld [vmem:[%s10455_s3 + $0x1f8] sm:$0xff] }
 0x8d3   :  { %7860 = vmatpush3.msra.mxu1 %v8831_v58  ;;  %v9201_v58 = vld [vmem:[%s10455_s3 + $0x1f0] sm:$0xff]  ;;  %7826 = vmatprep.subr.mxu0 %v9196_v53 }
 0x8d4   :  { %7861 = vmatprep.subr.mxu1 %v8845_v60  ;;  %7827 = vmatpush3.msra.mxu0 %v9196_v53 }
 0x8d5   :  { %7862 = vmatpush3.msra.mxu1 %v8845_v60  ;;  %v9208_v60 = vld [vmem:[%s10455_s3 + $0x1e8] sm:$0xff]  ;;  %7828 = vmatprep.subr.mxu0 %v9201_v58 }
 0x8d6   :  { %7863 = vmatprep.subr.mxu1 %v8859_v63  ;;  %7829 = vmatpush3.msra.mxu0 %v9201_v58 }
 0x8d7   :  { %7864 = vmatpush3.msra.mxu1 %v8859_v63  ;;  %7830 = vmatprep.subr.mxu0 %v9208_v60  ;;  %v9217_v63 = vld [vmem:[%s10455_s3 + $0x1e0] sm:$0xff] }
 0x8d8   :  { %7865 = vmatprep.subr.mxu1 %v8869_v2  ;;  %7831 = vmatpush3.msra.mxu0 %v9208_v60 }
 0x8d9   :  { %7866 = vmatpush3.msra.mxu1 %v8869_v2  ;;  %7832 = vmatprep.subr.mxu0 %v9217_v63 }
 0x8da   :  { %7833 = vmatpush3.msra.mxu0 %v9217_v63 }
 0x8db   :  { %7848 = vmatprep.subr.mxu0 %v8825_v57 }
 0x94b   :  { %v1081_v2 = vpop.xlane.xlu1 %1080 }
 0x94c   :  { %v1085_v55 = vmul.f32 0.03125, %v1081_v2 }
 0x94d   :  { %v1078_v38 = vpop.xlane.xlu0 %1077 }
 0x94e   :  { %v1089_v14 = vadd.f32 1e-05, %v1085_v55  ;;  %v1084_v49 = vmul.f32 0.03125, %v1078_v38  ;;  %v2247_v38 = vrot.slane %v8915_v30, %v9223_v32 }
 0x950   :  { %8416 = vrsqrt.f32 %v1089_v14  ;;  %v1088_v9 = vadd.f32 1e-05, %v1084_v49 }
 0x952   :  { %8418 = vrsqrt.f32 %v1088_v9 }
 0x95d   :  { %v8417_v12 = vpop.eup %8416 }
 0x95e   :  { %v1097_v13 = vmul.f32 %v8417_v12, %v1065_v62 }
 0x95f   :  { %v8419_v31 = vpop.eup %8418 }
 0x960   :  { %v1107_v33 = vmul.f32 %v8902_v25, %v1097_v13  ;;  %v1096_v52 = vmul.f32 %v8419_v31, %v1064_v36 }
 0x962   :  { %v1117_v2 = vadd.f32 %v8910_v28, %v1107_v33  ;;  %v1106_v55 = vmul.f32 %v8902_v25, %v1096_v52 }
 0x964   :  { %v1116_v14 = vadd.f32 %v8910_v28, %v1106_v55  ;;  %v2243_v62 = vmul.f32 %v2241_v34, %v1117_v2  ;;  %v6894_v28 = vld [vmem:[%s10457_s4 + $0xb] ss:$0 sm:$0xff] }
 0x965   :  { %v9277_v30 = vadd.f32 %v6894_v28, %v8820_v54 }
 0x966   :  { %v2242_v49 = vmul.f32 %v2241_v34, %v1116_v14  ;;  %v9233_v9 = vadd.f32 %v2247_v38, %v2243_v62 }
 0x967   :  { %v2235_v12 = vrot.slane %v9277_v30, %v8913_v29 }
 0x968   :  { %v9235_v22 = vadd.f32 %v2247_v38, %v2242_v49 }
 0x96a   :  { %7867 = vmatprep.mubr.msk.f32.mxu1 %vm261_vm3, %v9235_v22 }
 0x96b   :  { %7868 = vmatmul.mubr.msk.f32.vlgmr.msra.gmra.mxu1 %vm261_vm3, %v9233_v9 }
 0x98a   :  { %v7825_v26 = vpop.f32.mrf.mxu1 }
 0x98c   :  { %v2046_v36 = vpop.f32.mrf.mxu1 }
 0x98d   :  { %7834 = vmatprep.mubr.msk.f32.mxu0 %vm261_vm3, %v2046_v36 }
 0x98e   :  { %7835 = vmatmul.mubr.msk.f32.vlgmr.msra.gmra.mxu0 %vm261_vm3, %v7825_v26 }
 0x98f   :  { %7849 = vmatpush3.msra.mxu0 %v8825_v57  ;;  %7856 = vmatprep.mubr.msk.f32.mxu0 %vm261_vm3, %v9235_v22 }
 0x990   :  { %7850 = vmatprep.subr.mxu0 %v8838_v59 }
 0x991   :  { %7851 = vmatpush3.msra.mxu0 %v8838_v59 }
 0x992   :  { %7852 = vmatprep.subr.mxu0 %v8850_v61  ;;  %v7847_v57 = vpop.f32.mrf.mxu1 }
 0x993   :  { %7853 = vmatpush3.msra.mxu0 %v8850_v61 }
 0x994   :  { %7854 = vmatprep.subr.mxu0 %v8864_v1  ;;  %v2213_v59 = vpop.f32.mrf.mxu1 }
 0x995   :  { %7855 = vmatpush3.msra.mxu0 %v8864_v1 }
 0x996   :  { %7857 = vmatmul.mubr.msk.f32.vlgmr.msra.gmra.mxu0 %vm261_vm3, %v9233_v9  ;;  %7870 = vmatprep.subr.mxu0 %v8878_v4 }
 0x997   :  { %7871 = vmatpush3.msra.mxu0 %v8878_v4  ;;  %7878 = vmatprep.mubr.msk.f32.mxu0 %vm261_vm3, %v9235_v22 }
 0x998   :  { %7872 = vmatprep.subr.mxu0 %v8937_v44 }
 0x999   :  { %7873 = vmatpush3.msra.mxu0 %v8937_v44 }
 0x99a   :  { %7874 = vmatprep.subr.mxu0 %v8949_v45 }
 0x99b   :  { %7875 = vmatpush3.msra.mxu0 %v8949_v45  ;;  %v9282_v45 = vld [vmem:[%s10457_s4 + $0x15] ss:$0 sm:$0xff] }
 0x99c   :  { %7876 = vmatprep.subr.mxu0 %v8956_v6 }
 0x99d   :  { %7877 = vmatpush3.msra.mxu0 %v8956_v6 }
 0x99e   :  { %7879 = vmatmul.mubr.msk.f32.vlgmr.msra.gmra.mxu0 %vm261_vm3, %v9233_v9 }
 0xa2b   :  { %v7869_v61 = vpop.f32.mrf.mxu1 }
 0xa2c   :  { %v2403_v1 = vadd.f32 %v7869_v61, %v8967_v46 }
 0xa2d   :  { %v2397_v4 = vpop.f32.mrf.mxu1 }
 0xa2e   :  { %v2398_v25 = vadd.f32 %v8967_v46, %v2397_v4  ;;  %7881 = vmatprep.subr.msk.mxu1 %vm261_vm3, %v2403_v1 }
 0xa2f   :  { %7882 = vmatpush3.xpose.msk.msra.mxu1 %vm261_vm3, %v2403_v1 }
 0xa30   :  { %7883 = vmatprep.subr.msk.mxu1 %vm261_vm3, %v2398_v25 }
 0xa33   :  { %7884 = vmatpush3.xpose.msk.msra.mxu1 %vm261_vm3, %v2398_v25 }
 0xa34   :  { %7895 = vmatprep.subr.mxu1 %v8989_v7 }
 0xa4e   :  { %v7836_v44 = vpop.f32.mrf.mxu0 }
 0xa4f   :  { %v2219_v6 = vadd.f32 %v7847_v57, %v7836_v44 }
 0xa50   :  { %v2132_v46 = vpop.f32.mrf.mxu0 }
 0xa51   :  { %v2231_v13 = vadd.f32 %v9282_v45, %v2219_v6  ;;  %v2214_v31 = vadd.f32 %v2213_v59, %v2132_v46 }
 0xa53   :  { %v9287_v33 = vmul.f32 %v2235_v12, %v2231_v13  ;;  %v2230_v52 = vadd.f32 %v9282_v45, %v2214_v31 }
 0xa55   :  { %v9290_v54 = vmul.f32 %v2235_v12, %v2230_v52 }
 0xa56   :  { %v7858_v34 = vpop.f32.mrf.mxu0 }
 0xa57   :  { %v2328_v38 = vadd.f32 %v7858_v34, %v8973_v50 }
 0xa58   :  { %v2322_v2 = vpop.f32.mrf.mxu0 }
 0xa59   :  { %v2323_v55 = vadd.f32 %v8973_v50, %v2322_v2 }
 0xa5b   :  { %7885 = vmatprep.mubr.msk.f32.mxu1 %vm261_vm3, %v2323_v55 }
 0xa5c   :  { %7886 = vmatmul.mubr.msk.f32.vlgmr.msra.gmra.mxu1 %vm261_vm3, %v2328_v38 }
 0xa5d   :  { %7896 = vmatpush3.msra.mxu1 %v8989_v7  ;;  %7903 = vmatprep.mubr.msk.f32.mxu1 %vm261_vm3, %v9235_v22 }
 0xa5e   :  { %7897 = vmatprep.subr.mxu1 %v9000_v16  ;;  %v7880_v14 = vpop.f32.mrf.mxu0 }
 0xa5f   :  { %v2478_v62 = vadd.f32 %v7880_v14, %v8984_v5  ;;  %7898 = vmatpush3.msra.mxu1 %v9000_v16 }
 0xa60   :  { %7899 = vmatprep.subr.mxu1 %v9008_v18  ;;  %v2472_v49 = vpop.f32.mrf.mxu0 }
 0xa61   :  { %v2473_v50 = vadd.f32 %v8984_v5, %v2472_v49  ;;  %7900 = vmatpush3.msra.mxu1 %v9008_v18  ;;  %7888 = vmatprep.subr.mxu0 %v2478_v62 }
 0xa62   :  { %7901 = vmatprep.subr.mxu1 %v9015_v19  ;;  %7889 = vmatpush3.msra.mxu0 %v2478_v62 }
 0xa63   :  { %7902 = vmatpush3.msra.mxu1 %v9015_v19  ;;  %7890 = vmatprep.subr.mxu0 %v2473_v50 }
 0xa64   :  { %7904 = vmatmul.mubr.msk.f32.vlgmr.msra.gmra.mxu1 %vm261_vm3, %v9233_v9  ;;  %7917 = vmatprep.subr.mxu1 %v9022_v20 }
 0xa65   :  { %7891 = vmatpush3.msra.mxu0 %v2473_v50  ;;  %7918 = vmatpush3.msra.mxu1 %v9022_v20 }
 0xa66   :  { %7925 = vmatprep.mubr.msk.f32.mxu1 %vm261_vm3, %v9235_v22  ;;  %7919 = vmatprep.subr.mxu1 %v9029_v21 }
 0xa67   :  { %7920 = vmatpush3.msra.mxu1 %v9029_v21  ;;  %7906 = vmatprep.subr.mxu0 %v9071_v27 }
 0xa68   :  { %7921 = vmatprep.subr.mxu1 %v9040_v23 }
 0xa69   :  { %7922 = vmatpush3.msra.mxu1 %v9040_v23 }
 0xa6a   :  { %7923 = vmatprep.subr.mxu1 %v9047_v24 }
 0xa6b   :  { %7924 = vmatpush3.msra.mxu1 %v9047_v24 }
 0xa6c   :  { %7926 = vmatmul.mubr.msk.f32.vlgmr.msra.gmra.mxu1 %vm261_vm3, %v9233_v9 }
 0xb1c   :  { %v7887_v5 = vpop.f32.mrf.mxu1 }
 0xb1d   :  { %v2569_v7 = vmul.f32 0.25, %v7887_v5 }
 0xb1e   :  { %v2559_v16 = vpop.f32.mrf.mxu1 }
 0xb1f   :  { %v2568_v18 = vmul.f32 0.25, %v2559_v16  ;;  %v2573_v19 = vsel %vm1490_vm5, %v2569_v7, -inf }
 0xb20   :  { %2574 = vmax.xlane.f32.xlu1 %v2573_v19  ;;  %v9369_v19 = vadd.f32 %v9287_v33, %v8781_v37 }
 0xb21   :  { %v2570_v20 = vsel %vm1490_vm5, %v2568_v18, -inf }
 0xb22   :  { %2571 = vmax.xlane.f32.xlu0 %v2570_v20 }
 0xb24   :  { %v7905_v21 = vpop.f32.mrf.mxu1 }
 0xb26   :  { %v2739_v26 = vpop.f32.mrf.mxu1 }
 0xb27   :  { %v2740_v55 = vadd.f32 %v9101_v41, %v2739_v26  ;;  %v9374_v26 = vadd.f32 %v9290_v54, %v8773_v10 }
 0xb2c   :  { %v7927_v23 = vpop.f32.mrf.mxu1 }
 0xb2d   :  { %v2895_v36 = vadd.f32 %v7927_v23, %v9062_v39  ;;  %v3271_v23 = vsel %vm261_vm3, %v9369_v19, 0.0 }
 0xb2e   :  { %v2889_v57 = vpop.f32.mrf.mxu1 }
 0xb2f   :  { %v2890_v24 = vadd.f32 %v9062_v39, %v2889_v57  ;;  %7935 = vmatprep.subr.mxu1 %v2895_v36 }
 0xb30   :  { %7936 = vmatpush3.msra.mxu1 %v2895_v36  ;;  %v3268_v36 = vsel %vm261_vm3, %v9374_v26, 0.0 }
 0xb31   :  { %7937 = vmatprep.subr.mxu1 %v2890_v24 }
 0xb32   :  { %7938 = vmatpush3.msra.mxu1 %v2890_v24 }
 0xb33   :  { %7953 = vmatprep.subr.mxu1 %v9150_v51 }
 0xba9   :  { %v2575_v59 = vpop.xlane.xlu1 %2574 }
 0xbaa   :  { %v2577_v61 = vsub.f32 %v2569_v7, %v2575_v59 }
 0xbab   :  { %v2572_v1 = vpop.xlane.xlu0 %2571 }
 0xbac   :  { %v2580_v4 = vmul.f32 1.442695, %v2577_v61  ;;  %v2576_v25 = vsub.f32 %v2568_v18, %v2572_v1 }
 0xbae   :  { %8420 = vpow2.f32 %v2580_v4  ;;  %v2578_v28 = vmul.f32 1.442695, %v2576_v25 }
 0xbb0   :  { %8422 = vpow2.f32 %v2578_v28 }
 0xbbb   :  { %v8421_v44 = vpop.eup %8420 }
 0xbbc   :  { %v2585_v6 = vsel %vm1490_vm5, %v8421_v44, 0.0 }
 0xbbd   :  { %v8423_v46 = vpop.eup %8422  ;;  %2586 = vadd.xlane.f32.xlu1 %v2585_v6 }
 0xbbe   :  { %v2582_v39 = vsel %vm1490_vm5, %v8423_v46, 0.0 }
 0xbbf   :  { %2583 = vadd.xlane.f32.xlu0 %v2582_v39 }
 0xc46   :  { %v2587_v12 = vpop.xlane.xlu1 %2586 }
 0xc47   :  { %8424 = vrcp.f32 %v2587_v12  ;;  %v3487_v12 = vld [vmem:[%s10461_s6 + $0x60] sm:$0xff] }
 0xc48   :  { %v2584_v13 = vpop.xlane.xlu0 %2583 }
 0xc49   :  { %8426 = vrcp.f32 %v2584_v13  ;;  %v3486_v13 = vld [vmem:[%s10461_s6 + $0x58] sm:$0xff] }
 0xc54   :  { %v8425_v31 = vpop.eup %8424 }
 0xc55   :  { %v2591_v2 = vmul.f32 %v8425_v31, %v8421_v44  ;;  %v3485_v31 = vld [vmem:[%s10461_s6 + $0x50] sm:$0xff] }
 0xc56   :  { %v8427_v52 = vpop.eup %8426 }
 0xc57   :  { %v2589_v34 = vmul.f32 %v8427_v52, %v8423_v46  ;;  %v3484_v52 = vld [vmem:[%s10461_s6 + $0x48] sm:$0xff] }
 0xc59   :  { %7892 = vmatprep.mubr.msk.f32.mxu0 %vm1490_vm5, %v2589_v34  ;;  %v3483_v34 = vld [vmem:[%s10461_s6 + $0x40] sm:$0xff] }
 0xc5a   :  { %7893 = vmatmul.mubr.msk.f32.vlgmr.msra.gmra.mxu0 %vm1490_vm5, %v2591_v2  ;;  %v3482_v2 = vld [vmem:[%s10461_s6 + $0x38] sm:$0xff] }
 0xc5b   :  { %7907 = vmatpush3.msra.mxu0 %v9071_v27  ;;  %7914 = vmatprep.mubr.msk.f32.mxu0 %vm261_vm3, %v9235_v22 }
 0xc5c   :  { %7908 = vmatprep.subr.mxu0 %v9078_v42 }
 0xc5d   :  { %7909 = vmatpush3.msra.mxu0 %v9078_v42 }
 0xc5e   :  { %7910 = vmatprep.subr.mxu0 %v9087_v47 }
 0xc5f   :  { %7911 = vmatpush3.msra.mxu0 %v9087_v47 }
 0xc60   :  { %7912 = vmatprep.subr.mxu0 %v9094_v48 }
 0xc61   :  { %7913 = vmatpush3.msra.mxu0 %v9094_v48  ;;  %v2745_v48 = vadd.f32 %v7905_v21, %v9101_v41 }
 0xc62   :  { %7915 = vmatmul.mubr.msk.f32.vlgmr.msra.gmra.mxu0 %vm261_vm3, %v9233_v9 }
 0xc63   :  { %7932 = vmatprep.mubr.msk.f32.mxu0 %vm261_vm3, %v2740_v55 }
 0xd1a   :  { %v9344_v27 = vpop.f32.mrf.mxu0 }
 0xd1c   :  { %v9346_v22 = vpop.f32.mrf.mxu0 }
 0xd22   :  { %v7916_v42 = vpop.f32.mrf.mxu0 }
 0xd23   :  { %v2820_v38 = vadd.f32 %v7916_v42, %v9116_v56 }
 0xd24   :  { %v2814_v14 = vpop.f32.mrf.mxu0 }
 0xd25   :  { %v2815_v47 = vadd.f32 %v9116_v56, %v2814_v14  ;;  %7928 = vmatprep.subr.msk.mxu0 %vm261_vm3, %v2820_v38 }
 0xd26   :  { %7929 = vmatpush3.xpose.msk.msra.mxu0 %vm261_vm3, %v2820_v38 }
 0xd27   :  { %7930 = vmatprep.subr.msk.mxu0 %vm261_vm3, %v2815_v47 }
 0xd2a   :  { %7931 = vmatpush3.xpose.msk.msra.mxu0 %vm261_vm3, %v2815_v47  ;;  %v6901_v47 = vld [vmem:[%s10457_s4 + $0xc] ss:$0 sm:$0xff] }
 0xd2b   :  { %7942 = vmatprep.subr.mxu0 %v9196_v53 }
 0xd2d   :  { %7933 = vmatmul.mubr.msk.f32.vlgmr.msra.gmra.mxu0 %vm261_vm3, %v2745_v48  ;;  %v872_v48 = vadd.f32 %v6901_v47, %v8886_v8 }
 0xd2e   :  { %7943 = vmatpush3.msra.mxu0 %v9196_v53 }
 0xd2f   :  { %7944 = vmatprep.subr.mxu0 %v9201_v58 }
 0xd30   :  { %7945 = vmatpush3.msra.mxu0 %v9201_v58 }
 0xd31   :  { %7946 = vmatprep.subr.mxu0 %v9208_v60 }
 0xd32   :  { %7947 = vmatpush3.msra.mxu0 %v9208_v60 }
 0xd33   :  { %7948 = vmatprep.subr.mxu0 %v9217_v63 }
 0xd34   :  { %7949 = vmatpush3.msra.mxu0 %v9217_v63 }
 0xded   :  { %v7934_v56 = vpop.f32.mrf.mxu0 }
 0xdee   :  { %v2986_v41 = vmul.f32 0.25, %v7934_v56 }
 0xdef   :  { %v2976_v9 = vpop.f32.mrf.mxu0 }
 0xdf0   :  { %v2985_v62 = vmul.f32 0.25, %v2976_v9  ;;  %v2990_v49 = vsel %vm1490_vm5, %v2986_v41, -inf  ;;  %v9448_v9 = vld [vmem:[%s10457_s4 + $0x7] ss:$0 sm:$0xff] }
 0xdf1   :  { %2991 = vmax.xlane.f32.xlu1 %v2990_v49 }
 0xdf2   :  { %v2987_v53 = vsel %vm1490_vm5, %v2985_v62, -inf }
 0xdf3   :  { %2988 = vmax.xlane.f32.xlu0 %v2987_v53 }
 0xe7a   :  { %v2992_v50 = vpop.xlane.xlu1 %2991 }
 0xe7b   :  { %v2994_v58 = vsub.f32 %v2986_v41, %v2992_v50  ;;  %v6908_v41 = vld [vmem:[%s10457_s4 + $0xd] ss:$0 sm:$0xff]  ;;  %v9456_v50 = vld [vmem:[%s10457_s4 + $0x8] ss:$0 sm:$0xff] }
 0xe7c   :  { %v2989_v5 = vpop.xlane.xlu0 %2988  ;;  %v9459_v8 = vadd.f32 %v6908_v41, %v8871_v3 }
 0xe7d   :  { %v2997_v7 = vmul.f32 1.442695, %v2994_v58  ;;  %v2993_v16 = vsub.f32 %v2985_v62, %v2989_v5  ;;  %v9450_v62 = vadd.f32 1.0, %v872_v48 }
 0xe7f   :  { %8428 = vpow2.f32 %v2997_v7  ;;  %v2995_v60 = vmul.f32 1.442695, %v2993_v16  ;;  %v3344_v7 = vrot.slane %v9450_v62, %v8913_v29 }
 0xe81   :  { %8430 = vpow2.f32 %v2995_v60 }
 0xe8c   :  { %v8429_v18 = vpop.eup %8428 }
 0xe8d   :  { %v3002_v63 = vsel %vm1490_vm5, %v8429_v18, 0.0 }
 0xe8e   :  { %v8431_v20 = vpop.eup %8430  ;;  %3003 = vadd.xlane.f32.xlu1 %v3002_v63 }
 0xe8f   :  { %v2999_v21 = vsel %vm1490_vm5, %v8431_v20, 0.0 }
 0xe90   :  { %3000 = vadd.xlane.f32.xlu0 %v2999_v21 }
 0xe92   :  { %3272 = vadd.xlane.f32.xlu1 %v3271_v23 }
 0xe94   :  { %3269 = vadd.xlane.f32.xlu0 %v3268_v36 }
 0xf17   :  { %v3004_v57 = vpop.xlane.xlu1 %3003 }
 0xf18   :  { %8432 = vrcp.f32 %v3004_v57 }
 0xf19   :  { %v3001_v37 = vpop.xlane.xlu0 %3000 }
 0xf1a   :  { %8434 = vrcp.f32 %v3001_v37  ;;  %v3367_v37 = vld [vmem:[%s10460_s5 + $0x10] sm:$0xff] }
 0xf1b   :  { %v3273_v33 = vpop.xlane.xlu1 %3272 }
 0xf1c   :  { %v3281_v24 = vmul.f32 0.03125, %v3273_v33  ;;  %v3366_v33 = vld [vmem:[%s10460_s5 + $0x8] sm:$0xff] }
 0xf1d   :  { %v3270_v59 = vpop.xlane.xlu0 %3269 }
 0xf1e   :  { %v9381_v61 = vsub.f32 %v9369_v19, %v3281_v24  ;;  %v3280_v10 = vmul.f32 0.03125, %v3270_v59  ;;  %v3365_v24 = vld [vmem:[%s10460_s5] sm:$0xff]  ;;  %v10466_v59 = vmov 0.0  }
 0xf20   :  { %v9384_v54 = vsub.f32 %v9374_v26, %v3280_v10  ;;  %v3289_v1 = vmul.f32 %v9381_v61, %v9381_v61  ;;  %v3480_v10 = vld [vmem:[%s10461_s6 + $0x28] sm:$0xff] }
 0xf22   :  { %v3295_v4 = vsel %vm261_vm3, %v3289_v1, 0.0  ;;  %v3288_v25 = vmul.f32 %v9384_v54, %v9384_v54  ;;  %v3478_v1 = vld [vmem:[%s10461_s6 + $0x18] sm:$0xff] }
 0xf23   :  { %3296 = vadd.xlane.f32.xlu1 %v3295_v4  ;;  %v3477_v4 = vld [vmem:[%s10461_s6 + $0x10] sm:$0xff] }
 0xf24   :  { %v3292_v28 = vsel %vm261_vm3, %v3288_v25, 0.0  ;;  %v3476_v25 = vld [vmem:[%s10461_s6 + $0x8] sm:$0xff] }
 0xf25   :  { %3293 = vadd.xlane.f32.xlu0 %v3292_v28  ;;  %v8433_v44 = vpop.eup %8432  ;;  %v3475_v28 = vld [vmem:[%s10461_s6] sm:$0xff] }
 0xf26   :  { %v3008_v39 = vmul.f32 %v8433_v44, %v8429_v18  ;;  %v3350_v18 = vrot.slane %v9459_v8, %v8913_v29 }
 0xf27   :  { %v8435_v6 = vpop.eup %8434 }
 0xf28   :  { %v3006_v46 = vmul.f32 %v8435_v6, %v8431_v20 }
 0xf2a   :  { %7939 = vmatprep.mubr.msk.f32.mxu1 %vm1490_vm5, %v3006_v46 }
 0xf2b   :  { %7940 = vmatmul.mubr.msk.f32.vlgmr.msra.gmra.mxu1 %vm1490_vm5, %v3008_v39 }
 0xf2c   :  { %7954 = vmatpush3.msra.mxu1 %v9150_v51  ;;  %7961 = vmatprep.mubr.msk.f32.mxu1 %vm261_vm3, %v9346_v22  ;;  %v9408_v51 = vld [vmem:[%s10460_s5 + $0x18] sm:$0xff] }
 0xf2d   :  { %7955 = vmatprep.subr.mxu1 %v9161_v35  ;;  %7964 = vmatprep.subr.mxu0 %v9408_v51 }
 0xf2e   :  { %7956 = vmatpush3.msra.mxu1 %v9161_v35  ;;  %v3490_v35 = vld [vmem:[%s10461_s6 + $0x78] sm:$0xff] }
 0xf2f   :  { %7957 = vmatprep.subr.mxu1 %v9170_v40 }
 0xf30   :  { %7958 = vmatpush3.msra.mxu1 %v9170_v40  ;;  %v3489_v40 = vld [vmem:[%s10461_s6 + $0x70] sm:$0xff] }
 0xf31   :  { %7959 = vmatprep.subr.mxu1 %v9177_v0 }
 0xf32   :  { %7960 = vmatpush3.msra.mxu1 %v9177_v0  ;;  %v3488_v0 = vld [vmem:[%s10461_s6 + $0x68] sm:$0xff] }
 0xf33   :  { %7962 = vmatmul.mubr.msk.f32.vlgmr.msra.gmra.mxu1 %vm261_vm3, %v9344_v27  ;;  %7978 = vmatprep.subr.mxu1 %v3490_v35 }
 0xf34   :  { %7979 = vmatpush3.msra.mxu1 %v3490_v35  ;;  %v3257_v35 = vrot.slane %v9277_v30, %v9223_v32 }
 0xf35   :  { %7980 = vmatprep.subr.mxu1 %v3489_v40 }
 0xf36   :  { %7981 = vmatpush3.msra.mxu1 %v3489_v40 }
 0xf37   :  { %7982 = vmatprep.subr.mxu1 %v3488_v0 }
 0xf38   :  { %7983 = vmatpush3.msra.mxu1 %v3488_v0 }
 0xf39   :  { %7984 = vmatprep.subr.mxu1 %v3487_v12 }
 0xf3a   :  { %7985 = vmatpush3.msra.mxu1 %v3487_v12  ;;  %v3369_v12 = vld [vmem:[%s10460_s5 + $0x20] sm:$0xff] }
 0xf3b   :  { %7986 = vmatprep.subr.mxu1 %v3486_v13 }
 0xf3c   :  { %7987 = vmatpush3.msra.mxu1 %v3486_v13 }
 0xf3d   :  { %7988 = vmatprep.subr.mxu1 %v3485_v31 }
 0xf3e   :  { %7989 = vmatpush3.msra.mxu1 %v3485_v31 }
 0xf3f   :  { %7990 = vmatprep.subr.mxu1 %v3484_v52 }
 0xf40   :  { %7991 = vmatpush3.msra.mxu1 %v3484_v52  ;;  %v9515_v52 = vrot.slane %v3369_v12, %v8913_v29 }
 0xf41   :  { %7992 = vmatprep.subr.mxu1 %v3483_v34 }
 0xf42   :  { %7993 = vmatpush3.msra.mxu1 %v3483_v34 }
 0xf43   :  { %7994 = vmatprep.subr.mxu1 %v3482_v2 }
 0xf44   :  { %7995 = vmatpush3.msra.mxu1 %v3482_v2 }
 0xfac   :  { %v3297_v55 = vpop.xlane.xlu1 %3296 }
 0xfad   :  { %v3305_v27 = vmul.f32 0.03125, %v3297_v55 }
 0xfae   :  { %v3294_v22 = vpop.xlane.xlu0 %3293 }
 0xfaf   :  { %v3309_v42 = vadd.f32 1e-05, %v3305_v27  ;;  %v3304_v38 = vmul.f32 0.03125, %v3294_v22 }
 0xfb1   :  { %8436 = vrsqrt.f32 %v3309_v42  ;;  %v3308_v14 = vadd.f32 1e-05, %v3304_v38 }
 0xfb3   :  { %8438 = vrsqrt.f32 %v3308_v14 }
 0xfbe   :  { %v8437_v56 = vpop.eup %8436 }
 0xfbf   :  { %v3317_v49 = vmul.f32 %v8437_v56, %v9381_v61  ;;  %v3481_v61 = vld [vmem:[%s10461_s6 + $0x30] sm:$0xff] }
 0xfc0   :  { %v8439_v53 = vpop.eup %8438  ;;  %7996 = vmatprep.subr.mxu1 %v3481_v61 }
 0xfc1   :  { %v3327_v58 = vmul.f32 %v9448_v9, %v3317_v49  ;;  %v3316_v5 = vmul.f32 %v8439_v53, %v9384_v54  ;;  %7997 = vmatpush3.msra.mxu1 %v3481_v61  ;;  %v3479_v54 = vld [vmem:[%s10461_s6 + $0x20] sm:$0xff] }
 0xfc2   :  { %7998 = vmatprep.subr.mxu1 %v3480_v10 }
 0xfc3   :  { %v3326_v16 = vmul.f32 %v9448_v9, %v3316_v5  ;;  %v3337_v60 = vadd.f32 %v9456_v50, %v3327_v58  ;;  %7999 = vmatpush3.msra.mxu1 %v3480_v10 }
 0xfc4   :  { %8000 = vmatprep.subr.mxu1 %v3479_v54 }
 0xfc5   :  { %v3336_v63 = vadd.f32 %v9456_v50, %v3326_v16  ;;  %v3346_v20 = vmul.f32 %v3344_v7, %v3337_v60  ;;  %8001 = vmatpush3.msra.mxu1 %v3479_v54  ;;  %v7036_v16 = vld [vmem:[%s10455_s3 + $0x218] sm:$0xff]  ;;  %v7035_v60 = vld [vmem:[%s10455_s3 + $0x210] sm:$0xff] }
 0xfc6   :  { %8002 = vmatprep.subr.mxu1 %v3478_v1 }
 0xfc7   :  { %v3345_v21 = vmul.f32 %v3344_v7, %v3336_v63  ;;  %v3352_v3 = vadd.f32 %v3350_v18, %v3346_v20  ;;  %8003 = vmatpush3.msra.mxu1 %v3478_v1  ;;  %v7033_v63 = vld [vmem:[%s10455_s3 + $0x200] sm:$0xff]  ;;  %v6915_v20 = vld [vmem:[%s10457_s4 + $0xe] ss:$0 sm:$0xff] }
 0xfc8   :  { %8004 = vmatprep.subr.mxu1 %v3477_v4 }
 0xfc9   :  { %v3351_v23 = vadd.f32 %v3350_v18, %v3345_v21  ;;  %8005 = vmatpush3.msra.mxu1 %v3477_v4  ;;  %v7034_v18 = vld [vmem:[%s10455_s3 + $0x208] sm:$0xff]  ;;  %v9553_v21 = vadd.f32 %v6915_v20, %v8888_v11 }
 0xfca   :  { %8006 = vmatprep.subr.mxu1 %v3476_v25 }
 0xfcb   :  { %8007 = vmatpush3.msra.mxu1 %v3476_v25 }
 0xfcc   :  { %8008 = vmatprep.subr.mxu1 %v3475_v28 }
 0xfcd   :  { %8009 = vmatpush3.msra.mxu1 %v3475_v28 }
 0xfce   :  { %8060 = vmatprep.subr.mxu1 %v10466_v59 }
 0xfeb   :  { %v7941_v36 = vpop.f32.mrf.mxu1 }
 0xfed   :  { %v3081_v57 = vpop.f32.mrf.mxu1 }
 0xfee   :  { %7950 = vmatprep.mubr.msk.f32.mxu0 %vm261_vm3, %v3081_v57 }
 0xfef   :  { %7951 = vmatmul.mubr.msk.f32.vlgmr.msra.gmra.mxu0 %vm261_vm3, %v7941_v36  ;;  %v3587_v36 = vrot.slane %v9553_v21, %v8913_v29 }
 0xff0   :  { %7965 = vmatpush3.msra.mxu0 %v9408_v51  ;;  %7972 = vmatprep.mubr.msk.f32.mxu0 %vm261_vm3, %v3351_v23 }
 0xff1   :  { %7966 = vmatprep.subr.mxu0 %v3367_v37 }
 0xff2   :  { %7967 = vmatpush3.msra.mxu0 %v3367_v37 }
 0xff3   :  { %7968 = vmatprep.subr.mxu0 %v3366_v33  ;;  %v7963_v44 = vpop.f32.mrf.mxu1 }
 0xff4   :  { %7969 = vmatpush3.msra.mxu0 %v3366_v33 }
 0xff5   :  { %7970 = vmatprep.subr.mxu0 %v3365_v24  ;;  %v3243_v39 = vpop.f32.mrf.mxu1 }
 0xff6   :  { %7971 = vmatpush3.msra.mxu0 %v3365_v24 }
 0xff7   :  { %7973 = vmatmul.mubr.msk.f32.vlgmr.msra.gmra.mxu0 %vm261_vm3, %v3352_v3  ;;  %8016 = vmatprep.subr.mxu0 %v10466_v59  ;;  %v9558_v3 = vld [vmem:[%s10457_s4 + $0x16] ss:$0 sm:$0xff] }
 0xff8   :  { %8017 = vmatpush3.msra.mxu0 %v7036_v16 }
 0xff9   :  { %8018 = vmatprep.subr.mxu0 %v10466_v59 }
 0xffa   :  { %8019 = vmatpush3.msra.mxu0 %v7035_v60  ;;  %v7068_v60 = vld [vmem:[%s10455_s3 + $0x2a0] sm:$0xff] }
 0xffb   :  { %8020 = vmatprep.subr.mxu0 %v10466_v59 }
 0xffc   :  { %8021 = vmatpush3.msra.mxu0 %v7034_v18 }
 0xffd   :  { %8022 = vmatprep.subr.mxu0 %v10466_v59 }
 0xffe   :  { %8023 = vmatpush3.msra.mxu0 %v7033_v63 }
 0xfff   :  { %8027 = vmatprep.subr.mxu0 %v10466_v59 }
0x10af   :  { %v7952_v6 = vpop.f32.mrf.mxu0 }
0x10b0   :  { %v3249_v46 = vadd.f32 %v7963_v44, %v7952_v6 }
0x10b1   :  { %v3162_v51 = vpop.f32.mrf.mxu0 }
0x10b2   :  { %v3253_v40 = vadd.f32 %v9282_v45, %v3249_v46  ;;  %v3244_v0 = vadd.f32 %v3243_v39, %v3162_v51 }
0x10b4   :  { %v3259_v13 = vmul.f32 %v3257_v35, %v3253_v40  ;;  %v3252_v31 = vadd.f32 %v9282_v45, %v3244_v0  ;;  %v3356_v40 = vrot.slane %v9450_v62, %v9223_v32  ;;  %v7042_v62 = vld [vmem:[%s10455_s3 + $0x230] sm:$0xff] }
0x10b6   :  { %v3258_v34 = vmul.f32 %v3257_v35, %v3252_v31  ;;  %v9518_v2 = vadd.f32 %v3259_v13, %v9136_v43  ;;  %v3362_v13 = vrot.slane %v9459_v8, %v9223_v32  ;;  %v7040_v8 = vld [vmem:[%s10455_s3 + $0x220] sm:$0xff] }
0x10b7   :  { %v7974_v55 = vpop.f32.mrf.mxu0 }
0x10b8   :  { %v3277_v30 = vsel %vm261_vm3, %v9518_v2, 0.0  ;;  %v9523_v27 = vadd.f32 %v3258_v34, %v9140_v15  ;;  %v3458_v22 = vadd.f32 %v7974_v55, %v9515_v52 }
0x10b9   :  { %v3452_v42 = vpop.f32.mrf.mxu0  ;;  %3278 = vadd.xlane.f32.xlu1 %v3277_v30 }
0x10ba   :  { %v3453_v45 = vadd.f32 %v3452_v42, %v9515_v52  ;;  %v3274_v38 = vsel %vm261_vm3, %v9523_v27, 0.0  ;;  %v3472_v43 = vmax.f32 %v3458_v22, 0.0  ;;  %v7050_v42 = vld [vmem:[%s10455_s3 + $0x258] sm:$0xff] }
0x10bb   :  { %3275 = vadd.xlane.f32.xlu0 %v3274_v38  ;;  %v7048_v38 = vld [vmem:[%s10455_s3 + $0x248] sm:$0xff] }
0x10bc   :  { %v3471_v14 = vmax.f32 %v3453_v45, 0.0  ;;  %v7049_v45 = vld [vmem:[%s10455_s3 + $0x250] sm:$0xff] }
0x10be   :  { %8010 = vmatprep.mubr.f32.mxu1 %v3471_v14  ;;  %v7047_v14 = vld [vmem:[%s10455_s3 + $0x240] sm:$0xff] }
0x10bf   :  { %8011 = vmatmul.mubr.f32.vlgmr.msra.gmra.mxu1 %v3472_v43  ;;  %v7057_v43 = vld [vmem:[%s10455_s3 + $0x278] sm:$0xff] }
0x1142   :  { %v3279_v47 = vpop.xlane.xlu1 %3278 }
0x1143   :  { %v3283_v48 = vmul.f32 0.03125, %v3279_v47  ;;  %v7056_v47 = vld [vmem:[%s10455_s3 + $0x270] sm:$0xff] }
0x1144   :  { %v3276_v56 = vpop.xlane.xlu0 %3275 }
0x1145   :  { %v3287_v15 = vsub.f32 %v9518_v2, %v3283_v48  ;;  %v3282_v41 = vmul.f32 0.03125, %v3276_v56  ;;  %v7055_v48 = vld [vmem:[%s10455_s3 + $0x268] sm:$0xff]  ;;  %v7054_v56 = vld [vmem:[%s10455_s3 + $0x260] sm:$0xff] }
0x1147   :  { %v3286_v49 = vsub.f32 %v9523_v27, %v3282_v41  ;;  %v3291_v53 = vmul.f32 %v3287_v15, %v3287_v15  ;;  %v7070_v41 = vld [vmem:[%s10455_s3 + $0x2b0] sm:$0xff] }
0x1149   :  { %v3301_v58 = vsel %vm261_vm3, %v3291_v53, 0.0  ;;  %v3290_v5 = vmul.f32 %v3286_v49, %v3286_v49 }
0x114a   :  { %3302 = vadd.xlane.f32.xlu1 %v3301_v58  ;;  %v7069_v58 = vld [vmem:[%s10455_s3 + $0x2a8] sm:$0xff] }
0x114b   :  { %v3298_v7 = vsel %vm261_vm3, %v3290_v5, 0.0 }
0x114c   :  { %3299 = vadd.xlane.f32.xlu0 %v3298_v7 }
0x117f   :  { %v8012_v23 = vpop.f32.mrf.mxu1 }
0x1180   :  { %v3571_v57 = vadd.f32 %v8012_v23, %v9558_v3 }
0x1181   :  { %v3565_v37 = vpop.f32.mrf.mxu1 }
0x1182   :  { %v3589_v33 = vmul.f32 %v3587_v36, %v3571_v57  ;;  %v3566_v24 = vadd.f32 %v9558_v3, %v3565_v37  ;;  %v7064_v57 = vld [vmem:[%s10455_s3 + $0x298] sm:$0xff]  ;;  %v7063_v37 = vld [vmem:[%s10455_s3 + $0x290] sm:$0xff] }
0x1183   :  { %8061 = vmatpush3.msra.mxu1 %v7064_v57 }
0x1184   :  { %v9565_v61 = vadd.f32 %v3589_v33, %v9369_v19  ;;  %v3588_v11 = vmul.f32 %v3587_v36, %v3566_v24  ;;  %8062 = vmatprep.subr.mxu1 %v10466_v59  ;;  %v7062_v33 = vld [vmem:[%s10455_s3 + $0x288] sm:$0xff]  ;;  %v7061_v24 = vld [vmem:[%s10455_s3 + $0x280] sm:$0xff] }
0x1185   :  { %8063 = vmatpush3.msra.mxu1 %v7063_v37 }
0x1186   :  { %v9568_v10 = vadd.f32 %v3588_v11, %v9374_v26  ;;  %v4105_v54 = vsel %vm261_vm3, %v9565_v61, 0.0  ;;  %8064 = vmatprep.subr.mxu1 %v10466_v59  ;;  %v9689_v11 = vld [vmem:[%s10455_s3 + $0x2d8] sm:$0xff] }
0x1187   :  { %4106 = vadd.xlane.f32.xlu1 %v4105_v54  ;;  %8065 = vmatpush3.msra.mxu1 %v7062_v33  ;;  %v9694_v54 = vld [vmem:[%s10455_s3 + $0x318] sm:$0xff] }
0x1188   :  { %v4102_v1 = vsel %vm261_vm3, %v9568_v10, 0.0  ;;  %8066 = vmatprep.subr.mxu1 %v10466_v59 }
0x1189   :  { %4103 = vadd.xlane.f32.xlu0 %v4102_v1  ;;  %8067 = vmatpush3.msra.mxu1 %v7061_v24  ;;  %v9702_v1 = vld [vmem:[%s10455_s3 + $0x310] sm:$0xff] }
0x118a   :  { %8082 = vmatprep.subr.mxu1 %v9689_v11 }
0x11d3   :  { %v3303_v4 = vpop.xlane.xlu1 %3302 }
0x11d4   :  { %v3307_v25 = vmul.f32 0.03125, %v3303_v4  ;;  %v9709_v4 = vld [vmem:[%s10455_s3 + $0x308] sm:$0xff] }
0x11d5   :  { %v3300_v28 = vpop.xlane.xlu0 %3299 }
0x11d6   :  { %v3311_v44 = vadd.f32 1e-05, %v3307_v25  ;;  %v3306_v6 = vmul.f32 0.03125, %v3300_v28  ;;  %v9716_v25 = vld [vmem:[%s10455_s3 + $0x300] sm:$0xff] }
0x11d8   :  { %8440 = vrsqrt.f32 %v3311_v44  ;;  %v3310_v19 = vadd.f32 1e-05, %v3306_v6 }
0x11da   :  { %8442 = vrsqrt.f32 %v3310_v19 }
0x11e5   :  { %v8441_v46 = vpop.eup %8440 }
0x11e6   :  { %v3319_v39 = vmul.f32 %v8441_v46, %v3287_v15  ;;  %v7071_v15 = vld [vmem:[%s10455_s3 + $0x2b8] sm:$0xff] }
0x11e7   :  { %v8443_v26 = vpop.eup %8442 }
0x11e8   :  { %v3318_v51 = vmul.f32 %v8443_v26, %v3286_v49  ;;  %v3329_v35 = vmul.f32 %v9448_v9, %v3319_v39 }
0x11ea   :  { %v3328_v0 = vmul.f32 %v9448_v9, %v3318_v51  ;;  %v3339_v12 = vadd.f32 %v9456_v50, %v3329_v35  ;;  %v7043_v9 = vld [vmem:[%s10455_s3 + $0x238] sm:$0xff] }
0x11ec   :  { %v3338_v31 = vadd.f32 %v9456_v50, %v3328_v0  ;;  %v3358_v34 = vmul.f32 %v3356_v40, %v3339_v12  ;;  %v7041_v50 = vld [vmem:[%s10455_s3 + $0x228] sm:$0xff]  ;;  %v7038_v12 = vld [vmem:[%s10457_s4 + $0x1b] ss:$0 sm:$0xff] }
0x11ee   :  { %v3357_v55 = vmul.f32 %v3356_v40, %v3338_v31  ;;  %v3364_v30 = vadd.f32 %v3362_v13, %v3358_v34 }
0x11f0   :  { %v3363_v22 = vadd.f32 %v3362_v13, %v3357_v55 }
0x11f2   :  { %7975 = vmatprep.mubr.msk.f32.mxu0 %vm261_vm3, %v3363_v22 }
0x11f3   :  { %7976 = vmatmul.mubr.msk.f32.gmra.mxu0 %vm261_vm3, %v3364_v30 }
0x11f4   :  { %8024 = vmatprep.mubr.msk.f32.mxu0 %vm8501_vm0, %v10466_v59 }
0x11f7   :  { %8025 = vmatmul.mubr.msk.f32.vlgmr.msra.gmra.mxu0 %vm261_vm3, %v8706_v17 }
0x11f8   :  { %8028 = vmatpush3.msra.mxu0 %v7043_v9  ;;  %8035 = vmatprep.mubr.msk.f32.mxu0 %vm8501_vm0, %v10466_v59 }
0x11f9   :  { %8029 = vmatprep.subr.mxu0 %v10466_v59 }
0x11fa   :  { %8030 = vmatpush3.msra.mxu0 %v7042_v62  ;;  %v9728_v62 = vld [vmem:[%s10457_s4 + $0x17] ss:$0 sm:$0xff] }
0x11fb   :  { %8031 = vmatprep.subr.mxu0 %v10466_v59 }
0x11fc   :  { %8032 = vmatpush3.msra.mxu0 %v7041_v50 }
0x11fd   :  { %8033 = vmatprep.subr.mxu0 %v10466_v59 }
0x11fe   :  { %8034 = vmatpush3.msra.mxu0 %v7040_v8 }
0x11ff   :  { %8036 = vmatmul.mubr.msk.f32.vlgmr.msra.gmra.mxu0 %vm261_vm3, %v8706_v17  ;;  %8038 = vmatprep.subr.mxu0 %v10466_v59 }
0x1200   :  { %8039 = vmatpush3.msra.mxu0 %v7050_v42  ;;  %8046 = vmatprep.mubr.msk.f32.mxu0 %vm8501_vm0, %v10466_v59 }
0x1201   :  { %8040 = vmatprep.subr.mxu0 %v10466_v59 }
0x1202   :  { %8041 = vmatpush3.msra.mxu0 %v7049_v45  ;;  %v9739_v45 = vld [vmem:[%s10457_s4 + $0x18] ss:$0 sm:$0xff] }
0x1203   :  { %8042 = vmatprep.subr.mxu0 %v10466_v59 }
0x1204   :  { %8043 = vmatpush3.msra.mxu0 %v7048_v38  ;;  %v7045_v38 = vld [vmem:[%s10457_s4 + $0x1c] ss:$0 sm:$0xff] }
0x1205   :  { %8044 = vmatprep.subr.mxu0 %v10466_v59 }
0x1206   :  { %8045 = vmatpush3.msra.mxu0 %v7047_v14 }
0x1207   :  { %8047 = vmatmul.mubr.msk.f32.vlgmr.msra.gmra.mxu0 %vm261_vm3, %v8706_v17  ;;  %8049 = vmatprep.subr.mxu0 %v10466_v59 }
0x1208   :  { %8050 = vmatpush3.msra.mxu0 %v7057_v43  ;;  %8057 = vmatprep.mubr.msk.f32.mxu0 %vm8501_vm0, %v10466_v59  ;;  %v9749_v43 = vld [vmem:[%s10455_s3 + $0x2d0] sm:$0xff] }
0x1209   :  { %8051 = vmatprep.subr.mxu0 %v10466_v59 }
0x120a   :  { %8052 = vmatpush3.msra.mxu0 %v7056_v47 }
0x120b   :  { %8053 = vmatprep.subr.mxu0 %v10466_v59 }
0x120c   :  { %8054 = vmatpush3.msra.mxu0 %v7055_v48 }
0x120d   :  { %8055 = vmatprep.subr.mxu0 %v10466_v59 }
0x120e   :  { %8056 = vmatpush3.msra.mxu0 %v7054_v56 }
0x120f   :  { %8058 = vmatmul.mubr.msk.f32.vlgmr.msra.gmra.mxu0 %vm261_vm3, %v8706_v17  ;;  %8071 = vmatprep.subr.mxu0 %v10466_v59 }
0x1210   :  { %v4107_v49 = vpop.xlane.xlu1 %4106  ;;  %8072 = vmatpush3.msra.mxu0 %v7071_v15  ;;  %8079 = vmatprep.mubr.msk.f32.mxu0 %vm8501_vm0, %v10466_v59  ;;  %v9761_v15 = vld [vmem:[%s10455_s3 + $0x2c8] sm:$0xff] }
0x1211   :  { %v4115_v53 = vmul.f32 0.03125, %v4107_v49  ;;  %8073 = vmatprep.subr.mxu0 %v10466_v59 }
0x1212   :  { %8074 = vmatpush3.msra.mxu0 %v7070_v41  ;;  %v4104_v5 = vpop.xlane.xlu0 %4103 }
0x1213   :  { %v4119_v7 = vsub.f32 %v9565_v61, %v4115_v53  ;;  %v4114_v16 = vmul.f32 0.03125, %v4104_v5  ;;  %8075 = vmatprep.subr.mxu0 %v10466_v59 }
0x1214   :  { %8076 = vmatpush3.msra.mxu0 %v7069_v58  ;;  %v9770_v58 = vld [vmem:[%s10455_s3 + $0x2c0] sm:$0xff] }
0x1215   :  { %v4118_v18 = vsub.f32 %v9568_v10, %v4114_v16  ;;  %8077 = vmatprep.subr.mxu0 %v10466_v59  ;;  %v4123_v63 = vmul.f32 %v4119_v7, %v4119_v7  ;;  %v9782_v16 = vld [vmem:[%s10455_s3 + $0x358] sm:$0xff] }
0x1216   :  { %8078 = vmatpush3.msra.mxu0 %v7068_v60 }
0x1217   :  { %8080 = vmatmul.mubr.msk.f32.vlgmr.msra.gmra.mxu0 %vm261_vm3, %v8706_v17  ;;  %v4129_v20 = vsel %vm261_vm3, %v4123_v63, 0.0  ;;  %v4122_v23 = vmul.f32 %v4118_v18, %v4118_v18  ;;  %8093 = vmatprep.subr.mxu0 %v9694_v54 }
0x1218   :  { %4130 = vadd.xlane.f32.xlu1 %v4129_v20  ;;  %8094 = vmatpush3.msra.mxu0 %v9694_v54  ;;  %v9807_v20 = vld [vmem:[%s10455_s3 + $0x348] sm:$0xff] }
0x1219   :  { %v4126_v36 = vsel %vm261_vm3, %v4122_v23, 0.0  ;;  %8095 = vmatprep.subr.mxu0 %v9702_v1  ;;  %v9814_v23 = vld [vmem:[%s10455_s3 + $0x340] sm:$0xff] }
0x121a   :  { %4127 = vadd.xlane.f32.xlu0 %v4126_v36  ;;  %8096 = vmatpush3.msra.mxu0 %v9702_v1 }
0x121b   :  { %8097 = vmatprep.subr.mxu0 %v9709_v4 }
0x121c   :  { %8098 = vmatpush3.msra.mxu0 %v9709_v4 }
0x121d   :  { %8099 = vmatprep.subr.mxu0 %v9716_v25 }
0x121e   :  { %8100 = vmatpush3.msra.mxu0 %v9716_v25 }
0x12a1   :  { %v4131_v28 = vpop.xlane.xlu1 %4130 }
0x12a2   :  { %v4139_v44 = vmul.f32 0.03125, %v4131_v28  ;;  %v3593_v28 = vrot.slane %v9553_v21, %v9223_v32  ;;  %v9844_v21 = vld [vmem:[%s10457_s4 + $0x21] ss:$0 sm:$0xff] }
0x12a3   :  { %v4128_v6 = vpop.xlane.xlu0 %4127 }
0x12a4   :  { %v4143_v19 = vadd.f32 1e-05, %v4139_v44  ;;  %v4138_v46 = vmul.f32 0.03125, %v4128_v6 }
0x12a6   :  { %v4142_v39 = vadd.f32 1e-05, %v4138_v46  ;;  %8444 = vrsqrt.f32 %v4143_v19 }
0x12a8   :  { %8446 = vrsqrt.f32 %v4142_v39 }
0x12b3   :  { %v7977_v26 = vpop.f32.mrf.mxu0  ;;  %v8445_v51 = vpop.eup %8444 }
0x12b4   :  { %v3468_v40 = vadd.f32 %v7977_v26, %v9515_v52  ;;  %v4151_v22 = vmul.f32 %v8445_v51, %v4119_v7 }
0x12b5   :  { %v8447_v35 = vpop.eup %8446  ;;  %v3462_v0 = vpop.f32.mrf.mxu0 }
0x12b6   :  { %v3463_v13 = vadd.f32 %v3462_v0, %v9515_v52  ;;  %v4150_v30 = vmul.f32 %v8447_v35, %v4118_v18  ;;  %v3474_v9 = vmax.f32 %v3468_v40, 0.0  ;;  %v4161_v52 = vmul.f32 %v9728_v62, %v4151_v22  ;;  %v9796_v18 = vld [vmem:[%s10455_s3 + $0x350] sm:$0xff]  ;;  %v9839_v35 = vld [vmem:[%s10457_s4 + $0x23] ss:$0 sm:$0xff] }
0x12b7   :  { %v3679_v31 = vpop.f32.mrf.mxu0 }
0x12b8   :  { %v3473_v34 = vmax.f32 %v3463_v13, 0.0  ;;  %v3680_v55 = vadd.f32 %v7038_v12, %v3679_v31  ;;  %v4160_v42 = vmul.f32 %v9728_v62, %v4150_v30  ;;  %v4171_v48 = vadd.f32 %v9739_v45, %v4161_v52  ;;  %v9861_v30 = vld [vmem:[%s10455_s3 + $0x338] sm:$0xff] }
0x12b9   :  { %v8026_v50 = vpop.f32.mrf.mxu0 }
0x12ba   :  { %v9730_v8 = vadd.f32 1.0, %v3680_v55  ;;  %8013 = vmatprep.mubr.f32.mxu1 %v3473_v34  ;;  %v9856_v55 = vld [vmem:[%s10457_s4 + $0x25] ss:$0 sm:$0xff] }
0x12bb   :  { %8014 = vmatmul.mubr.f32.gmra.mxu1 %v3474_v9 }
0x12bc   :  { %8068 = vmatprep.mubr.msk.f32.mxu1 %vm8501_vm0, %v10466_v59  ;;  %v4178_v14 = vrot.slane %v9730_v8, %v8913_v29  ;;  %v4170_v59 = vadd.f32 %v9739_v45, %v4160_v42 }
0x12be   :  { %v4179_v49 = vmul.f32 %v4178_v14, %v4170_v59  ;;  %v4180_v53 = vmul.f32 %v4178_v14, %v4171_v48  ;;  %v9880_v14 = vld [vmem:[%s10455_s3 + $0x328] sm:$0xff] }
0x12bf   :  { %v3762_v47 = vpop.f32.mrf.mxu0  ;;  %8069 = vmatmul.mubr.msk.f32.vlgmr.msra.gmra.mxu1 %vm261_vm3, %v8706_v17 }
0x12c0   :  { %v9755_v56 = vadd.f32 %v7045_v38, %v3762_v47  ;;  %8083 = vmatpush3.msra.mxu1 %v9689_v11  ;;  %v9872_v38 = vld [vmem:[%s10455_s3 + $0x330] sm:$0xff]  ;;  %v9887_v47 = vld [vmem:[%s10455_s3 + $0x320] sm:$0xff] }
0x12c1   :  { %v8037_v41 = vpop.f32.mrf.mxu0  ;;  %8084 = vmatprep.subr.mxu1 %v9749_v43 }
0x12c2   :  { %v4184_v17 = vrot.slane %v9755_v56, %v8913_v29  ;;  %8085 = vmatpush3.msra.mxu1 %v9749_v43 }
0x12c3   :  { %8086 = vmatprep.subr.mxu1 %v9761_v15 }
0x12c4   :  { %v9773_v5 = vadd.f32 %v4184_v17, %v4179_v49  ;;  %v9775_v7 = vadd.f32 %v4184_v17, %v4180_v53  ;;  %8087 = vmatpush3.msra.mxu1 %v9761_v15 }
0x12c5   :  { %8088 = vmatprep.subr.mxu1 %v9770_v58 }
0x12c6   :  { %8089 = vmatpush3.msra.mxu1 %v9770_v58  ;;  %8090 = vmatprep.mubr.msk.f32.mxu1 %vm261_vm3, %v9773_v5 }
0x12c7   :  { %8101 = vmatprep.mubr.msk.f32.mxu0 %vm261_vm3, %v9773_v5  ;;  %v9789_v60 = vpop.f32.mrf.mxu0  ;;  %8091 = vmatmul.mubr.msk.f32.vlgmr.msra.gmra.mxu1 %vm261_vm3, %v9775_v7 }
0x12c8   :  { %8102 = vmatmul.mubr.msk.f32.vlgmr.msra.gmra.mxu0 %vm261_vm3, %v9775_v7  ;;  %8104 = vmatprep.subr.mxu1 %v9782_v16 }
0x12c9   :  { %8105 = vmatpush3.msra.mxu1 %v9782_v16  ;;  %8112 = vmatprep.mubr.msk.f32.mxu1 %vm261_vm3, %v9773_v5  ;;  %v8048_v63 = vpop.f32.mrf.mxu0 }
0x12ca   :  { %8106 = vmatprep.subr.mxu1 %v9796_v18  ;;  %v9900_v63 = vld [vmem:[%s10457_s4 + $0x24] ss:$0 sm:$0xff] }
0x12cb   :  { %8107 = vmatpush3.msra.mxu1 %v9796_v18 }
0x12cc   :  { %8108 = vmatprep.subr.mxu1 %v9807_v20 }
0x12cd   :  { %8109 = vmatpush3.msra.mxu1 %v9807_v20 }
0x12ce   :  { %8110 = vmatprep.subr.mxu1 %v9814_v23 }
0x12cf   :  { %8111 = vmatpush3.msra.mxu1 %v9814_v23  ;;  %v9820_v36 = vpop.f32.mrf.mxu0 }
0x12d0   :  { %8113 = vmatmul.mubr.msk.f32.vlgmr.msra.gmra.mxu1 %vm261_vm3, %v9775_v7 }
0x12d1   :  { %v8059_v57 = vpop.f32.mrf.mxu0 }
0x12d7   :  { %v9824_v37 = vpop.f32.mrf.mxu0 }
0x12d9   :  { %v8081_v33 = vpop.f32.mrf.mxu0 }
0x137b   :  { %v8015_v24 = vpop.f32.mrf.mxu1 }
0x137c   :  { %v3581_v44 = vadd.f32 %v8015_v24, %v9558_v3 }
0x137d   :  { %v3575_v6 = vpop.f32.mrf.mxu1 }
0x137e   :  { %v9829_v19 = vmul.f32 %v3593_v28, %v3581_v44  ;;  %v3576_v46 = vadd.f32 %v9558_v3, %v3575_v6 }
0x137f   :  { %v9832_v39 = vpop.f32.mrf.mxu1 }
0x1380   :  { %v9834_v26 = vmul.f32 %v3593_v28, %v3576_v46 }
0x1381   :  { %v8070_v51 = vpop.f32.mrf.mxu1 }
0x1387   :  { %v8092_v40 = vpop.f32.mrf.mxu1 }
0x1388   :  { %v8103_v0 = vpop.f32.mrf.mxu0  ;;  %v4278_v9 = vadd.f32 %v8092_v40, %v9844_v21 }
0x1389   :  { %v4366_v12 = vadd.f32 %v8103_v0, %v9839_v35  ;;  %v4272_v3 = vpop.f32.mrf.mxu1 }
0x138a   :  { %v4273_v13 = vadd.f32 %v9844_v21, %v4272_v3  ;;  %v4360_v31 = vpop.f32.mrf.mxu0 }
0x138b   :  { %v4361_v34 = vadd.f32 %v9839_v35, %v4360_v31  ;;  %8115 = vmatprep.subr.msk.mxu0 %vm261_vm3, %v4366_v12 }
0x138c   :  { %8116 = vmatpush3.xpose.msk.msra.mxu0 %vm261_vm3, %v4366_v12  ;;  %8119 = vmatprep.mubr.msk.f32.mxu0 %vm261_vm3, %v4273_v13 }
0x138d   :  { %8117 = vmatprep.subr.msk.mxu0 %vm261_vm3, %v4361_v34 }
0x1390   :  { %v8114_v22 = vpop.f32.mrf.mxu1  ;;  %8118 = vmatpush3.xpose.msk.msra.mxu0 %vm261_vm3, %v4361_v34  ;;  %v9913_v34 = vld [vmem:[%s10455_s3 + $0x2f8] sm:$0xff] }
0x1391   :  { %v4454_v50 = vadd.f32 %v8114_v22, %v9856_v55  ;;  %8140 = vmatprep.subr.mxu0 %v9861_v30 }
0x1392   :  { %v4448_v42 = vpop.f32.mrf.mxu1 }
0x1393   :  { %v4449_v52 = vadd.f32 %v9856_v55, %v4448_v42  ;;  %8120 = vmatmul.mubr.msk.f32.vlgmr.msra.gmra.mxu0 %vm261_vm3, %v4278_v9  ;;  %8122 = vmatprep.subr.mxu1 %v4454_v50 }
0x1394   :  { %8123 = vmatpush3.msra.mxu1 %v4454_v50  ;;  %8141 = vmatpush3.msra.mxu0 %v9861_v30 }
0x1395   :  { %8148 = vmatprep.mubr.msk.f32.mxu0 %vm261_vm3, %v9773_v5  ;;  %8124 = vmatprep.subr.mxu1 %v4449_v52 }
0x1396   :  { %8142 = vmatprep.subr.mxu0 %v9872_v38  ;;  %8125 = vmatpush3.msra.mxu1 %v4449_v52 }
0x1397   :  { %8143 = vmatpush3.msra.mxu0 %v9872_v38  ;;  %8129 = vmatprep.subr.mxu1 %v9913_v34 }
0x1398   :  { %8144 = vmatprep.subr.mxu0 %v9880_v14 }
0x1399   :  { %8145 = vmatpush3.msra.mxu0 %v9880_v14 }
0x139a   :  { %8146 = vmatprep.subr.mxu0 %v9887_v47 }
0x139b   :  { %8147 = vmatpush3.msra.mxu0 %v9887_v47 }
0x139c   :  { %8149 = vmatmul.mubr.msk.f32.vlgmr.msra.gmra.mxu0 %vm261_vm3, %v9775_v7 }
0x1453   :  { %v8121_v59 = vpop.f32.mrf.mxu0 }
0x1454   :  { %v4545_v48 = vmul.f32 0.25, %v8121_v59 }
0x1455   :  { %v4535_v41 = vpop.f32.mrf.mxu0 }
0x1456   :  { %v4544_v49 = vmul.f32 0.25, %v4535_v41  ;;  %v4549_v53 = vsel %vm1490_vm5, %v4545_v48, -inf  ;;  %v9929_v41 = vld [vmem:[%s10455_s3 + $0x2e8] sm:$0xff] }
0x1457   :  { %4550 = vmax.xlane.f32.xlu1 %v4549_v53  ;;  %v9943_v53 = vld [vmem:[%s10455_s3 + $0x378] sm:$0xff] }
0x1458   :  { %v4546_v17 = vsel %vm1490_vm5, %v4544_v49, -inf }
0x1459   :  { %4547 = vmax.xlane.f32.xlu0 %v4546_v17  ;;  %v9950_v17 = vld [vmem:[%s10455_s3 + $0x370] sm:$0xff] }
0x145c   :  { %v8150_v57 = vpop.f32.mrf.mxu0 }
0x145d   :  { %v4827_v33 = vadd.f32 %v8150_v57, %v9900_v63  ;;  %v9961_v57 = vld [vmem:[%s10455_s3 + $0x368] sm:$0xff] }
0x145e   :  { %v4821_v24 = vpop.f32.mrf.mxu0 }
0x145f   :  { %v4822_v28 = vadd.f32 %v9900_v63, %v4821_v24  ;;  %8162 = vmatprep.subr.msk.mxu0 %vm261_vm3, %v4827_v33 }
0x1460   :  { %8163 = vmatpush3.xpose.msk.msra.mxu0 %vm261_vm3, %v4827_v33  ;;  %v9968_v33 = vld [vmem:[%s10455_s3 + $0x360] sm:$0xff] }
0x1461   :  { %8164 = vmatprep.subr.msk.mxu0 %vm261_vm3, %v4822_v28 }
0x1464   :  { %8165 = vmatpush3.xpose.msk.msra.mxu0 %vm261_vm3, %v4822_v28 }
0x14e0   :  { %v4551_v44 = vpop.xlane.xlu1 %4550 }
0x14e1   :  { %v4553_v6 = vsub.f32 %v4545_v48, %v4551_v44  ;;  %v9920_v48 = vld [vmem:[%s10455_s3 + $0x2f0] sm:$0xff]  ;;  %v9983_v44 = vld [vmem:[%s10457_s4 + $0x22] ss:$0 sm:$0xff] }
0x14e2   :  { %v4548_v46 = vpop.xlane.xlu0 %4547 }
0x14e3   :  { %v4556_v51 = vmul.f32 1.442695, %v4553_v6  ;;  %v4552_v40 = vsub.f32 %v4544_v49, %v4548_v46  ;;  %v9936_v49 = vld [vmem:[%s10455_s3 + $0x2e0] sm:$0xff] }
0x14e5   :  { %8448 = vpow2.f32 %v4556_v51  ;;  %v4554_v0 = vmul.f32 1.442695, %v4552_v40 }
0x14e7   :  { %8450 = vpow2.f32 %v4554_v0 }
0x14f2   :  { %v8449_v12 = vpop.eup %8448 }
0x14f3   :  { %v4561_v3 = vsel %vm1490_vm5, %v8449_v12, 0.0 }
0x14f4   :  { %v8451_v13 = vpop.eup %8450  ;;  %4562 = vadd.xlane.f32.xlu1 %v4561_v3 }
0x14f5   :  { %v4558_v31 = vsel %vm1490_vm5, %v8451_v13, 0.0 }
0x14f6   :  { %4559 = vadd.xlane.f32.xlu0 %v4558_v31 }
0x157d   :  { %v4563_v22 = vpop.xlane.xlu1 %4562 }
0x157e   :  { %8452 = vrcp.f32 %v4563_v22 }
0x157f   :  { %v4560_v9 = vpop.xlane.xlu0 %4559 }
0x1580   :  { %8454 = vrcp.f32 %v4560_v9 }
0x158b   :  { %v8453_v50 = vpop.eup %8452 }
0x158c   :  { %v4567_v59 = vmul.f32 %v8453_v50, %v8449_v12 }
0x158d   :  { %v8455_v42 = vpop.eup %8454 }
0x158e   :  { %v4565_v52 = vmul.f32 %v8455_v42, %v8451_v13 }
0x1590   :  { %8126 = vmatprep.mubr.msk.f32.mxu1 %vm1490_vm5, %v4565_v52 }
0x1591   :  { %8127 = vmatmul.mubr.msk.f32.vlgmr.msra.gmra.mxu1 %vm1490_vm5, %v4567_v59 }
0x1592   :  { %8130 = vmatpush3.msra.mxu1 %v9913_v34  ;;  %8137 = vmatprep.mubr.msk.f32.mxu1 %vm261_vm3, %v9773_v5 }
0x1593   :  { %8131 = vmatprep.subr.mxu1 %v9920_v48 }
0x1594   :  { %8132 = vmatpush3.msra.mxu1 %v9920_v48 }
0x1595   :  { %8133 = vmatprep.subr.mxu1 %v9929_v41 }
0x1596   :  { %8134 = vmatpush3.msra.mxu1 %v9929_v41 }
0x1597   :  { %8135 = vmatprep.subr.mxu1 %v9936_v49 }
0x1598   :  { %8136 = vmatpush3.msra.mxu1 %v9936_v49 }
0x1599   :  { %8138 = vmatmul.mubr.msk.f32.vlgmr.msra.gmra.mxu1 %vm261_vm3, %v9775_v7  ;;  %8151 = vmatprep.subr.mxu1 %v9943_v53 }
0x159a   :  { %8152 = vmatpush3.msra.mxu1 %v9943_v53  ;;  %8159 = vmatprep.mubr.msk.f32.mxu1 %vm261_vm3, %v9773_v5 }
0x159b   :  { %8153 = vmatprep.subr.mxu1 %v9950_v17 }
0x159c   :  { %8154 = vmatpush3.msra.mxu1 %v9950_v17 }
0x159d   :  { %8155 = vmatprep.subr.mxu1 %v9961_v57 }
0x159e   :  { %8156 = vmatpush3.msra.mxu1 %v9961_v57 }
0x159f   :  { %8157 = vmatprep.subr.mxu1 %v9968_v33 }
0x15a0   :  { %8158 = vmatpush3.msra.mxu1 %v9968_v33 }
0x15a1   :  { %8160 = vmatmul.mubr.msk.f32.vlgmr.msra.gmra.mxu1 %vm261_vm3, %v9775_v7  ;;  %v9992_v7 = vld [vmem:[%s10457_s4 + $0x26] ss:$0 sm:$0xff] }
0x1651   :  { %v9976_v5 = vpop.f32.mrf.mxu1 }
0x1653   :  { %v9978_v24 = vpop.f32.mrf.mxu1 }
0x1659   :  { %v8139_v28 = vpop.f32.mrf.mxu1 }
0x165a   :  { %v4739_v51 = vadd.f32 %v8139_v28, %v9983_v44 }
0x165b   :  { %v4733_v6 = vpop.f32.mrf.mxu1 }
0x165c   :  { %v4734_v46 = vadd.f32 %v9983_v44, %v4733_v6 }
0x165e   :  { %8166 = vmatprep.mubr.msk.f32.mxu0 %vm261_vm3, %v4734_v46 }
0x165f   :  { %8167 = vmatmul.mubr.msk.f32.vlgmr.msra.gmra.mxu0 %vm261_vm3, %v4739_v51 }
0x1661   :  { %v8161_v40 = vpop.f32.mrf.mxu1 }
0x1662   :  { %v4915_v0 = vadd.f32 %v8161_v40, %v9992_v7 }
0x1663   :  { %v4909_v12 = vpop.f32.mrf.mxu1 }
0x1664   :  { %v4910_v3 = vadd.f32 %v9992_v7, %v4909_v12  ;;  %8169 = vmatprep.subr.mxu1 %v4915_v0 }
0x1665   :  { %8170 = vmatpush3.msra.mxu1 %v4915_v0  ;;  %v10000_v0 = vadd.f32 %v9829_v19, %v9518_v2  ;;  %v10015_v2 = vld [vmem:[%s10455_s3 + $0x398] sm:$0xff] }
0x1666   :  { %8171 = vmatprep.subr.mxu1 %v4910_v3 }
0x1667   :  { %8172 = vmatpush3.msra.mxu1 %v4910_v3 }
0x1668   :  { %8187 = vmatprep.subr.mxu1 %v10015_v2 }
0x171f   :  { %v8168_v13 = vpop.f32.mrf.mxu0 }
0x1720   :  { %v5006_v31 = vmul.f32 0.25, %v8168_v13  ;;  %v10005_v13 = vadd.f32 %v9834_v26, %v9523_v27 }
0x1721   :  { %v4996_v22 = vpop.f32.mrf.mxu0 }
0x1722   :  { %v5005_v9 = vmul.f32 0.25, %v4996_v22  ;;  %v5010_v50 = vsel %vm1490_vm5, %v5006_v31, -inf  ;;  %v4111_v22 = vsel %vm261_vm3, %v10000_v0, 0.0 }
0x1723   :  { %5011 = vmax.xlane.f32.xlu1 %v5010_v50 }
0x1724   :  { %v5007_v42 = vsel %vm1490_vm5, %v5005_v9, -inf }
0x1725   :  { %5008 = vmax.xlane.f32.xlu0 %v5007_v42 }
0x17ac   :  { %v5012_v52 = vpop.xlane.xlu1 %5011 }
0x17ad   :  { %v5014_v59 = vsub.f32 %v5006_v31, %v5012_v52 }
0x17ae   :  { %v5009_v28 = vpop.xlane.xlu0 %5008 }
0x17af   :  { %v5017_v6 = vmul.f32 1.442695, %v5014_v59  ;;  %v5013_v46 = vsub.f32 %v5005_v9, %v5009_v28  ;;  %v4108_v9 = vsel %vm261_vm3, %v10005_v13, 0.0 }
0x17b1   :  { %8456 = vpow2.f32 %v5017_v6  ;;  %v5015_v51 = vmul.f32 1.442695, %v5013_v46 }
0x17b3   :  { %8458 = vpow2.f32 %v5015_v51 }
0x17be   :  { %v8457_v40 = vpop.eup %8456 }
0x17bf   :  { %v5022_v12 = vsel %vm1490_vm5, %v8457_v40, 0.0 }
0x17c0   :  { %v8459_v3 = vpop.eup %8458  ;;  %5023 = vadd.xlane.f32.xlu1 %v5022_v12 }
0x17c1   :  { %v5019_v31 = vsel %vm1490_vm5, %v8459_v3, 0.0 }
0x17c2   :  { %5020 = vadd.xlane.f32.xlu0 %v5019_v31 }
0x17c4   :  { %4112 = vadd.xlane.f32.xlu1 %v4111_v22 }
0x17c6   :  { %4109 = vadd.xlane.f32.xlu0 %v4108_v9 }
0x1849   :  { %v5024_v27 = vpop.xlane.xlu1 %5023 }
0x184a   :  { %8460 = vrcp.f32 %v5024_v27 }
0x184b   :  { %v5021_v19 = vpop.xlane.xlu0 %5020 }
0x184c   :  { %8462 = vrcp.f32 %v5021_v19  ;;  %v10026_v19 = vld [vmem:[%s10455_s3 + $0x390] sm:$0xff] }
0x184d   :  { %v4113_v26 = vpop.xlane.xlu1 %4112 }
0x184e   :  { %v4117_v50 = vmul.f32 0.03125, %v4113_v26  ;;  %v10035_v26 = vld [vmem:[%s10455_s3 + $0x388] sm:$0xff] }
0x184f   :  { %v4110_v42 = vpop.xlane.xlu0 %4109 }
0x1850   :  { %v4121_v52 = vsub.f32 %v10000_v0, %v4117_v50  ;;  %v4116_v59 = vmul.f32 0.03125, %v4110_v42 }
0x1852   :  { %v4120_v28 = vsub.f32 %v10005_v13, %v4116_v59  ;;  %v4125_v6 = vmul.f32 %v4121_v52, %v4121_v52 }
0x1854   :  { %v4135_v46 = vsel %vm261_vm3, %v4125_v6, 0.0  ;;  %v4124_v51 = vmul.f32 %v4120_v28, %v4120_v28 }
0x1855   :  { %4136 = vadd.xlane.f32.xlu1 %v4135_v46 }
0x1856   :  { %v4132_v12 = vsel %vm261_vm3, %v4124_v51, 0.0 }
0x1857   :  { %4133 = vadd.xlane.f32.xlu0 %v4132_v12  ;;  %v8461_v31 = vpop.eup %8460 }
0x1858   :  { %v5028_v27 = vmul.f32 %v8461_v31, %v8457_v40  ;;  %v10042_v40 = vld [vmem:[%s10455_s3 + $0x380] sm:$0xff] }
0x1859   :  { %v8463_v22 = vpop.eup %8462 }
0x185a   :  { %v5026_v9 = vmul.f32 %v8463_v22, %v8459_v3  ;;  %v5296_v22 = vrot.slane %v9730_v8, %v9223_v32 }
0x185c   :  { %8173 = vmatprep.mubr.msk.f32.mxu1 %vm1490_vm5, %v5026_v9 }
0x185d   :  { %8174 = vmatmul.mubr.msk.f32.vlgmr.msra.gmra.mxu1 %vm1490_vm5, %v5028_v27 }
0x185e   :  { %8188 = vmatpush3.msra.mxu1 %v10015_v2  ;;  %8195 = vmatprep.mubr.msk.f32.mxu1 %vm261_vm3, %v9978_v24 }
0x185f   :  { %8189 = vmatprep.subr.mxu1 %v10026_v19 }
0x1860   :  { %8190 = vmatpush3.msra.mxu1 %v10026_v19 }
0x1861   :  { %8191 = vmatprep.subr.mxu1 %v10035_v26 }
0x1862   :  { %8192 = vmatpush3.msra.mxu1 %v10035_v26 }
0x1863   :  { %8193 = vmatprep.subr.mxu1 %v10042_v40 }
0x1864   :  { %8194 = vmatpush3.msra.mxu1 %v10042_v40 }
0x1865   :  { %8196 = vmatmul.mubr.msk.f32.vlgmr.msra.gmra.mxu1 %vm261_vm3, %v9976_v5  ;;  %8209 = vmatprep.subr.mxu1 %v9694_v54  ;;  %v10061_v5 = vld [vmem:[%s10455_s3 + $0x3b8] sm:$0xff] }
0x1866   :  { %8210 = vmatpush3.msra.mxu1 %v9694_v54  ;;  %v10066_v54 = vld [vmem:[%s10455_s3 + $0x3b0] sm:$0xff]  ;;  %8176 = vmatprep.subr.mxu0 %v10061_v5 }
0x1867   :  { %8211 = vmatprep.subr.mxu1 %v9702_v1  ;;  %8177 = vmatpush3.msra.mxu0 %v10061_v5 }
0x1868   :  { %8212 = vmatpush3.msra.mxu1 %v9702_v1  ;;  %v10073_v1 = vld [vmem:[%s10455_s3 + $0x3a8] sm:$0xff]  ;;  %8178 = vmatprep.subr.mxu0 %v10066_v54 }
0x1869   :  { %8213 = vmatprep.subr.mxu1 %v9709_v4  ;;  %8179 = vmatpush3.msra.mxu0 %v10066_v54 }
0x186a   :  { %8214 = vmatpush3.msra.mxu1 %v9709_v4  ;;  %8180 = vmatprep.subr.mxu0 %v10073_v1  ;;  %v10082_v4 = vld [vmem:[%s10455_s3 + $0x3a0] sm:$0xff] }
0x186b   :  { %8215 = vmatprep.subr.mxu1 %v9716_v25  ;;  %8181 = vmatpush3.msra.mxu0 %v10073_v1 }
0x186c   :  { %8216 = vmatpush3.msra.mxu1 %v9716_v25  ;;  %8182 = vmatprep.subr.mxu0 %v10082_v4 }
0x186d   :  { %8183 = vmatpush3.msra.mxu0 %v10082_v4 }
0x186e   :  { %8198 = vmatprep.subr.mxu0 %v9689_v11 }
0x18de   :  { %v4137_v25 = vpop.xlane.xlu1 %4136 }
0x18df   :  { %v4141_v24 = vmul.f32 0.03125, %v4137_v25  ;;  %v5302_v25 = vrot.slane %v9755_v56, %v9223_v32 }
0x18e0   :  { %v4134_v3 = vpop.xlane.xlu0 %4133 }
0x18e1   :  { %v4145_v50 = vadd.f32 1e-05, %v4141_v24  ;;  %v4140_v42 = vmul.f32 0.03125, %v4134_v3 }
0x18e3   :  { %8464 = vrsqrt.f32 %v4145_v50  ;;  %v4144_v59 = vadd.f32 1e-05, %v4140_v42 }
0x18e5   :  { %8466 = vrsqrt.f32 %v4144_v59 }
0x18f0   :  { %v8465_v6 = vpop.eup %8464 }
0x18f1   :  { %v4153_v46 = vmul.f32 %v8465_v6, %v4121_v52 }
0x18f2   :  { %v8467_v51 = vpop.eup %8466 }
0x18f3   :  { %v4163_v12 = vmul.f32 %v9728_v62, %v4153_v46  ;;  %v4152_v31 = vmul.f32 %v8467_v51, %v4120_v28 }
0x18f5   :  { %v4173_v9 = vadd.f32 %v9739_v45, %v4163_v12  ;;  %v4162_v27 = vmul.f32 %v9728_v62, %v4152_v31 }
0x18f7   :  { %v4172_v24 = vadd.f32 %v9739_v45, %v4162_v27  ;;  %v5298_v3 = vmul.f32 %v5296_v22, %v4173_v9 }
0x18f9   :  { %v5297_v50 = vmul.f32 %v5296_v22, %v4172_v24  ;;  %v10095_v42 = vadd.f32 %v5302_v25, %v5298_v3 }
0x18fb   :  { %v10097_v52 = vadd.f32 %v5302_v25, %v5297_v50 }
0x18fd   :  { %8217 = vmatprep.mubr.msk.f32.mxu1 %vm261_vm3, %v10097_v52 }
0x18fe   :  { %8218 = vmatmul.mubr.msk.f32.vlgmr.msra.gmra.mxu1 %vm261_vm3, %v10095_v42 }
0x191d   :  { %v8175_v8 = vpop.f32.mrf.mxu1 }
0x191f   :  { %v5101_v28 = vpop.f32.mrf.mxu1 }
0x1920   :  { %8184 = vmatprep.mubr.msk.f32.mxu0 %vm261_vm3, %v5101_v28 }
0x1921   :  { %8185 = vmatmul.mubr.msk.f32.vlgmr.msra.gmra.mxu0 %vm261_vm3, %v8175_v8 }
0x1922   :  { %8199 = vmatpush3.msra.mxu0 %v9689_v11  ;;  %8206 = vmatprep.mubr.msk.f32.mxu0 %vm261_vm3, %v10097_v52 }
0x1923   :  { %8200 = vmatprep.subr.mxu0 %v9749_v43 }
0x1924   :  { %8201 = vmatpush3.msra.mxu0 %v9749_v43 }
0x1925   :  { %8202 = vmatprep.subr.mxu0 %v9761_v15  ;;  %v8197_v11 = vpop.f32.mrf.mxu1 }
0x1926   :  { %8203 = vmatpush3.msra.mxu0 %v9761_v15 }
0x1927   :  { %8204 = vmatprep.subr.mxu0 %v9770_v58  ;;  %v5268_v62 = vpop.f32.mrf.mxu1 }
0x1928   :  { %8205 = vmatpush3.msra.mxu0 %v9770_v58  ;;  %v7052_v58 = vld [vmem:[%s10457_s4 + $0x1d] ss:$0 sm:$0xff] }
0x1929   :  { %8207 = vmatmul.mubr.msk.f32.vlgmr.msra.gmra.mxu0 %vm261_vm3, %v10095_v42  ;;  %8220 = vmatprep.subr.mxu0 %v9782_v16 }
0x192a   :  { %8221 = vmatpush3.msra.mxu0 %v9782_v16  ;;  %8228 = vmatprep.mubr.msk.f32.mxu0 %vm261_vm3, %v10097_v52  ;;  %v10139_v16 = vadd.f32 %v7052_v58, %v9789_v60 }
0x192b   :  { %8222 = vmatprep.subr.mxu0 %v9796_v18 }
0x192c   :  { %8223 = vmatpush3.msra.mxu0 %v9796_v18  ;;  %v5290_v59 = vrot.slane %v10139_v16, %v8913_v29 }
0x192d   :  { %8224 = vmatprep.subr.mxu0 %v9807_v20 }
0x192e   :  { %8225 = vmatpush3.msra.mxu0 %v9807_v20  ;;  %v10144_v20 = vld [vmem:[%s10457_s4 + $0x27] ss:$0 sm:$0xff] }
0x192f   :  { %8226 = vmatprep.subr.mxu0 %v9814_v23 }
0x1930   :  { %8227 = vmatpush3.msra.mxu0 %v9814_v23 }
0x1931   :  { %8229 = vmatmul.mubr.msk.f32.vlgmr.msra.gmra.mxu0 %vm261_vm3, %v10095_v42 }
0x19be   :  { %v8219_v45 = vpop.f32.mrf.mxu1 }
0x19bf   :  { %v5458_v43 = vadd.f32 %v8219_v45, %v9839_v35 }
0x19c0   :  { %v5452_v56 = vpop.f32.mrf.mxu1 }
0x19c1   :  { %v5453_v15 = vadd.f32 %v9839_v35, %v5452_v56  ;;  %8231 = vmatprep.subr.msk.mxu1 %vm261_vm3, %v5458_v43 }
0x19c2   :  { %8232 = vmatpush3.xpose.msk.msra.mxu1 %vm261_vm3, %v5458_v43 }
0x19c3   :  { %8233 = vmatprep.subr.msk.mxu1 %vm261_vm3, %v5453_v15 }
0x19c6   :  { %8234 = vmatpush3.xpose.msk.msra.mxu1 %vm261_vm3, %v5453_v15 }
0x19c7   :  { %8245 = vmatprep.subr.mxu1 %v9913_v34 }
0x19e1   :  { %v8186_v18 = vpop.f32.mrf.mxu0 }
0x19e2   :  { %v5274_v23 = vadd.f32 %v8197_v11, %v8186_v18 }
0x19e3   :  { %v5187_v35 = vpop.f32.mrf.mxu0 }
0x19e4   :  { %v5286_v6 = vadd.f32 %v10144_v20, %v5274_v23  ;;  %v5269_v46 = vadd.f32 %v5268_v62, %v5187_v35 }
0x19e6   :  { %v10149_v51 = vmul.f32 %v5290_v59, %v5286_v6  ;;  %v5285_v12 = vadd.f32 %v10144_v20, %v5269_v46 }
0x19e8   :  { %v10152_v60 = vmul.f32 %v5290_v59, %v5285_v12 }
0x19e9   :  { %v8208_v31 = vpop.f32.mrf.mxu0 }
0x19ea   :  { %v5383_v27 = vadd.f32 %v8208_v31, %v9844_v21 }
0x19eb   :  { %v5377_v22 = vpop.f32.mrf.mxu0 }
0x19ec   :  { %v5378_v9 = vadd.f32 %v9844_v21, %v5377_v22 }
0x19ee   :  { %8235 = vmatprep.mubr.msk.f32.mxu1 %vm261_vm3, %v5378_v9 }
0x19ef   :  { %8236 = vmatmul.mubr.msk.f32.vlgmr.msra.gmra.mxu1 %vm261_vm3, %v5383_v27 }
0x19f0   :  { %8246 = vmatpush3.msra.mxu1 %v9913_v34  ;;  %8253 = vmatprep.mubr.msk.f32.mxu1 %vm261_vm3, %v10097_v52 }
0x19f1   :  { %8247 = vmatprep.subr.mxu1 %v9920_v48  ;;  %v8230_v25 = vpop.f32.mrf.mxu0 }
0x19f2   :  { %v5533_v24 = vadd.f32 %v8230_v25, %v9856_v55  ;;  %8248 = vmatpush3.msra.mxu1 %v9920_v48 }
0x19f3   :  { %8249 = vmatprep.subr.mxu1 %v9929_v41  ;;  %v5527_v3 = vpop.f32.mrf.mxu0 }
0x19f4   :  { %v5528_v21 = vadd.f32 %v9856_v55, %v5527_v3  ;;  %8250 = vmatpush3.msra.mxu1 %v9929_v41  ;;  %8238 = vmatprep.subr.mxu0 %v5533_v24 }
0x19f5   :  { %8251 = vmatprep.subr.mxu1 %v9936_v49  ;;  %8239 = vmatpush3.msra.mxu0 %v5533_v24 }
0x19f6   :  { %8252 = vmatpush3.msra.mxu1 %v9936_v49  ;;  %8240 = vmatprep.subr.mxu0 %v5528_v21 }
0x19f7   :  { %8254 = vmatmul.mubr.msk.f32.vlgmr.msra.gmra.mxu1 %vm261_vm3, %v10095_v42  ;;  %8267 = vmatprep.subr.mxu1 %v9943_v53 }
0x19f8   :  { %8241 = vmatpush3.msra.mxu0 %v5528_v21  ;;  %8268 = vmatpush3.msra.mxu1 %v9943_v53 }
0x19f9   :  { %8275 = vmatprep.mubr.msk.f32.mxu1 %vm261_vm3, %v10097_v52  ;;  %8269 = vmatprep.subr.mxu1 %v9950_v17 }
0x19fa   :  { %8270 = vmatpush3.msra.mxu1 %v9950_v17  ;;  %8256 = vmatprep.subr.mxu0 %v9861_v30 }
0x19fb   :  { %8271 = vmatprep.subr.mxu1 %v9961_v57 }
0x19fc   :  { %8272 = vmatpush3.msra.mxu1 %v9961_v57 }
0x19fd   :  { %8273 = vmatprep.subr.mxu1 %v9968_v33 }
0x19fe   :  { %8274 = vmatpush3.msra.mxu1 %v9968_v33 }
0x19ff   :  { %8276 = vmatmul.mubr.msk.f32.vlgmr.msra.gmra.mxu1 %vm261_vm3, %v10095_v42 }
0x1aaf   :  { %v8237_v55 = vpop.f32.mrf.mxu1 }
0x1ab0   :  { %v5624_v34 = vmul.f32 0.25, %v8237_v55 }
0x1ab1   :  { %v5614_v48 = vpop.f32.mrf.mxu1 }
0x1ab2   :  { %v5623_v41 = vmul.f32 0.25, %v5614_v48  ;;  %v5628_v49 = vsel %vm1490_vm5, %v5624_v34, -inf }
0x1ab3   :  { %5629 = vmax.xlane.f32.xlu1 %v5628_v49 }
0x1ab4   :  { %v5625_v53 = vsel %vm1490_vm5, %v5623_v41, -inf }
0x1ab5   :  { %5626 = vmax.xlane.f32.xlu0 %v5625_v53 }
0x1ab7   :  { %v8255_v17 = vpop.f32.mrf.mxu1 }
0x1ab9   :  { %v5794_v50 = vpop.f32.mrf.mxu1 }
0x1aba   :  { %v5795_v22 = vadd.f32 %v9983_v44, %v5794_v50 }
0x1abf   :  { %v8277_v57 = vpop.f32.mrf.mxu1 }
0x1ac0   :  { %v5950_v8 = vadd.f32 %v8277_v57, %v9992_v7 }
0x1ac1   :  { %v5944_v28 = vpop.f32.mrf.mxu1 }
0x1ac2   :  { %v5945_v33 = vadd.f32 %v9992_v7, %v5944_v28  ;;  %8285 = vmatprep.subr.mxu1 %v5950_v8 }
0x1ac3   :  { %8286 = vmatpush3.msra.mxu1 %v5950_v8 }
0x1ac4   :  { %8287 = vmatprep.subr.mxu1 %v5945_v33 }
0x1ac5   :  { %8288 = vmatpush3.msra.mxu1 %v5945_v33 }
0x1ac6   :  { %8303 = vmatprep.subr.mxu1 %v10015_v2 }
0x1b3c   :  { %v5630_v11 = vpop.xlane.xlu1 %5629 }
0x1b3d   :  { %v5632_v62 = vsub.f32 %v5624_v34, %v5630_v11 }
0x1b3e   :  { %v5627_v45 = vpop.xlane.xlu0 %5626 }
0x1b3f   :  { %v5635_v43 = vmul.f32 1.442695, %v5632_v62  ;;  %v5631_v56 = vsub.f32 %v5623_v41, %v5627_v45  ;;  %v10229_v41 = vadd.f32 %v10149_v51, %v9565_v61 }
0x1b41   :  { %8468 = vpow2.f32 %v5635_v43  ;;  %v5633_v15 = vmul.f32 1.442695, %v5631_v56  ;;  %v6326_v50 = vsel %vm261_vm3, %v10229_v41, 0.0 }
0x1b43   :  { %8470 = vpow2.f32 %v5633_v15 }
0x1b4e   :  { %v8469_v58 = vpop.eup %8468 }
0x1b4f   :  { %v5640_v18 = vsel %vm1490_vm5, %v8469_v58, 0.0 }
0x1b50   :  { %v8471_v23 = vpop.eup %8470  ;;  %5641 = vadd.xlane.f32.xlu1 %v5640_v18 }
0x1b51   :  { %v5637_v7 = vsel %vm1490_vm5, %v8471_v23, 0.0 }
0x1b52   :  { %5638 = vadd.xlane.f32.xlu0 %v5637_v7 }
0x1bd9   :  { %v5642_v35 = vpop.xlane.xlu1 %5641 }
0x1bda   :  { %8472 = vrcp.f32 %v5642_v35 }
0x1bdb   :  { %v5639_v59 = vpop.xlane.xlu0 %5638 }
0x1bdc   :  { %8474 = vrcp.f32 %v5639_v59 }
0x1be7   :  { %v8473_v6 = vpop.eup %8472 }
0x1be8   :  { %v5646_v31 = vmul.f32 %v8473_v6, %v8469_v58 }
0x1be9   :  { %v8475_v46 = vpop.eup %8474 }
0x1bea   :  { %v5644_v12 = vmul.f32 %v8475_v46, %v8471_v23 }
0x1bec   :  { %8242 = vmatprep.mubr.msk.f32.mxu0 %vm1490_vm5, %v5644_v12 }
0x1bed   :  { %8243 = vmatmul.mubr.msk.f32.vlgmr.msra.gmra.mxu0 %vm1490_vm5, %v5646_v31 }
0x1bee   :  { %8257 = vmatpush3.msra.mxu0 %v9861_v30  ;;  %8264 = vmatprep.mubr.msk.f32.mxu0 %vm261_vm3, %v10097_v52 }
0x1bef   :  { %8258 = vmatprep.subr.mxu0 %v9872_v38 }
0x1bf0   :  { %8259 = vmatpush3.msra.mxu0 %v9872_v38 }
0x1bf1   :  { %8260 = vmatprep.subr.mxu0 %v9880_v14 }
0x1bf2   :  { %8261 = vmatpush3.msra.mxu0 %v9880_v14 }
0x1bf3   :  { %8262 = vmatprep.subr.mxu0 %v9887_v47 }
0x1bf4   :  { %8263 = vmatpush3.msra.mxu0 %v9887_v47  ;;  %v5800_v47 = vadd.f32 %v8255_v17, %v9983_v44  ;;  %v10234_v17 = vadd.f32 %v10152_v60, %v9568_v10 }
0x1bf5   :  { %8265 = vmatmul.mubr.msk.f32.vlgmr.msra.gmra.mxu0 %vm261_vm3, %v10095_v42 }
0x1bf6   :  { %8282 = vmatprep.mubr.msk.f32.mxu0 %vm261_vm3, %v5795_v22  ;;  %v6323_v57 = vsel %vm261_vm3, %v10234_v17, 0.0 }
0x1cad   :  { %v10206_v30 = vpop.f32.mrf.mxu0 }
0x1caf   :  { %v5719_v52 = vpop.f32.mrf.mxu0 }
0x1cb5   :  { %v8266_v9 = vpop.f32.mrf.mxu0 }
0x1cb6   :  { %v5875_v38 = vadd.f32 %v8266_v9, %v9900_v63 }
0x1cb7   :  { %v5869_v27 = vpop.f32.mrf.mxu0 }
0x1cb8   :  { %v5870_v14 = vadd.f32 %v9900_v63, %v5869_v27  ;;  %8278 = vmatprep.subr.msk.mxu0 %vm261_vm3, %v5875_v38  ;;  %v7185_v27 = vld [vmem:[%s10460_s5 + $0x28] sm:$0xff] }
0x1cb9   :  { %8279 = vmatpush3.xpose.msk.msra.mxu0 %vm261_vm3, %v5875_v38  ;;  %v7186_v38 = vld [vmem:[%s10460_s5 + $0x30] sm:$0xff] }
0x1cba   :  { %8280 = vmatprep.subr.msk.mxu0 %vm261_vm3, %v5870_v14 }
0x1cbd   :  { %8281 = vmatpush3.xpose.msk.msra.mxu0 %vm261_vm3, %v5870_v14 }
0x1cbe   :  { %8292 = vmatprep.subr.mxu0 %v10061_v5 }
0x1cc0   :  { %8283 = vmatmul.mubr.msk.f32.vlgmr.msra.gmra.mxu0 %vm261_vm3, %v5800_v47 }
0x1cc1   :  { %8293 = vmatpush3.msra.mxu0 %v10061_v5 }
0x1cc2   :  { %8294 = vmatprep.subr.mxu0 %v10066_v54 }
0x1cc3   :  { %8295 = vmatpush3.msra.mxu0 %v10066_v54 }
0x1cc4   :  { %8296 = vmatprep.subr.mxu0 %v10073_v1 }
0x1cc5   :  { %8297 = vmatpush3.msra.mxu0 %v10073_v1 }
0x1cc6   :  { %8298 = vmatprep.subr.mxu0 %v10082_v4 }
0x1cc7   :  { %8299 = vmatpush3.msra.mxu0 %v10082_v4 }
0x1d80   :  { %v8284_v63 = vpop.f32.mrf.mxu0 }
0x1d81   :  { %v6041_v44 = vmul.f32 0.25, %v8284_v63 }
0x1d82   :  { %v6031_v42 = vpop.f32.mrf.mxu0 }
0x1d83   :  { %v6040_v25 = vmul.f32 0.25, %v6031_v42  ;;  %v6045_v24 = vsel %vm1490_vm5, %v6041_v44, -inf }
0x1d84   :  { %6046 = vmax.xlane.f32.xlu1 %v6045_v24 }
0x1d85   :  { %v6042_v5 = vsel %vm1490_vm5, %v6040_v25, -inf }
0x1d86   :  { %6043 = vmax.xlane.f32.xlu0 %v6042_v5 }
0x1e0d   :  { %v6047_v3 = vpop.xlane.xlu1 %6046 }
0x1e0e   :  { %v6049_v54 = vsub.f32 %v6041_v44, %v6047_v3 }
0x1e0f   :  { %v6044_v21 = vpop.xlane.xlu0 %6043 }
0x1e10   :  { %v6052_v55 = vmul.f32 1.442695, %v6049_v54  ;;  %v6048_v34 = vsub.f32 %v6040_v25, %v6044_v21 }
0x1e12   :  { %8476 = vpow2.f32 %v6052_v55  ;;  %v6050_v1 = vmul.f32 1.442695, %v6048_v34 }
0x1e14   :  { %8478 = vpow2.f32 %v6050_v1 }
0x1e1f   :  { %v8477_v48 = vpop.eup %8476 }
0x1e20   :  { %v6057_v4 = vsel %vm1490_vm5, %v8477_v48, 0.0 }
0x1e21   :  { %v8479_v49 = vpop.eup %8478  ;;  %6058 = vadd.xlane.f32.xlu1 %v6057_v4 }
0x1e22   :  { %v6054_v53 = vsel %vm1490_vm5, %v8479_v49, 0.0 }
0x1e23   :  { %6055 = vadd.xlane.f32.xlu0 %v6054_v53 }
0x1e25   :  { %6327 = vadd.xlane.f32.xlu1 %v6326_v50 }
0x1e27   :  { %6324 = vadd.xlane.f32.xlu0 %v6323_v57  ;;  %v7066_v57 = vld [vmem:[%s10457_s4 + $0x1f] ss:$0 sm:$0xff] }
0x1eaa   :  { %v6059_v8 = vpop.xlane.xlu1 %6058 }
0x1eab   :  { %8480 = vrcp.f32 %v6059_v8  ;;  %v10306_v8 = vld [vmem:[%s10457_s4 + $0x19] ss:$0 sm:$0xff] }
0x1eac   :  { %v6056_v61 = vpop.xlane.xlu0 %6055 }
0x1ead   :  { %8482 = vrcp.f32 %v6056_v61 }
0x1eb8   :  { %v8481_v51 = vpop.eup %8480 }
0x1eb9   :  { %v6063_v11 = vmul.f32 %v8481_v51, %v8477_v48 }
0x1eba   :  { %v8483_v28 = vpop.eup %8482 }
0x1ebb   :  { %v6061_v33 = vmul.f32 %v8483_v28, %v8479_v49  ;;  %v7059_v49 = vld [vmem:[%s10457_s4 + $0x1e] ss:$0 sm:$0xff] }
0x1ebc   :  { %v3929_v53 = vadd.f32 %v7059_v49, %v9820_v36  ;;  %v10316_v36 = vadd.f32 %v7066_v57, %v9832_v39 }
0x1ebd   :  { %8289 = vmatprep.mubr.msk.f32.mxu1 %vm1490_vm5, %v6061_v33  ;;  %v10313_v33 = vld [vmem:[%s10457_s4 + $0x1a] ss:$0 sm:$0xff] }
0x1ebe   :  { %8290 = vmatmul.mubr.msk.f32.vlgmr.msra.gmra.mxu1 %vm1490_vm5, %v6063_v11  ;;  %v10308_v61 = vadd.f32 1.0, %v3929_v53 }
0x1ebf   :  { %8304 = vmatpush3.msra.mxu1 %v10015_v2  ;;  %8311 = vmatprep.mubr.msk.f32.mxu1 %vm261_vm3, %v5719_v52  ;;  %v6328_v2 = vpop.xlane.xlu1 %6327 }
0x1ec0   :  { %8305 = vmatprep.subr.mxu1 %v10026_v19  ;;  %v6336_v43 = vmul.f32 0.03125, %v6328_v2 }
0x1ec1   :  { %8306 = vmatpush3.msra.mxu1 %v10026_v19  ;;  %v6325_v19 = vpop.xlane.xlu0 %6324 }
0x1ec2   :  { %8307 = vmatprep.subr.mxu1 %v10035_v26  ;;  %v6335_v58 = vmul.f32 0.03125, %v6325_v19  ;;  %v6340_v7 = vsub.f32 %v10229_v41, %v6336_v43  ;;  %v6405_v19 = vrot.slane %v10316_v36, %v8913_v29 }
0x1ec3   :  { %8308 = vmatpush3.msra.mxu1 %v10035_v26 }
0x1ec4   :  { %8309 = vmatprep.subr.mxu1 %v10042_v40  ;;  %v6339_v6 = vsub.f32 %v10234_v17, %v6335_v58  ;;  %v6344_v22 = vmul.f32 %v6340_v7, %v6340_v7  ;;  %v7207_v58 = vld [vmem:[%s10461_s6 + $0xe8] sm:$0xff] }
0x1ec5   :  { %8310 = vmatpush3.msra.mxu1 %v10042_v40  ;;  %v6312_v40 = vrot.slane %v10139_v16, %v9223_v32 }
0x1ec6   :  { %8312 = vmatmul.mubr.msk.f32.vlgmr.msra.gmra.mxu1 %vm261_vm3, %v10206_v30  ;;  %v6343_v52 = vmul.f32 %v6339_v6, %v6339_v6 }
0x1ec8   :  { %v6347_v9 = vsel %vm261_vm3, %v6343_v52, 0.0  ;;  %v7196_v52 = vld [vmem:[%s10461_s6 + $0x90] sm:$0xff] }
0x1f7e   :  { %v8291_v10 = vpop.f32.mrf.mxu1 }
0x1f80   :  { %v6136_v60 = vpop.f32.mrf.mxu1 }
0x1f81   :  { %8300 = vmatprep.mubr.msk.f32.mxu0 %vm261_vm3, %v6136_v60  ;;  %v6399_v60 = vrot.slane %v10308_v61, %v8913_v29 }
0x1f82   :  { %8301 = vmatmul.mubr.msk.f32.vlgmr.msra.gmra.mxu0 %vm261_vm3, %v8291_v10 }
0x1f86   :  { %v8313_v62 = vpop.f32.mrf.mxu1 }
0x1f88   :  { %v6298_v26 = vpop.f32.mrf.mxu1 }
0x2042   :  { %v8302_v45 = vpop.f32.mrf.mxu0 }
0x2043   :  { %v6304_v56 = vadd.f32 %v8313_v62, %v8302_v45 }
0x2044   :  { %v6217_v15 = vpop.f32.mrf.mxu0 }
0x2045   :  { %v6308_v18 = vadd.f32 %v10144_v20, %v6304_v56  ;;  %v6299_v23 = vadd.f32 %v6298_v26, %v6217_v15  ;;  %v7209_v15 = vld [vmem:[%s10461_s6 + $0xf8] sm:$0xff] }
0x2046   :  { %8328 = vmatprep.subr.mxu1 %v7209_v15 }
0x2047   :  { %v6314_v35 = vmul.f32 %v6312_v40, %v6308_v18  ;;  %v6307_v59 = vadd.f32 %v10144_v20, %v6299_v23  ;;  %v6350_v20 = vsel %vm261_vm3, %v6344_v22, 0.0  ;;  %8329 = vmatpush3.msra.mxu1 %v7209_v15  ;;  %v7206_v18 = vld [vmem:[%s10461_s6 + $0xe0] sm:$0xff]  ;;  %v7205_v23 = vld [vmem:[%s10461_s6 + $0xd8] sm:$0xff] }
0x2048   :  { %v7198_v22 = vld [vmem:[%s10461_s6 + $0xa0] sm:$0xff] }
0x2049   :  { %v6313_v46 = vmul.f32 %v6312_v40, %v6307_v59  ;;  %v10261_v12 = vadd.f32 %v6314_v35, %v10000_v0  ;;  %v7188_v0 = vld [vmem:[%s10460_s5 + $0x40] sm:$0xff]  ;;  %v7208_v40 = vld [vmem:[%s10461_s6 + $0xf0] sm:$0xff]  ;;  %v7203_v35 = vld [vmem:[%s10461_s6 + $0xc8] sm:$0xff] }
0x204a   :  { %8314 = vmatprep.subr.mxu0 %v7188_v0  ;;  %8330 = vmatprep.subr.mxu1 %v7208_v40  ;;  %v7202_v59 = vld [vmem:[%s10461_s6 + $0xc0] sm:$0xff] }
0x204b   :  { %v6332_v31 = vsel %vm261_vm3, %v10261_v12, 0.0  ;;  %v10266_v16 = vadd.f32 %v6313_v46, %v10005_v13  ;;  %v7187_v13 = vld [vmem:[%s10460_s5 + $0x38] sm:$0xff]  ;;  %8315 = vmatpush3.msra.mxu0 %v7188_v0  ;;  %8331 = vmatpush3.msra.mxu1 %v7208_v40  ;;  %v7200_v46 = vld [vmem:[%s10461_s6 + $0xb0] sm:$0xff] }
0x204c   :  { %6333 = vadd.xlane.f32.xlu1 %v6332_v31  ;;  %8316 = vmatprep.subr.mxu0 %v7187_v13  ;;  %v7199_v31 = vld [vmem:[%s10461_s6 + $0xa8] sm:$0xff] }
0x204d   :  { %v6329_v30 = vsel %vm261_vm3, %v10266_v16, 0.0  ;;  %8317 = vmatpush3.msra.mxu0 %v7187_v13  ;;  %8332 = vmatprep.subr.mxu1 %v7207_v58 }
0x204e   :  { %6330 = vadd.xlane.f32.xlu0 %v6329_v30  ;;  %8318 = vmatprep.subr.mxu0 %v7186_v38  ;;  %v7197_v30 = vld [vmem:[%s10461_s6 + $0x98] sm:$0xff] }
0x204f   :  { %8319 = vmatpush3.msra.mxu0 %v7186_v38  ;;  %8333 = vmatpush3.msra.mxu1 %v7207_v58 }
0x2050   :  { %6351 = vadd.xlane.f32.xlu1 %v6350_v20  ;;  %8320 = vmatprep.subr.mxu0 %v7185_v27  ;;  %v7195_v20 = vld [vmem:[%s10461_s6 + $0x88] sm:$0xff] }
0x2051   :  { %8321 = vmatpush3.msra.mxu0 %v7185_v27  ;;  %8334 = vmatprep.subr.mxu1 %v7206_v18 }
0x2052   :  { %6348 = vadd.xlane.f32.xlu0 %v6347_v9  ;;  %8335 = vmatpush3.msra.mxu1 %v7206_v18  ;;  %v7194_v9 = vld [vmem:[%s10461_s6 + $0x80] sm:$0xff] }
0x2053   :  { %8336 = vmatprep.subr.mxu1 %v7205_v23 }
0x2054   :  { %8337 = vmatpush3.msra.mxu1 %v7205_v23 }
0x20d5   :  { %v6334_v14 = vpop.xlane.xlu1 %6333 }
0x20d6   :  { %v6338_v47 = vmul.f32 0.03125, %v6334_v14 }
0x20d7   :  { %v6331_v63 = vpop.xlane.xlu0 %6330 }
0x20d8   :  { %v10285_v44 = vsub.f32 %v10261_v12, %v6338_v47  ;;  %v6337_v42 = vmul.f32 0.03125, %v6331_v63 }
0x20d9   :  { %v6352_v25 = vpop.xlane.xlu1 %6351 }
0x20da   :  { %v10288_v24 = vsub.f32 %v10266_v16, %v6337_v42  ;;  %v6360_v5 = vmul.f32 0.03125, %v6352_v25  ;;  %v6346_v3 = vmul.f32 %v10285_v44, %v10285_v44 }
0x20db   :  { %v6349_v54 = vpop.xlane.xlu0 %6348 }
0x20dc   :  { %v6364_v21 = vadd.f32 1e-05, %v6360_v5  ;;  %v6359_v55 = vmul.f32 0.03125, %v6349_v54  ;;  %v6356_v34 = vsel %vm261_vm3, %v6346_v3, 0.0  ;;  %v6345_v1 = vmul.f32 %v10288_v24, %v10288_v24 }
0x20dd   :  { %6357 = vadd.xlane.f32.xlu1 %v6356_v34  ;;  %v6411_v54 = vrot.slane %v10308_v61, %v9223_v32  ;;  %v6417_v34 = vrot.slane %v10316_v36, %v9223_v32 }
0x20de   :  { %8484 = vrsqrt.f32 %v6364_v21  ;;  %v6363_v48 = vadd.f32 1e-05, %v6359_v55  ;;  %v6353_v4 = vsel %vm261_vm3, %v6345_v1, 0.0 }
0x20df   :  { %6354 = vadd.xlane.f32.xlu0 %v6353_v4 }
0x20e0   :  { %8486 = vrsqrt.f32 %v6363_v48 }
0x20eb   :  { %v8485_v50 = vpop.eup %8484 }
0x20ec   :  { %v6372_v51 = vmul.f32 %v8485_v50, %v6340_v7  ;;  %v7204_v7 = vld [vmem:[%s10461_s6 + $0xd0] sm:$0xff] }
0x20ed   :  { %v8487_v28 = vpop.eup %8486  ;;  %8338 = vmatprep.subr.mxu1 %v7204_v7 }
0x20ee   :  { %v6382_v11 = vmul.f32 %v10306_v8, %v6372_v51  ;;  %v6371_v10 = vmul.f32 %v8487_v28, %v6339_v6  ;;  %8339 = vmatpush3.msra.mxu1 %v7204_v7  ;;  %v7201_v6 = vld [vmem:[%s10461_s6 + $0xb8] sm:$0xff] }
0x20ef   :  { %8340 = vmatprep.subr.mxu1 %v7203_v35 }
0x20f0   :  { %v6381_v2 = vmul.f32 %v10306_v8, %v6371_v10  ;;  %v6392_v62 = vadd.f32 %v10313_v33, %v6382_v11  ;;  %8341 = vmatpush3.msra.mxu1 %v7203_v35 }
0x20f1   :  { %8342 = vmatprep.subr.mxu1 %v7202_v59 }
0x20f2   :  { %v6391_v45 = vadd.f32 %v10313_v33, %v6381_v2  ;;  %v6401_v43 = vmul.f32 %v6399_v60, %v6392_v62  ;;  %8343 = vmatpush3.msra.mxu1 %v7202_v59  ;;  %v7073_v62 = vld [vmem:[%s10457_s4 + $0x20] ss:$0 sm:$0xff] }
0x20f3   :  { %8344 = vmatprep.subr.mxu1 %v7201_v6 }
0x20f4   :  { %v6400_v56 = vmul.f32 %v6399_v60, %v6391_v45  ;;  %v6407_v26 = vadd.f32 %v6405_v19, %v6401_v43  ;;  %8345 = vmatpush3.msra.mxu1 %v7201_v6  ;;  %v7211_v45 = vld [vmem:[%s10457_s4 + $0x28] ss:$0 sm:$0xff] }
0x20f5   :  { %8346 = vmatprep.subr.mxu1 %v7200_v46 }
0x20f6   :  { %v6406_v39 = vadd.f32 %v6405_v19, %v6400_v56  ;;  %8347 = vmatpush3.msra.mxu1 %v7200_v46  ;;  %v4095_v19 = vadd.f32 %v7073_v62, %v9824_v37 }
0x20f7   :  { %8348 = vmatprep.subr.mxu1 %v7199_v31 }
0x20f8   :  { %8322 = vmatprep.mubr.msk.f32.mxu0 %vm261_vm3, %v6406_v39  ;;  %8349 = vmatpush3.msra.mxu1 %v7199_v31  ;;  %v6644_v56 = vrot.slane %v4095_v19, %v8913_v29  ;;  %v6650_v59 = vrot.slane %v4095_v19, %v9223_v32 }
0x20f9   :  { %8323 = vmatmul.mubr.msk.f32.vlgmr.msra.gmra.mxu0 %vm261_vm3, %v6407_v26  ;;  %8350 = vmatprep.subr.mxu1 %v7198_v22 }
0x20fa   :  { %8351 = vmatpush3.msra.mxu1 %v7198_v22 }
0x20fb   :  { %8352 = vmatprep.subr.mxu1 %v7197_v30 }
0x20fc   :  { %8353 = vmatpush3.msra.mxu1 %v7197_v30 }
0x20fd   :  { %8354 = vmatprep.subr.mxu1 %v7196_v52 }
0x20fe   :  { %8355 = vmatpush3.msra.mxu1 %v7196_v52 }
0x20ff   :  { %8356 = vmatprep.subr.mxu1 %v7195_v20 }
0x2100   :  { %8357 = vmatpush3.msra.mxu1 %v7195_v20 }
0x2101   :  { %8358 = vmatprep.subr.mxu1 %v7194_v9 }
0x2102   :  { %8359 = vmatpush3.msra.mxu1 %v7194_v9 }
0x2166   :  { %v6358_v0 = vpop.xlane.xlu1 %6357 }
0x2167   :  { %v6362_v13 = vmul.f32 0.03125, %v6358_v0 }
0x2168   :  { %v6355_v38 = vpop.xlane.xlu0 %6354 }
0x2169   :  { %v6366_v27 = vadd.f32 1e-05, %v6362_v13  ;;  %v6361_v14 = vmul.f32 0.03125, %v6355_v38 }
0x216b   :  { %8488 = vrsqrt.f32 %v6366_v27  ;;  %v6365_v47 = vadd.f32 1e-05, %v6361_v14 }
0x216d   :  { %8490 = vrsqrt.f32 %v6365_v47 }
0x2178   :  { %v8489_v63 = vpop.eup %8488 }
0x2179   :  { %v6374_v42 = vmul.f32 %v8489_v63, %v10285_v44 }
0x217a   :  { %v8491_v25 = vpop.eup %8490 }
0x217b   :  { %v6373_v5 = vmul.f32 %v8491_v25, %v10288_v24  ;;  %v6384_v3 = vmul.f32 %v10306_v8, %v6374_v42  ;;  %v7189_v24 = vld [vmem:[%s10460_s5 + $0x48] sm:$0xff] }
0x217c   :  { %v6429_v53 = vrot.slane %v7189_v24, %v8913_v29  ;;  %v6734_v25 = vld [vmem:[%s10462_s7 + $0x8] sm:$0xff] }
0x217d   :  { %v6383_v21 = vmul.f32 %v10306_v8, %v6373_v5  ;;  %v6394_v55 = vadd.f32 %v10313_v33, %v6384_v3  ;;  %v6733_v5 = vld [vmem:[%s10462_s7] sm:$0xff] }
0x217f   :  { %v6393_v1 = vadd.f32 %v10313_v33, %v6383_v21  ;;  %v6413_v48 = vmul.f32 %v6411_v54, %v6394_v55 }
0x2181   :  { %v6412_v4 = vmul.f32 %v6411_v54, %v6393_v1  ;;  %v6419_v44 = vadd.f32 %v6417_v34, %v6413_v48 }
0x2183   :  { %v6418_v49 = vadd.f32 %v6417_v34, %v6412_v4 }
0x2185   :  { %8325 = vmatprep.mubr.msk.f32.mxu0 %vm261_vm3, %v6418_v49 }
0x2186   :  { %8326 = vmatmul.mubr.msk.f32.gmra.mxu0 %vm261_vm3, %v6419_v44 }
0x21b9   :  { %v8324_v50 = vpop.f32.mrf.mxu0 }
0x21ba   :  { %v6514_v57 = vadd.f32 %v8324_v50, %v6429_v53 }
0x21bb   :  { %v6508_v8 = vpop.f32.mrf.mxu0 }
0x21bc   :  { %v6509_v61 = vadd.f32 %v6508_v8, %v6429_v53  ;;  %v6528_v28 = vmax.f32 %v6514_v57, 0.0 }
0x21be   :  { %v6527_v51 = vmax.f32 %v6509_v61, 0.0 }
0x21c0   :  { %8360 = vmatprep.mubr.f32.mxu1 %v6527_v51 }
0x21c1   :  { %8361 = vmatmul.mubr.f32.vlgmr.msra.gmra.mxu1 %v6528_v28 }
0x2246   :  { %v8327_v33 = vpop.f32.mrf.mxu0 }
0x2247   :  { %v6524_v36 = vadd.f32 %v8327_v33, %v6429_v53  ;;  %v7214_v33 = vld [vmem:[%s10457_s4 + $0x3] ss:$0 sm:$0xff] }
0x2248   :  { %v6518_v11 = vpop.f32.mrf.mxu0 }
0x2249   :  { %v6519_v10 = vadd.f32 %v6518_v11, %v6429_v53  ;;  %v6530_v2 = vmax.f32 %v6524_v36, 0.0 }
0x224b   :  { %v6529_v60 = vmax.f32 %v6519_v10, 0.0 }
0x224d   :  { %8363 = vmatprep.mubr.f32.mxu1 %v6529_v60  ;;  %v7215_v60 = vld [vmem:[%s10457_s4 + $0x4] ss:$0 sm:$0xff] }
0x224e   :  { %8364 = vmatmul.mubr.f32.gmra.mxu1 %v6530_v2 }
0x2281   :  { %v8362_v43 = vpop.f32.mrf.mxu1 }
0x2282   :  { %v6628_v26 = vadd.f32 %v8362_v43, %v7211_v45 }
0x2283   :  { %v6622_v39 = vpop.f32.mrf.mxu1 }
0x2284   :  { %v6646_v15 = vmul.f32 %v6644_v56, %v6628_v26  ;;  %v6623_v40 = vadd.f32 %v7211_v45, %v6622_v39 }
0x2286   :  { %v6645_v58 = vmul.f32 %v6644_v56, %v6623_v40  ;;  %v6654_v18 = vadd.f32 %v6646_v15, %v10229_v41 }
0x2288   :  { %v6664_v23 = vsel %vm261_vm3, %v6654_v18, 0.0  ;;  %v6653_v7 = vadd.f32 %v6645_v58, %v10234_v17 }
0x2289   :  { %6665 = vadd.xlane.f32.xlu1 %v6664_v23 }
0x228a   :  { %v6661_v37 = vsel %vm261_vm3, %v6653_v7, 0.0 }
0x228b   :  { %6662 = vadd.xlane.f32.xlu0 %v6661_v37 }
0x230e   :  { %v8365_v35 = vpop.f32.mrf.mxu1 }
0x230f   :  { %v6638_v6 = vadd.f32 %v8365_v35, %v7211_v45 }
0x2310   :  { %v6632_v46 = vpop.f32.mrf.mxu1 }
0x2311   :  { %v6652_v31 = vmul.f32 %v6650_v59, %v6638_v6  ;;  %v6633_v22 = vadd.f32 %v7211_v45, %v6632_v46  ;;  %v6737_v6 = vld [vmem:[%s10462_s7 + $0x20] sm:$0xff] }
0x2312   :  { %v6666_v30 = vpop.xlane.xlu1 %6665  ;;  %v6741_v46 = vrot.slane %v6737_v6, %v8913_v29 }
0x2313   :  { %v6651_v52 = vmul.f32 %v6650_v59, %v6633_v22  ;;  %v6674_v20 = vmul.f32 0.03125, %v6666_v30  ;;  %v6656_v41 = vadd.f32 %v6652_v31, %v10261_v12  ;;  %v6736_v12 = vld [vmem:[%s10462_s7 + $0x18] sm:$0xff] }
0x2314   :  { %v6663_v9 = vpop.xlane.xlu0 %6662  ;;  %8366 = vmatprep.subr.mxu0 %v6736_v12 }
0x2315   :  { %v6678_v0 = vsub.f32 %v6654_v18, %v6674_v20  ;;  %v6673_v13 = vmul.f32 0.03125, %v6663_v9  ;;  %v6670_v17 = vsel %vm261_vm3, %v6656_v41, 0.0  ;;  %v6655_v38 = vadd.f32 %v6651_v52, %v10266_v16  ;;  %v6735_v16 = vld [vmem:[%s10462_s7 + $0x10] sm:$0xff]  ;;  %8367 = vmatpush3.msra.mxu0 %v6736_v12 }
0x2316   :  { %6671 = vadd.xlane.f32.xlu1 %v6670_v17  ;;  %8368 = vmatprep.subr.mxu0 %v6735_v16 }
0x2317   :  { %v6677_v27 = vsub.f32 %v6653_v7, %v6673_v13  ;;  %v6667_v32 = vsel %vm261_vm3, %v6655_v38, 0.0  ;;  %v6682_v14 = vmul.f32 %v6678_v0, %v6678_v0  ;;  %8369 = vmatpush3.msra.mxu0 %v6735_v16 }
0x2318   :  { %6668 = vadd.xlane.f32.xlu0 %v6667_v32  ;;  %8370 = vmatprep.subr.mxu0 %v6734_v25 }
0x2319   :  { %v6688_v47 = vsel %vm261_vm3, %v6682_v14, 0.0  ;;  %v6681_v63 = vmul.f32 %v6677_v27, %v6677_v27  ;;  %8371 = vmatpush3.msra.mxu0 %v6734_v25 }
0x231a   :  { %6689 = vadd.xlane.f32.xlu1 %v6688_v47  ;;  %8372 = vmatprep.subr.mxu0 %v6733_v5 }
0x231b   :  { %v6685_v42 = vsel %vm261_vm3, %v6681_v63, 0.0  ;;  %8373 = vmatpush3.msra.mxu0 %v6733_v5 }
0x231c   :  { %6686 = vadd.xlane.f32.xlu0 %v6685_v42 }
0x239f   :  { %v6672_v3 = vpop.xlane.xlu1 %6671 }
0x23a0   :  { %v6676_v54 = vmul.f32 0.03125, %v6672_v3 }
0x23a1   :  { %v6669_v21 = vpop.xlane.xlu0 %6668 }
0x23a2   :  { %v6680_v55 = vsub.f32 %v6656_v41, %v6676_v54  ;;  %v6675_v34 = vmul.f32 0.03125, %v6669_v21 }
0x23a3   :  { %v6690_v1 = vpop.xlane.xlu1 %6689 }
0x23a4   :  { %v6679_v48 = vsub.f32 %v6655_v38, %v6675_v34  ;;  %v6698_v4 = vmul.f32 0.03125, %v6690_v1  ;;  %v6684_v44 = vmul.f32 %v6680_v55, %v6680_v55 }
0x23a5   :  { %v6687_v49 = vpop.xlane.xlu0 %6686 }
0x23a6   :  { %v6702_v24 = vadd.f32 1e-05, %v6698_v4  ;;  %v6697_v53 = vmul.f32 0.03125, %v6687_v49  ;;  %v6694_v50 = vsel %vm261_vm3, %v6684_v44, 0.0  ;;  %v6683_v57 = vmul.f32 %v6679_v48, %v6679_v48 }
0x23a7   :  { %6695 = vadd.xlane.f32.xlu1 %v6694_v50 }
0x23a8   :  { %8492 = vrsqrt.f32 %v6702_v24  ;;  %v6701_v8 = vadd.f32 1e-05, %v6697_v53  ;;  %v6691_v61 = vsel %vm261_vm3, %v6683_v57, 0.0 }
0x23a9   :  { %6692 = vadd.xlane.f32.xlu0 %v6691_v61 }
0x23aa   :  { %8494 = vrsqrt.f32 %v6701_v8 }
0x23b5   :  { %v8493_v51 = vpop.eup %8492 }
0x23b6   :  { %v6710_v28 = vmul.f32 %v8493_v51, %v6678_v0 }
0x23b7   :  { %v8495_v36 = vpop.eup %8494 }
0x23b8   :  { %v6709_v11 = vmul.f32 %v8495_v36, %v6677_v27  ;;  %v6720_v10 = vmul.f32 %v7214_v33, %v6710_v28 }
0x23ba   :  { %v6719_v2 = vmul.f32 %v7214_v33, %v6709_v11  ;;  %v6730_v19 = vadd.f32 %v7215_v60, %v6720_v10 }
0x23bc   :  { %v6729_v62 = vadd.f32 %v7215_v60, %v6719_v2 }
0x23be   :  { %8374 = vmatprep.mubr.msk.f32.mxu0 %vm261_vm3, %v6729_v62 }
0x23bf   :  { %8375 = vmatmul.mubr.msk.f32.vlgmr.msra.gmra.mxu0 %vm261_vm3, %v6730_v19 }
0x2430   :  { %v6696_v45 = vpop.xlane.xlu1 %6695 }
0x2431   :  { %v6700_v43 = vmul.f32 0.03125, %v6696_v45 }
0x2432   :  { %v6693_v56 = vpop.xlane.xlu0 %6692 }
0x2433   :  { %v6704_v26 = vadd.f32 1e-05, %v6700_v43  ;;  %v6699_v39 = vmul.f32 0.03125, %v6693_v56 }
0x2435   :  { %8496 = vrsqrt.f32 %v6704_v26  ;;  %v6703_v15 = vadd.f32 1e-05, %v6699_v39 }
0x2437   :  { %8498 = vrsqrt.f32 %v6703_v15 }
0x2442   :  { %v8497_v40 = vpop.eup %8496 }
0x2443   :  { %v6712_v58 = vmul.f32 %v8497_v40, %v6680_v55 }
0x2444   :  { %v8499_v18 = vpop.eup %8498 }
0x2445   :  { %v6711_v23 = vmul.f32 %v8499_v18, %v6679_v48  ;;  %v6722_v7 = vmul.f32 %v7214_v33, %v6712_v58 }
0x2447   :  { %v6721_v37 = vmul.f32 %v7214_v33, %v6711_v23  ;;  %v6732_v59 = vadd.f32 %v7215_v60, %v6722_v7 }
0x2449   :  { %v6731_v35 = vadd.f32 %v7215_v60, %v6721_v37 }
0x244b   :  { %8377 = vmatprep.mubr.msk.f32.mxu0 %vm261_vm3, %v6731_v35 }
0x244c   :  { %8378 = vmatmul.mubr.msk.f32.gmra.mxu0 %vm261_vm3, %v6732_v59 }
0x247f   :  { %v8376_v31 = vpop.f32.mrf.mxu0 }
0x2480   :  { %v6826_v22 = vadd.f32 %v8376_v31, %v6741_v46 }
0x2481   :  { %v6820_v30 = vpop.f32.mrf.mxu0 }
0x2482   :  { %6840 = vst.msk [vmem:[%s10463_s8 + $0x8] sm:$0xff] %vm442_vm4, %v6826_v22  ;;  %v6821_v52 = vadd.f32 %v6820_v30, %v6741_v46 }
0x2484   :  { %6839 = vst.msk [vmem:[%s10463_s8] sm:$0xff] %vm442_vm4, %v6821_v52 }
0x250c   :  { %v8379_v20 = vpop.f32.mrf.mxu0 }
0x250d   :  { %v6836_v41 = vadd.f32 %v8379_v20, %v6741_v46 }
0x250e   :  { %v6830_v9 = vpop.f32.mrf.mxu0 }
0x250f   :  { %6842 = vst.msk [vmem:[%s10463_s8 + $0x18] sm:$0xff] %vm442_vm4, %v6836_v41  ;;  %v6831_v29 = vadd.f32 %v6830_v9, %v6741_v46 }
0x2511   :  { %6841 = vst.msk [vmem:[%s10463_s8 + $0x10] sm:$0xff] %vm442_vm4, %v6831_v29 }

</bundles_post_ra>
